<compile_context>
chip_gen: v7x
topology: tpu7x:2x2x1
jax: 0.10.0
libtpu: 0.0.40
codegen_flags: <defaults>
</compile_context>

<pallas_src>
import jax
import jax.numpy as jnp
from jax import lax
from jax.experimental import pallas as pl
from jax.experimental.pallas import tpu as pltpu

BN_EPS = 1e-5
VMEM_LIMIT = 32 * 1024 * 1024   # conservative scoped-VMEM request (v7x-safe)


def _pick_tile_m(m):
    """Largest row tile <= 256 that divides M (M = B*H*W is a multiple of 8 here)."""
    for t in (256, 128, 64, 32, 16, 8):
        if m % t == 0:
            return t
    return m


# ------------------------------ Pallas kernels ------------------------------

def _bnrelu_mm_bnrelu_kernel(x_ref, s1_ref, b1_ref, w_ref, s2_ref, b2_ref, o_ref):
    """o = relu( (relu(x*s1 + b1) @ W) * s2 + b2 )   (conv1 path).

    x: (TM, Cin) f32   W: (Cin, P) bf16   s*/b*: (1, C) f32   o: (TM, P) bf16
    """
    pre = jnp.maximum(x_ref[...] * s1_ref[...] + b1_ref[...], 0.0)
    acc = jnp.dot(pre.astype(jnp.bfloat16), w_ref[...],
                  preferred_element_type=jnp.float32)
    o_ref[...] = jnp.maximum(acc * s2_ref[...] + b2_ref[...], 0.0).astype(o_ref.dtype)


def _bnrelu_mm_kernel(x_ref, s1_ref, b1_ref, w_ref, o_ref):
    """o = relu(x*s1 + b1) @ W   (projection-shortcut path, f32 output)."""
    pre = jnp.maximum(x_ref[...] * s1_ref[...] + b1_ref[...], 0.0)
    o_ref[...] = jnp.dot(pre.astype(jnp.bfloat16), w_ref[...],
                         preferred_element_type=jnp.float32).astype(o_ref.dtype)


def _mm_residual_kernel(x_ref, w_ref, res_ref, o_ref):
    """o = x @ W + res   (conv3 + fused residual add).

    x: (TM, P) bf16   W: (P, 4P) bf16   res: (TM, 4P) f32   o: (TM, 4P) f32
    """
    acc = jnp.dot(x_ref[...], w_ref[...], preferred_element_type=jnp.float32)
    o_ref[...] = (acc + res_ref[...]).astype(o_ref.dtype)


def _conv3x3_bnrelu_kernel(x_ref, w_ref, s_ref, b_ref, o_ref, pad_ref, slab_ref):
    """3x3 conv (stride 1, pad 1) + BN + ReLU for one image per grid step.

    x: (1, H, W, C) bf16    w: (9*C, C) bf16    s/b: (1, C) f32
    o: (1, H*W, C) bf16
    pad_ref : (H+2, W+2, C) f32 VMEM scratch (zero-padded input tile)
    slab_ref: (H, W, 9*C)  f32 VMEM scratch (im2col slab built inside VMEM)
    """
    H, W, C = x_ref.shape[1], x_ref.shape[2], x_ref.shape[3]
    pad_ref[...] = jnp.zeros_like(pad_ref)
    pad_ref[1:H + 1, 1:W + 1, :] = x_ref[0].astype(jnp.float32)
    for kh in range(3):                    # static unroll: 9 VMEM window copies
        for kw in range(3):
            t = kh * 3 + kw
            slab_ref[:, :, t * C:(t + 1) * C] = pad_ref[kh:kh + H, kw:kw + W, :]
    patches = slab_ref[...].reshape(H * W, 9 * C).astype(jnp.bfloat16)
    acc = jnp.dot(patches, w_ref[...], preferred_element_type=jnp.float32)
    o_ref[0] = jnp.maximum(acc * s_ref[...] + b_ref[...], 0.0).astype(o_ref.dtype)


# ------------------------------ JAX wrappers --------------------------------

def conv1x1_pre_post(x_flat, s1, b1, w1, s2, b2):
    """(M, Cin) f32 -> (M, P) bf16 :  relu(bn2(conv1(relu(bn1(x)))))."""
    M, Cin = x_flat.shape
    P = w1.shape[1]
    TM = _pick_tile_m(M)
    return pl.pallas_call(
        _bnrelu_mm_bnrelu_kernel,
        out_shape=jax.ShapeDtypeStruct((M, P), jnp.bfloat16),
        grid=(M // TM,),
        in_specs=[
            pl.BlockSpec((TM, Cin), lambda i: (i, 0)),
            pl.BlockSpec((1, Cin), lambda i: (0, 0)),
            pl.BlockSpec((1, Cin), lambda i: (0, 0)),
            pl.BlockSpec((Cin, P), lambda i: (0, 0)),
            pl.BlockSpec((1, P), lambda i: (0, 0)),
            pl.BlockSpec((1, P), lambda i: (0, 0)),
        ],
        out_specs=pl.BlockSpec((TM, P), lambda i: (i, 0)),
        compiler_params=pltpu.CompilerParams(
            dimension_semantics=("parallel",), vmem_limit_bytes=VMEM_LIMIT),
    )(x_flat, s1.reshape(1, Cin), b1.reshape(1, Cin), w1,
      s2.reshape(1, P), b2.reshape(1, P))


def conv3x3_bn_relu(x_bhwc, w2, s3, b3):
    """(B, H, W, C) bf16 -> (B, H*W, C) bf16 : relu(bn3(conv2_stride1(x)))."""
    B, H, W, C = x_bhwc.shape
    return pl.pallas_call(
        _conv3x3_bnrelu_kernel,
        out_shape=jax.ShapeDtypeStruct((B, H * W, C), jnp.bfloat16),
        grid=(B,),
        in_specs=[
            pl.BlockSpec((1, H, W, C), lambda b: (b, 0, 0, 0)),
            pl.BlockSpec((9 * C, C), lambda b: (0, 0)),
            pl.BlockSpec((1, C), lambda b: (0, 0)),
            pl.BlockSpec((1, C), lambda b: (0, 0)),
        ],
        out_specs=pl.BlockSpec((1, H * W, C), lambda b: (b, 0, 0)),
        scratch_shapes=[
            pltpu.VMEM((H + 2, W + 2, C), jnp.float32),
            pltpu.VMEM((H, W, 9 * C), jnp.float32),
        ],
        compiler_params=pltpu.CompilerParams(
            dimension_semantics=("parallel",), vmem_limit_bytes=VMEM_LIMIT),
    )(x_bhwc, w2, s3.reshape(1, C), b3.reshape(1, C))


def shortcut_conv1x1(x_flat, s1, b1, wsc):
    """(M, Cin) f32 -> (M, 4P) f32 : conv_sc(relu(bn1(x)))."""
    M, Cin = x_flat.shape
    Cout = wsc.shape[1]
    TM = _pick_tile_m(M)
    return pl.pallas_call(
        _bnrelu_mm_kernel,
        out_shape=jax.ShapeDtypeStruct((M, Cout), jnp.float32),
        grid=(M // TM,),
        in_specs=[
            pl.BlockSpec((TM, Cin), lambda i: (i, 0)),
            pl.BlockSpec((1, Cin), lambda i: (0, 0)),
            pl.BlockSpec((1, Cin), lambda i: (0, 0)),
            pl.BlockSpec((Cin, Cout), lambda i: (0, 0)),
        ],
        out_specs=pl.BlockSpec((TM, Cout), lambda i: (i, 0)),
        compiler_params=pltpu.CompilerParams(
            dimension_semantics=("parallel",), vmem_limit_bytes=VMEM_LIMIT),
    )(x_flat, s1.reshape(1, Cin), b1.reshape(1, Cin), wsc)


def conv1x1_residual(t_flat, w3, res):
    """(M, P) bf16, (P, 4P) bf16, (M, 4P) f32 -> (M, 4P) f32 : conv3(t) + res."""
    M, P = t_flat.shape
    Cout = w3.shape[1]
    TM = _pick_tile_m(M)
    return pl.pallas_call(
        _mm_residual_kernel,
        out_shape=jax.ShapeDtypeStruct((M, Cout), jnp.float32),
        grid=(M // TM,),
        in_specs=[
            pl.BlockSpec((TM, P), lambda i: (i, 0)),
            pl.BlockSpec((P, Cout), lambda i: (0, 0)),
            pl.BlockSpec((TM, Cout), lambda i: (i, 0)),
        ],
        out_specs=pl.BlockSpec((TM, Cout), lambda i: (i, 0)),
        compiler_params=pltpu.CompilerParams(
            dimension_semantics=("parallel",), vmem_limit_bytes=VMEM_LIMIT),
    )(t_flat, w3, res)


# ------------------------------ forward pass --------------------------------

def preact_bottleneck_forward(x_nchw, params, stride):
    """PreActBottleneck forward; x: (B, Cin, H, W) f32 -> (B, 4P, Ho, Wo) f32."""
    x = jnp.transpose(x_nchw, (0, 2, 3, 1)).astype(jnp.float32)   # NHWC
    B, H, W, Cin = x.shape
    P = params['w1'].shape[1]
    Cout = params['w3'].shape[1]
    x_flat = x.reshape(B * H * W, Cin)

    # conv1 (1x1) with fused relu(bn1) prologue and relu(bn2) epilogue
    t1 = conv1x1_pre_post(x_flat, params['s1'], params['b1'], params['w1'],
                          params['s2'], params['b2'])             # (B*H*W, P) bf16

    # conv2 (3x3, pad 1) with fused relu(bn3) epilogue; stride applied below
    t2 = conv3x3_bn_relu(t1.reshape(B, H, W, P), params['w2'],
                         params['s3'], params['b3'])              # (B, H*W, P) bf16
    t2 = t2.reshape(B, H, W, P)
    if stride != 1:
        # TODO(synk): strided in-kernel tap reads would avoid computing the
        # stride^2 extra rows that this subsample throws away.
        t2 = t2[:, ::stride, ::stride, :]
    Ho, Wo = t2.shape[1], t2.shape[2]
    t2_flat = t2.reshape(B * Ho * Wo, P)

    # shortcut branch
    if params['wsc'] is not None:
        xs = x[:, ::stride, ::stride, :].reshape(B * Ho * Wo, Cin)
        sc = shortcut_conv1x1(xs, params['s1'], params['b1'], params['wsc'])
    else:
        sc = x_flat                                               # identity shortcut

    # conv3 (1x1) with fused residual add
    out = conv1x1_residual(t2_flat, params['w3'], sc)             # (B*Ho*Wo, 4P) f32
    out = out.reshape(B, Ho, Wo, Cout)
    return jnp.transpose(out, (0, 3, 1, 2))                       # back to NCHW


# ------------------------- params / pure-JAX reference ----------------------

def init_params(key, in_planes, planes, stride):
    """Synthetic parameters; eval-mode BatchNorm folded to per-channel scale/bias."""
    expansion = 4
    cout = expansion * planes

    def bn_fold(k, c):
        kg, kb, km, kv = jax.random.split(k, 4)
        gamma = 1.0 + 0.1 * jax.random.normal(kg, (c,), jnp.float32)
        beta = 0.1 * jax.random.normal(kb, (c,), jnp.float32)
        mean = 0.1 * jax.random.normal(km, (c,), jnp.float32)
        var = jax.random.uniform(kv, (c,), jnp.float32, minval=0.5, maxval=1.5)
        scale = gamma * lax.rsqrt(var + BN_EPS)
        return scale, beta - scale * mean

    kb1, kb2, kb3, kw1, kw2, kw3, kwsc = jax.random.split(key, 7)
    s1, b1 = bn_fold(kb1, in_planes)
    s2, b2 = bn_fold(kb2, planes)
    s3, b3 = bn_fold(kb3, planes)
    w1 = (jax.random.normal(kw1, (in_planes, planes), jnp.float32)
          / jnp.sqrt(1.0 * in_planes)).astype(jnp.bfloat16)
    w2 = (jax.random.normal(kw2, (3, 3, planes, planes), jnp.float32)
          / jnp.sqrt(9.0 * planes)).astype(jnp.bfloat16)          # HWIO
    w3 = (jax.random.normal(kw3, (planes, cout), jnp.float32)
          / jnp.sqrt(1.0 * planes)).astype(jnp.bfloat16)
    wsc = None
    if stride != 1 or in_planes != cout:      # same rule as the PyTorch module
        wsc = (jax.random.normal(kwsc, (in_planes, cout), jnp.float32)
               / jnp.sqrt(1.0 * in_planes)).astype(jnp.bfloat16)
    return dict(s1=s1, b1=b1, s2=s2, b2=b2, s3=s3, b3=b3,
                w1=w1, w2=w2.reshape(9 * planes, planes), w3=w3, wsc=wsc)


def preact_bottleneck_ref(x_nchw, params, stride):
    """Pure-JAX reference with the same bf16 operand rounding (f32 accumulation)."""
    x = jnp.transpose(x_nchw, (0, 2, 3, 1)).astype(jnp.float32)
    pre = jnp.maximum(x * params['s1'] + params['b1'], 0.0)

    def mm(a_bf16, w_bf16):   # bf16 values, exact f32 products, f32 accumulation
        return jnp.einsum('bhwc,cd->bhwd', a_bf16.astype(jnp.float32),
                          w_bf16.astype(jnp.float32))

    if params['wsc'] is not None:
        sc = mm(pre[:, ::stride, ::stride, :].astype(jnp.bfloat16), params['wsc'])
    else:
        sc = x
    t = mm(pre.astype(jnp.bfloat16), params['w1'])
    t = jnp.maximum(t * params['s2'] + params['b2'], 0.0).astype(jnp.bfloat16)
    P = params['w1'].shape[1]
    w2 = params['w2'].reshape(3, 3, P, P).astype(jnp.float32)
    t = lax.conv_general_dilated(
        t.astype(jnp.float32), w2, window_strides=(stride, stride),
        padding=((1, 1), (1, 1)), dimension_numbers=('NHWC', 'HWIO', 'NHWC'))
    t = jnp.maximum(t * params['s3'] + params['b3'], 0.0).astype(jnp.bfloat16)
    out = mm(t, params['w3']) + sc
    return jnp.transpose(out, (0, 3, 1, 2))


# ------------------------------------ main ----------------------------------

if __name__ == "__main__":
    key = jax.random.PRNGKey(0)
    fwd = jax.jit(preact_bottleneck_forward, static_argnums=(2,))

    B = 2
    configs = [
        # (in_planes, planes, stride): identity shortcut, and projection+stride.
        (128, 32, 1),
        (64, 32, 2),
    ]
    for idx, (cin, planes, stride) in enumerate(configs):
        kp, kx = jax.random.split(jax.random.fold_in(key, idx))
        params = init_params(kp, cin, planes, stride)
        H = W = 16
        x = jax.random.normal(kx, (B, cin, H, W), jnp.float32)    # NCHW like PyTorch

        out = fwd(x, params, stride)
        ref = preact_bottleneck_ref(x, params, stride)
        out, ref = jax.block_until_ready((out, ref))

        ho = (H - 1) // stride + 1
        assert out.shape == (B, 4 * planes, ho, ho), out.shape
        err = float(jnp.max(jnp.abs(out - ref)))
        assert err == err and err < 5e-2, f"max abs err {err}"

    print("KERNEL_OK")
</pallas_src>

<mosaic_0001>
module attributes {stable_mosaic.version = 11 : i64} {
  func.func @_bnrelu_mm_bnrelu_kernel(%arg0: i32, %arg1: memref<256x128xf32, #tpu.memory_space<vmem>>, %arg2: memref<1x128xf32, #tpu.memory_space<vmem>>, %arg3: memref<1x128xf32, #tpu.memory_space<vmem>>, %arg4: memref<128x32xbf16, #tpu.memory_space<vmem>>, %arg5: memref<1x32xf32, #tpu.memory_space<vmem>>, %arg6: memref<1x32xf32, #tpu.memory_space<vmem>>, %arg7: memref<256x32xbf16, #tpu.memory_space<vmem>>) attributes {dimension_semantics = [#tpu.dimension_semantics<parallel>], iteration_bounds = array<i64: 2>, scalar_prefetch = 0 : i64, scratch_operands = 0 : i64, tpu.core_type = #tpu.core_type<tc>, window_params = [{transform_indices = @transform_0, window_bounds = array<i64: 256, 128>}, {pipeline_mode = #tpu.pipeline_mode<synchronous>, transform_indices = @transform_1, window_bounds = array<i64: 1, 128>}, {pipeline_mode = #tpu.pipeline_mode<synchronous>, transform_indices = @transform_2, window_bounds = array<i64: 1, 128>}, {pipeline_mode = #tpu.pipeline_mode<synchronous>, transform_indices = @transform_3, window_bounds = array<i64: 128, 32>}, {pipeline_mode = #tpu.pipeline_mode<synchronous>, transform_indices = @transform_4, window_bounds = array<i64: 1, 32>}, {pipeline_mode = #tpu.pipeline_mode<synchronous>, transform_indices = @transform_5, window_bounds = array<i64: 1, 32>}, {transform_indices = @transform_6, window_bounds = array<i64: 256, 32>}]} {
    %c0 = arith.constant 0 : index
    %c0_0 = arith.constant 0 : index
    %0 = vector.load %arg1[%c0, %c0_0] : memref<256x128xf32, #tpu.memory_space<vmem>>, vector<256x128xf32>
    %c0_1 = arith.constant 0 : index
    %c0_2 = arith.constant 0 : index
    %1 = vector.load %arg2[%c0_1, %c0_2] : memref<1x128xf32, #tpu.memory_space<vmem>>, vector<1x128xf32>
    %2 = vector.broadcast %1 : vector<1x128xf32> to vector<256x128xf32>
    %3 = arith.mulf %0, %2 : vector<256x128xf32>
    %c0_3 = arith.constant 0 : index
    %c0_4 = arith.constant 0 : index
    %4 = vector.load %arg3[%c0_3, %c0_4] : memref<1x128xf32, #tpu.memory_space<vmem>>, vector<1x128xf32>
    %5 = vector.broadcast %4 : vector<1x128xf32> to vector<256x128xf32>
    %6 = arith.addf %3, %5 : vector<256x128xf32>
    %cst = arith.constant 0.000000e+00 : f32
    %7 = vector.broadcast %cst : f32 to vector<256x128xf32>
    %8 = arith.maximumf %6, %7 : vector<256x128xf32>
    %9 = arith.truncf %8 : vector<256x128xf32> to vector<256x128xbf16>
    %c0_5 = arith.constant 0 : index
    %c0_6 = arith.constant 0 : index
    %10 = vector.load %arg4[%c0_5, %c0_6] : memref<128x32xbf16, #tpu.memory_space<vmem>>, vector<128x32xbf16>
    %cst_7 = arith.constant dense<0.000000e+00> : vector<256x32xf32>
    %11 = tpu.matmul %9, %10, %cst_7 {dimension_numbers = #tpu.dot_dimension_numbers<[1], [0], [0], [1], [0, 0, 1, 1], [], []>} : vector<256x128xbf16>, vector<128x32xbf16>, vector<256x32xf32> -> vector<256x32xf32>
    %c0_8 = arith.constant 0 : index
    %c0_9 = arith.constant 0 : index
    %12 = vector.load %arg5[%c0_8, %c0_9] : memref<1x32xf32, #tpu.memory_space<vmem>>, vector<1x32xf32>
    %13 = vector.broadcast %12 : vector<1x32xf32> to vector<256x32xf32>
    %14 = arith.mulf %11, %13 : vector<256x32xf32>
    %c0_10 = arith.constant 0 : index
    %c0_11 = arith.constant 0 : index
    %15 = vector.load %arg6[%c0_10, %c0_11] : memref<1x32xf32, #tpu.memory_space<vmem>>, vector<1x32xf32>
    %16 = vector.broadcast %15 : vector<1x32xf32> to vector<256x32xf32>
    %17 = arith.addf %14, %16 : vector<256x32xf32>
    %cst_12 = arith.constant 0.000000e+00 : f32
    %18 = vector.broadcast %cst_12 : f32 to vector<256x32xf32>
    %19 = arith.maximumf %17, %18 : vector<256x32xf32>
    %20 = arith.truncf %19 : vector<256x32xf32> to vector<256x32xbf16>
    %c0_13 = arith.constant 0 : index
    %c0_14 = arith.constant 0 : index
    %21 = vector.load %arg7[%c0_13, %c0_14] : memref<256x32xbf16, #tpu.memory_space<vmem>>, vector<256x32xbf16>
    tpu.vector_store %arg7[%c0_13, %c0_14], %20 {strides = array<i32>} : memref<256x32xbf16, #tpu.memory_space<vmem>>, vector<256x32xbf16>,
    return
  }
  func.func @transform_0(%arg0: i32) -> (i32, i32) {
    %c0_i32 = arith.constant 0 : i32
    %c0_i32_0 = arith.constant 0 : i32
    return %arg0, %c0_i32 : i32, i32
  }
  func.func @transform_1(%arg0: i32) -> (i32, i32) {
    %c0_i32 = arith.constant 0 : i32
    %c0_i32_0 = arith.constant 0 : i32
    %c0_i32_1 = arith.constant 0 : i32
    return %c0_i32, %c0_i32_0 : i32, i32
  }
  func.func @transform_2(%arg0: i32) -> (i32, i32) {
    %c0_i32 = arith.constant 0 : i32
    %c0_i32_0 = arith.constant 0 : i32
    %c0_i32_1 = arith.constant 0 : i32
    return %c0_i32, %c0_i32_0 : i32, i32
  }
  func.func @transform_3(%arg0: i32) -> (i32, i32) {
    %c0_i32 = arith.constant 0 : i32
    %c0_i32_0 = arith.constant 0 : i32
    %c0_i32_1 = arith.constant 0 : i32
    return %c0_i32, %c0_i32_0 : i32, i32
  }
  func.func @transform_4(%arg0: i32) -> (i32, i32) {
    %c0_i32 = arith.constant 0 : i32
    %c0_i32_0 = arith.constant 0 : i32
    %c0_i32_1 = arith.constant 0 : i32
    return %c0_i32, %c0_i32_0 : i32, i32
  }
  func.func @transform_5(%arg0: i32) -> (i32, i32) {
    %c0_i32 = arith.constant 0 : i32
    %c0_i32_0 = arith.constant 0 : i32
    %c0_i32_1 = arith.constant 0 : i32
    return %c0_i32, %c0_i32_0 : i32, i32
  }
  func.func @transform_6(%arg0: i32) -> (i32, i32) {
    %c0_i32 = arith.constant 0 : i32
    %c0_i32_0 = arith.constant 0 : i32
    return %arg0, %c0_i32 : i32, i32
  }
}

module attributes {stable_mosaic.version = 11 : i64} {
  func.func @_conv3x3_bnrelu_kernel(%arg0: i32, %arg1: memref<1x16x16x32xbf16, #tpu.memory_space<vmem>>, %arg2: memref<288x32xbf16, #tpu.memory_space<vmem>>, %arg3: memref<1x32xf32, #tpu.memory_space<vmem>>, %arg4: memref<1x32xf32, #tpu.memory_space<vmem>>, %arg5: memref<1x256x32xbf16, #tpu.memory_space<vmem>>, %arg6: memref<18x18x32xf32, #tpu.memory_space<vmem>>, %arg7: memref<16x16x288xf32, #tpu.memory_space<vmem>>) attributes {dimension_semantics = [#tpu.dimension_semantics<parallel>], iteration_bounds = array<i64: 2>, scalar_prefetch = 0 : i64, scratch_operands = 2 : i64, tpu.core_type = #tpu.core_type<tc>, window_params = [{transform_indices = @transform_0, window_bounds = array<i64: 1, 16, 16, 32>}, {pipeline_mode = #tpu.pipeline_mode<synchronous>, transform_indices = @transform_1, window_bounds = array<i64: 288, 32>}, {pipeline_mode = #tpu.pipeline_mode<synchronous>, transform_indices = @transform_2, window_bounds = array<i64: 1, 32>}, {pipeline_mode = #tpu.pipeline_mode<synchronous>, transform_indices = @transform_3, window_bounds = array<i64: 1, 32>}, {transform_indices = @transform_4, window_bounds = array<i64: 1, 256, 32>}]} {
    %cst = arith.constant 0.000000e+00 : f32
    %0 = vector.broadcast %cst : f32 to vector<18x18x32xf32>
    %c0 = arith.constant 0 : index
    %c0_0 = arith.constant 0 : index
    %c0_1 = arith.constant 0 : index
    %1 = vector.load %arg6[%c0, %c0_0, %c0_1] : memref<18x18x32xf32, #tpu.memory_space<vmem>>, vector<18x18x32xf32>
    tpu.vector_store %arg6[%c0, %c0_0, %c0_1], %0 {strides = array<i32>} : memref<18x18x32xf32, #tpu.memory_space<vmem>>, vector<18x18x32xf32>,
    %c0_2 = arith.constant 0 : index
    %c0_3 = arith.constant 0 : index
    %c0_4 = arith.constant 0 : index
    %c0_5 = arith.constant 0 : index
    %2 = vector.load %arg1[%c0_2, %c0_3, %c0_4, %c0_5] : memref<1x16x16x32xbf16, #tpu.memory_space<vmem>>, vector<1x16x16x32xbf16>
    %3 = vector.shape_cast %2 : vector<1x16x16x32xbf16> to vector<16x16x32xbf16>
    %4 = arith.extf %3 : vector<16x16x32xbf16> to vector<16x16x32xf32>
    %c1 = arith.constant 1 : index
    %c1_6 = arith.constant 1 : index
    %c0_7 = arith.constant 0 : index
    %5 = vector.load %arg6[%c1, %c1_6, %c0_7] : memref<18x18x32xf32, #tpu.memory_space<vmem>>, vector<16x16x32xf32>
    tpu.vector_store %arg6[%c1, %c1_6, %c0_7], %4 {strides = array<i32>} : memref<18x18x32xf32, #tpu.memory_space<vmem>>, vector<16x16x32xf32>,
    %c0_8 = arith.constant 0 : index
    %c0_9 = arith.constant 0 : index
    %c0_10 = arith.constant 0 : index
    %6 = vector.load %arg6[%c0_8, %c0_9, %c0_10] : memref<18x18x32xf32, #tpu.memory_space<vmem>>, vector<16x16x32xf32>
    %c0_11 = arith.constant 0 : index
    %c0_12 = arith.constant 0 : index
    %c0_13 = arith.constant 0 : index
    %7 = vector.load %arg7[%c0_11, %c0_12, %c0_13] : memref<16x16x288xf32, #tpu.memory_space<vmem>>, vector<16x16x32xf32>
    tpu.vector_store %arg7[%c0_11, %c0_12, %c0_13], %6 {strides = array<i32>} : memref<16x16x288xf32, #tpu.memory_space<vmem>>, vector<16x16x32xf32>,
    %c0_14 = arith.constant 0 : index
    %c1_15 = arith.constant 1 : index
    %c0_16 = arith.constant 0 : index
    %8 = vector.load %arg6[%c0_14, %c1_15, %c0_16] : memref<18x18x32xf32, #tpu.memory_space<vmem>>, vector<16x16x32xf32>
    %c0_17 = arith.constant 0 : index
    %c0_18 = arith.constant 0 : index
    %c32 = arith.constant 32 : index
    %9 = vector.load %arg7[%c0_17, %c0_18, %c32] : memref<16x16x288xf32, #tpu.memory_space<vmem>>, vector<16x16x32xf32>
    tpu.vector_store %arg7[%c0_17, %c0_18, %c32], %8 {strides = array<i32>} : memref<16x16x288xf32, #tpu.memory_space<vmem>>, vector<16x16x32xf32>,
    %c0_19 = arith.constant 0 : index
    %c2 = arith.constant 2 : index
    %c0_20 = arith.constant 0 : index
    %10 = vector.load %arg6[%c0_19, %c2, %c0_20] : memref<18x18x32xf32, #tpu.memory_space<vmem>>, vector<16x16x32xf32>
    %c0_21 = arith.constant 0 : index
    %c0_22 = arith.constant 0 : index
    %c64 = arith.constant 64 : index
    %11 = vector.load %arg7[%c0_21, %c0_22, %c64] : memref<16x16x288xf32, #tpu.memory_space<vmem>>, vector<16x16x32xf32>
    tpu.vector_store %arg7[%c0_21, %c0_22, %c64], %10 {strides = array<i32>} : memref<16x16x288xf32, #tpu.memory_space<vmem>>, vector<16x16x32xf32>,
    %c1_23 = arith.constant 1 : index
    %c0_24 = arith.constant 0 : index
    %c0_25 = arith.constant 0 : index
    %12 = vector.load %arg6[%c1_23, %c0_24, %c0_25] : memref<18x18x32xf32, #tpu.memory_space<vmem>>, vector<16x16x32xf32>
    %c0_26 = arith.constant 0 : index
    %c0_27 = arith.constant 0 : index
    %c96 = arith.constant 96 : index
    %13 = vector.load %arg7[%c0_26, %c0_27, %c96] : memref<16x16x288xf32, #tpu.memory_space<vmem>>, vector<16x16x32xf32>
    tpu.vector_store %arg7[%c0_26, %c0_27, %c96], %12 {strides = array<i32>} : memref<16x16x288xf32, #tpu.memory_space<vmem>>, vector<16x16x32xf32>,
    %c1_28 = arith.constant 1 : index
    %c1_29 = arith.constant 1 : index
    %c0_30 = arith.constant 0 : index
    %14 = vector.load %arg6[%c1_28, %c1_29, %c0_30] : memref<18x18x32xf32, #tpu.memory_space<vmem>>, vector<16x16x32xf32>
    %c0_31 = arith.constant 0 : index
    %c0_32 = arith.constant 0 : index
    %c128 = arith.constant 128 : index
    %15 = vector.load %arg7[%c0_31, %c0_32, %c128] : memref<16x16x288xf32, #tpu.memory_space<vmem>>, vector<16x16x32xf32>
    tpu.vector_store %arg7[%c0_31, %c0_32, %c128], %14 {strides = array<i32>} : memref<16x16x288xf32, #tpu.memory_space<vmem>>, vector<16x16x32xf32>,
    %c1_33 = arith.constant 1 : index
    %c2_34 = arith.constant 2 : index
    %c0_35 = arith.constant 0 : index
    %16 = vector.load %arg6[%c1_33, %c2_34, %c0_35] : memref<18x18x32xf32, #tpu.memory_space<vmem>>, vector<16x16x32xf32>
    %c0_36 = arith.constant 0 : index
    %c0_37 = arith.constant 0 : index
    %c160 = arith.constant 160 : index
    %17 = vector.load %arg7[%c0_36, %c0_37, %c160] : memref<16x16x288xf32, #tpu.memory_space<vmem>>, vector<16x16x32xf32>
    tpu.vector_store %arg7[%c0_36, %c0_37, %c160], %16 {strides = array<i32>} : memref<16x16x288xf32, #tpu.memory_space<vmem>>, vector<16x16x32xf32>,
    %c2_38 = arith.constant 2 : index
    %c0_39 = arith.constant 0 : index
    %c0_40 = arith.constant 0 : index
    %18 = vector.load %arg6[%c2_38, %c0_39, %c0_40] : memref<18x18x32xf32, #tpu.memory_space<vmem>>, vector<16x16x32xf32>
    %c0_41 = arith.constant 0 : index
    %c0_42 = arith.constant 0 : index
    %c192 = arith.constant 192 : index
    %19 = vector.load %arg7[%c0_41, %c0_42, %c192] : memref<16x16x288xf32, #tpu.memory_space<vmem>>, vector<16x16x32xf32>
    tpu.vector_store %arg7[%c0_41, %c0_42, %c192], %18 {strides = array<i32>} : memref<16x16x288xf32, #tpu.memory_space<vmem>>, vector<16x16x32xf32>,
    %c2_43 = arith.constant 2 : index
    %c1_44 = arith.constant 1 : index
    %c0_45 = arith.constant 0 : index
    %20 = vector.load %arg6[%c2_43, %c1_44, %c0_45] : memref<18x18x32xf32, #tpu.memory_space<vmem>>, vector<16x16x32xf32>
    %c0_46 = arith.constant 0 : index
    %c0_47 = arith.constant 0 : index
    %c224 = arith.constant 224 : index
    %21 = vector.load %arg7[%c0_46, %c0_47, %c224] : memref<16x16x288xf32, #tpu.memory_space<vmem>>, vector<16x16x32xf32>
    tpu.vector_store %arg7[%c0_46, %c0_47, %c224], %20 {strides = array<i32>} : memref<16x16x288xf32, #tpu.memory_space<vmem>>, vector<16x16x32xf32>,
    %c2_48 = arith.constant 2 : index
    %c2_49 = arith.constant 2 : index
    %c0_50 = arith.constant 0 : index
    %22 = vector.load %arg6[%c2_48, %c2_49, %c0_50] : memref<18x18x32xf32, #tpu.memory_space<vmem>>, vector<16x16x32xf32>
    %c0_51 = arith.constant 0 : index
    %c0_52 = arith.constant 0 : index
    %c256 = arith.constant 256 : index
    %23 = vector.load %arg7[%c0_51, %c0_52, %c256] : memref<16x16x288xf32, #tpu.memory_space<vmem>>, vector<16x16x32xf32>
    tpu.vector_store %arg7[%c0_51, %c0_52, %c256], %22 {strides = array<i32>} : memref<16x16x288xf32, #tpu.memory_space<vmem>>, vector<16x16x32xf32>,
    %c0_53 = arith.constant 0 : index
    %c0_54 = arith.constant 0 : index
    %c0_55 = arith.constant 0 : index
    %24 = vector.load %arg7[%c0_53, %c0_54, %c0_55] : memref<16x16x288xf32, #tpu.memory_space<vmem>>, vector<16x16x288xf32>
    %25 = vector.shape_cast %24 : vector<16x16x288xf32> to vector<256x288xf32>
    %26 = arith.truncf %25 : vector<256x288xf32> to vector<256x288xbf16>
    %c0_56 = arith.constant 0 : index
    %c0_57 = arith.constant 0 : index
    %27 = vector.load %arg2[%c0_56, %c0_57] : memref<288x32xbf16, #tpu.memory_space<vmem>>, vector<288x32xbf16>
    %cst_58 = arith.constant dense<0.000000e+00> : vector<256x32xf32>
    %28 = tpu.matmul %26, %27, %cst_58 {dimension_numbers = #tpu.dot_dimension_numbers<[1], [0], [0], [1], [0, 0, 1, 1], [], []>} : vector<256x288xbf16>, vector<288x32xbf16>, vector<256x32xf32> -> vector<256x32xf32>
    %c0_59 = arith.constant 0 : index
    %c0_60 = arith.constant 0 : index
    %29 = vector.load %arg3[%c0_59, %c0_60] : memref<1x32xf32, #tpu.memory_space<vmem>>, vector<1x32xf32>
    %30 = vector.broadcast %29 : vector<1x32xf32> to vector<256x32xf32>
    %31 = arith.mulf %28, %30 : vector<256x32xf32>
    %c0_61 = arith.constant 0 : index
    %c0_62 = arith.constant 0 : index
    %32 = vector.load %arg4[%c0_61, %c0_62] : memref<1x32xf32, #tpu.memory_space<vmem>>, vector<1x32xf32>
    %33 = vector.broadcast %32 : vector<1x32xf32> to vector<256x32xf32>
    %34 = arith.addf %31, %33 : vector<256x32xf32>
    %cst_63 = arith.constant 0.000000e+00 : f32
    %35 = vector.broadcast %cst_63 : f32 to vector<256x32xf32>
    %36 = arith.maximumf %34, %35 : vector<256x32xf32>
    %37 = arith.truncf %36 : vector<256x32xf32> to vector<256x32xbf16>
    %c0_64 = arith.constant 0 : index
    %c0_65 = arith.constant 0 : index
    %c0_66 = arith.constant 0 : index
    %38 = vector.load %arg5[%c0_64, %c0_65, %c0_66] : memref<1x256x32xbf16, #tpu.memory_space<vmem>>, vector<1x256x32xbf16>
    %39 = vector.shape_cast %38 : vector<1x256x32xbf16> to vector<256x32xbf16>
    %40 = vector.shape_cast %37 : vector<256x32xbf16> to vector<1x256x32xbf16>
    tpu.vector_store %arg5[%c0_64, %c0_65, %c0_66], %40 {strides = array<i32>} : memref<1x256x32xbf16, #tpu.memory_space<vmem>>, vector<1x256x32xbf16>,
    return
  }
  func.func @transform_0(%arg0: i32) -> (i32, i32, i32, i32) {
    %c0_i32 = arith.constant 0 : i32
    %c0_i32_0 = arith.constant 0 : i32
    %c0_i32_1 = arith.constant 0 : i32
    %c0_i32_2 = arith.constant 0 : i32
    return %arg0, %c0_i32, %c0_i32_0, %c0_i32_1 : i32, i32, i32, i32
  }
  func.func @transform_1(%arg0: i32) -> (i32, i32) {
    %c0_i32 = arith.constant 0 : i32
    %c0_i32_0 = arith.constant 0 : i32
    %c0_i32_1 = arith.constant 0 : i32
    return %c0_i32, %c0_i32_0 : i32, i32
  }
  func.func @transform_2(%arg0: i32) -> (i32, i32) {
    %c0_i32 = arith.constant 0 : i32
    %c0_i32_0 = arith.constant 0 : i32
    %c0_i32_1 = arith.constant 0 : i32
    return %c0_i32, %c0_i32_0 : i32, i32
  }
  func.func @transform_3(%arg0: i32) -> (i32, i32) {
    %c0_i32 = arith.constant 0 : i32
    %c0_i32_0 = arith.constant 0 : i32
    %c0_i32_1 = arith.constant 0 : i32
    return %c0_i32, %c0_i32_0 : i32, i32
  }
  func.func @transform_4(%arg0: i32) -> (i32, i32, i32) {
    %c0_i32 = arith.constant 0 : i32
    %c0_i32_0 = arith.constant 0 : i32
    %c0_i32_1 = arith.constant 0 : i32
    return %arg0, %c0_i32, %c0_i32_0 : i32, i32, i32
  }
}

module attributes {stable_mosaic.version = 11 : i64} {
  func.func @_mm_residual_kernel(%arg0: i32, %arg1: memref<256x32xbf16, #tpu.memory_space<vmem>>, %arg2: memref<32x128xbf16, #tpu.memory_space<vmem>>, %arg3: memref<256x128xf32, #tpu.memory_space<vmem>>, %arg4: memref<256x128xf32, #tpu.memory_space<vmem>>) attributes {dimension_semantics = [#tpu.dimension_semantics<parallel>], iteration_bounds = array<i64: 2>, scalar_prefetch = 0 : i64, scratch_operands = 0 : i64, tpu.core_type = #tpu.core_type<tc>, window_params = [{transform_indices = @transform_0, window_bounds = array<i64: 256, 32>}, {pipeline_mode = #tpu.pipeline_mode<synchronous>, transform_indices = @transform_1, window_bounds = array<i64: 32, 128>}, {transform_indices = @transform_2, window_bounds = array<i64: 256, 128>}, {transform_indices = @transform_3, window_bounds = array<i64: 256, 128>}]} {
    %c0 = arith.constant 0 : index
    %c0_0 = arith.constant 0 : index
    %0 = vector.load %arg1[%c0, %c0_0] : memref<256x32xbf16, #tpu.memory_space<vmem>>, vector<256x32xbf16>
    %c0_1 = arith.constant 0 : index
    %c0_2 = arith.constant 0 : index
    %1 = vector.load %arg2[%c0_1, %c0_2] : memref<32x128xbf16, #tpu.memory_space<vmem>>, vector<32x128xbf16>
    %cst = arith.constant dense<0.000000e+00> : vector<256x128xf32>
    %2 = tpu.matmul %0, %1, %cst {dimension_numbers = #tpu.dot_dimension_numbers<[1], [0], [0], [1], [0, 0, 1, 1], [], []>} : vector<256x32xbf16>, vector<32x128xbf16>, vector<256x128xf32> -> vector<256x128xf32>
    %c0_3 = arith.constant 0 : index
    %c0_4 = arith.constant 0 : index
    %3 = vector.load %arg3[%c0_3, %c0_4] : memref<256x128xf32, #tpu.memory_space<vmem>>, vector<256x128xf32>
    %4 = arith.addf %2, %3 : vector<256x128xf32>
    %c0_5 = arith.constant 0 : index
    %c0_6 = arith.constant 0 : index
    %5 = vector.load %arg4[%c0_5, %c0_6] : memref<256x128xf32, #tpu.memory_space<vmem>>, vector<256x128xf32>
    tpu.vector_store %arg4[%c0_5, %c0_6], %4 {strides = array<i32>} : memref<256x128xf32, #tpu.memory_space<vmem>>, vector<256x128xf32>,
    return
  }
  func.func @transform_0(%arg0: i32) -> (i32, i32) {
    %c0_i32 = arith.constant 0 : i32
    %c0_i32_0 = arith.constant 0 : i32
    return %arg0, %c0_i32 : i32, i32
  }
  func.func @transform_1(%arg0: i32) -> (i32, i32) {
    %c0_i32 = arith.constant 0 : i32
    %c0_i32_0 = arith.constant 0 : i32
    %c0_i32_1 = arith.constant 0 : i32
    return %c0_i32, %c0_i32_0 : i32, i32
  }
  func.func @transform_2(%arg0: i32) -> (i32, i32) {
    %c0_i32 = arith.constant 0 : i32
    %c0_i32_0 = arith.constant 0 : i32
    return %arg0, %c0_i32 : i32, i32
  }
  func.func @transform_3(%arg0: i32) -> (i32, i32) {
    %c0_i32 = arith.constant 0 : i32
    %c0_i32_0 = arith.constant 0 : i32
    return %arg0, %c0_i32 : i32, i32
  }
}

</mosaic_0001>

<bundles_post_ra>
// kernel: preact_bottleneck_forward.3
= control target key start
LH: loop header
LB: loop body
LE: loop exit
PB: predicated region body
PF: predicated region fallthrough
CT: control target
= control target key end

     0   :  { %11 = vsyncpa [#allocation3], 0  ;;  %s1709_s0 = inlined_call_operand.hbm [shape: f32[512,128], index: 0, kind: input, shape index: {}]   ;;  %s1710_s1 = inlined_call_operand.vmem [shape: f32[1,128], index: 1, kind: input, shape index: {}]   ;;  %s1711_s2 = inlined_call_operand.vmem [shape: f32[1,128], index: 2, kind: input, shape index: {}]   ;;  %s1712_s3 = inlined_call_operand.vmem [shape: bf16[128,32], index: 3, kind: input, shape index: {}]   ;;  %s1713_s4 = inlined_call_operand.vmem [shape: f32[1,32], index: 4, kind: input, shape index: {}]   ;;  %s1714_s5 = inlined_call_operand.vmem [shape: f32[1,32], index: 5, kind: input, shape index: {}]   ;;  %s1715_s6 = inlined_call_operand.vmem [shape: bf16[512,32], index: 6, kind: output, shape index: {}]  }
   0x1   :  { %13 = vsyncpa [#allocation3 + $0x1], 0  ;;  %s1327_s21 = smov 0   ;;  %s1329_s22 = smov 0  }
   0x2   :  { %s1331_s23 = smov 0   ;;  %s1333_s24 = smov 0  }
   0x3 LB: > { %s996_s25 = sadd.s32 4294967295, %s1287_s24   ;;  %s1347_s26 = sadd.s32 1, %s1287_s24   ;;  %s1287_s24 = sphi %s1333_s24, %s1722_s24   ;;  %s1283_s23 = sphi %s1331_s23, %s1721_s23   ;;  %s1279_s22 = sphi %s1329_s22, %s1720_s22   ;;  %s1275_s21 = sphi %s1327_s21, %s1719_s21  }
   0x4   : > { %s23_s27 = ssub.s32 %s1287_s24, %s1347_s26  ;;  %s26_s28 = sadd.s32 1, %s1283_s23 }
   0x5   : > { %p24_p0 = scmp.eq.s32.totalorder %s23_s27, 0  ;;  %p33_p1 = scmp.ne.s32.totalorder %s1283_s23, %s1279_s22 }
   0x6   : > { %p34_p2 = scmp.eq.s32.totalorder %s1287_s24, 0  ;;  %p39_p3 = scmp.ne.s32.totalorder %s1279_s22, %s1275_s21 }
   0x7   : > { %s1357_s29 = scalar_select %p24_p0, %s1283_s23, %s26_s28  }
   0x8   : > { %p35_p4 = por %p34_p2, %p33_p1  ;;  %p40_p5 = scmp.eq.s32.totalorder %s996_s25, 0 }
   0x9   : > { %p1180_p6 = scmp.lt.s32.totalorder %s1287_s24, 2  ;;  %s209_s7 = sand.u32 1, %s1283_s23  }
   0xa   : > { %p1362_p7 = por %p40_p5, %p39_p3  ;;  %s1000_s8 = sshll.u32 %s209_s7, 8 }
   0xb   : > { %s1053_s9 = sshll.u32 %s1287_s24, 12  ;;  %s213_s13 = scalar_lea.vmem [#allocation2], %s1000_s8 }
   0xc   : > { %s1371_s12 = scalar_lea.hbm %s1709_s0, %s1053_s9  ;;  %s220_s14 = sshll.u32 %s213_s13, 4  ;;  %s1373_s14 = int_to_ptr.vmem [resolvable:$true] %s220_s14 }
   0xd   : > { %p1375_p8 = pnand %p1180_p6, %p35_p4  ;;  %s1380_s16 = scalar_lea.sflag [#allocation3], %s209_s7 }
   0xe   : > { %s1223_s17 = scalar_lea.hbm %s1371_s12, 4096  ;;  %s1228_s20 = scalar_lea.hbm %s1709_s0, 8192 }
   0xf   : > { %p1224_p10 = scmp.ne.s32.totalorder %s1371_s12, %s1223_s17  ;;  %p1225_p11 = pneg %p1375_p8 }
  0x10   : > { %p1229_p0 = scmp.lt.u32.totalorder %s1371_s12, %s1709_s0  ;;  %p1230_p1 = scmp.lt.u32.totalorder %s1228_s20, %s1223_s17 }
  0x11   : > { %p1226_p12 = pnand %p1225_p11, %p1224_p10  ;;  %p1232_p3 = scmp.lt.u32.totalorder %s1223_s17, %s1371_s12 }
  0x12   : > { %p1231_p2 = por %p1230_p1, %p1229_p0 }
  0x13   : > { %p1227_p13 = pneg %p1226_p12 }
  0x14   : > { %p1233_p4 = por %p1232_p3, %p1231_p2 }
  0x16   : > { %p1234_p5 = pnand %p1233_p4, %p1227_p13 }
  0x18   : > { %1237 = shalt.err (!%p1234_p5)
}
  0x19   : > { %s1238_s28 = scalar_lea.vmem %s1373_s14, 4096  ;;  %s1289_s7 = smov [#allocation2]  }
  0x1a   : > { %p1239_p6 = scmp.ne.s32.totalorder %s1373_s14, %s1238_s28  ;;  %s1243_s8 = sshll.u32 %s1289_s7, 4  ;;  %s1244_s8 = int_to_ptr.vmem [resolvable:$false] %s1243_s8 }
  0x1b   : > { %s1245_s9 = scalar_lea.vmem %s1244_s8, 8192  ;;  %p1246_p9 = scmp.lt.s32.totalorder %s1373_s14, %s1244_s8 }
  0x1c   : > { %p1241_p10 = pnand %p1239_p6, %p1225_p11  ;;  %p1247_p0 = scmp.lt.s32.totalorder %s1245_s9, %s1238_s28 }
  0x1e   : > { %p1242_p12 = pneg %p1241_p10  ;;  %p1248_p1 = por %p1247_p0, %p1246_p9 }
  0x20   : > { %p1249_p2 = pnand %p1248_p1, %p1242_p12 }
  0x22   : > { %1252 = shalt.err (!%p1249_p2)
}
  0x23   : > { %s1290_s10 = smov 128   ;;  %s1291_s11 = smov 8  }
  0x24   : > { %1179 = dma.hbm_to_vmem [thread:$0]  (!%p1375_p8), %s1371_s12, 4096, %s1373_s14, %s1380_s16, %s1290_s10, %s1290_s10, %s1291_s11  }
  0x25   : > { %p228_p11 = scmp.lt.s32.totalorder %s1287_s24, 3  ;;  %p1718_p13 = scmp.ge.s32.totalorder %s1287_s24, 1 }
  0x27   : > { %p229_p3 = pnand %p1718_p13, %p228_p11 }
  0x28   : > { %s234_s13 = sand.u32 (!%p229_p3), 1, %s1279_s22  }
  0x29   : > { %232 = sbr.rel (%p229_p3) target bundleno = 333 (0x14d), region = 44  ;;  %s1004_s17 = sshll.u32 (!%p229_p3), %s234_s13, 8 }
  0x2a   : > { %s235_s18 = scalar_lea.sflag (!%p229_p3), [#allocation3], %s234_s13  ;;  %s1412_s19 = scalar_lea.vmem (!%p229_p3), [#allocation2], %s1004_s17 }
  0x30   : > { %1270 = dma.done.wait (%p1362_p7), %s235_s18, 4096  }
  0x31   : > { %1272 = vsyncadd (%p1362_p7), %s235_s18, 4294963200  ;;  %v1215_v0 = vld [vmem:[%s1712_s3] sm:$0xff]   ;;  %v1216_v1 = vld [vmem:[%s1712_s3 + $0x8] sm:$0xff]   ;;  %vm896_vm0 = vcmask 257024  }
  0x32   : > { %1110 = vmatprep.subr.bf16.mxu0 %v1215_v0  ;;  %1158 = vmatprep.subr.bf16.mxu1 %v1215_v0  ;;  %v1217_v2 = vld [vmem:[%s1712_s3 + $0x10] sm:$0xff]   ;;  %v1218_v3 = vld [vmem:[%s1712_s3 + $0x18] sm:$0xff]   ;;  %v275_v4 = vld [vmem:[%s1412_s19] sm:$0xff] }
  0x33   : > { %1111 = vmatpush3.bf16.msra.mxu0 %v1215_v0  ;;  %1166 = vmatpush3.bf16.msra.mxu1 %v1215_v0  ;;  %v276_v5 = vld [vmem:[%s1412_s19 + $0x8] sm:$0xff]  ;;  %v1435_v6 = vld [vmem:[%s1710_s1] ss:$0 sm:$0xff]  ;;  %v277_v21 = vld [vmem:[%s1412_s19 + $0x10] sm:$0xff] }
  0x34   : > { %1112 = vmatprep.subr.bf16.mxu0 %v1216_v1  ;;  %1159 = vmatprep.subr.bf16.mxu1 %v1216_v1  ;;  %v314_v7 = vmul.f32 %v1435_v6, %v275_v4  ;;  %v315_v8 = vmul.f32 %v1435_v6, %v276_v5  ;;  %v1442_v9 = vld [vmem:[%s1711_s2] ss:$0 sm:$0xff]  ;;  %v292_v11 = vld [vmem:[%s1412_s19 + $0x88] sm:$0xff]  ;;  %v278_v24 = vld [vmem:[%s1412_s19 + $0x18] sm:$0xff]  ;;  %v316_v32 = vmul.f32 %v1435_v6, %v277_v21 }
  0x35   : > { %v291_v10 = vld [vmem:[%s1412_s19 + $0x80] sm:$0xff]  ;;  %v331_v13 = vmul.f32 %v1435_v6, %v292_v11  ;;  %v293_v25 = vld [vmem:[%s1412_s19 + $0x90] sm:$0xff]  ;;  %v294_v26 = vld [vmem:[%s1412_s19 + $0x98] sm:$0xff]  ;;  %v317_v35 = vmul.f32 %v1435_v6, %v278_v24 }
  0x36   : > { %v330_v12 = vmul.f32 %v1435_v6, %v291_v10  ;;  %v353_v14 = vadd.f32 %v1442_v9, %v314_v7  ;;  %v354_v15 = vadd.f32 %v1442_v9, %v315_v8  ;;  %v1219_v16 = vld [vmem:[%s1712_s3 + $0x20] sm:$0xff]   ;;  %v280_v29 = vld [vmem:[%s1412_s19 + $0x28] sm:$0xff]  ;;  %v332_v36 = vmul.f32 %v1435_v6, %v293_v25  ;;  %v1221_v42 = vld [vmem:[%s1712_s3 + $0x30] sm:$0xff]  }
  0x37   : > { %1113 = vmatpush3.bf16.msra.mxu0 %v1216_v1  ;;  %1167 = vmatpush3.bf16.msra.mxu1 %v1216_v1  ;;  %v370_v18 = vadd.f32 %v1442_v9, %v331_v13  ;;  %v279_v28 = vld [vmem:[%s1412_s19 + $0x20] sm:$0xff]  ;;  %v1220_v30 = vld [vmem:[%s1712_s3 + $0x28] sm:$0xff]   ;;  %v333_v37 = vmul.f32 %v1435_v6, %v294_v26  ;;  %v319_v39 = vmul.f32 %v1435_v6, %v280_v29  ;;  %v281_v44 = vld [vmem:[%s1412_s19 + $0x30] sm:$0xff] }
  0x38   : > { %1114 = vmatprep.subr.bf16.mxu0 %v1217_v2  ;;  %1160 = vmatprep.subr.bf16.mxu1 %v1217_v2  ;;  %v369_v17 = vadd.f32 %v1442_v9, %v330_v12  ;;  %v385_v19 = vmax.f32 %v353_v14, 0.0  ;;  %v386_v20 = vmax.f32 %v354_v15, 0.0  ;;  %v295_v33 = vld [vmem:[%s1412_s19 + $0xa0] sm:$0xff]  ;;  %v296_v34 = vld [vmem:[%s1412_s19 + $0xa8] sm:$0xff]  ;;  %v318_v38 = vmul.f32 %v1435_v6, %v279_v28  ;;  %v282_v48 = vld [vmem:[%s1412_s19 + $0x38] sm:$0xff] }
  0x39   : > { %v402_v23 = vmax.f32 %v370_v18, 0.0  ;;  %v334_v40 = vmul.f32 %v1435_v6, %v295_v33  ;;  %v335_v41 = vmul.f32 %v1435_v6, %v296_v34  ;;  %v355_v43 = vadd.f32 %v1442_v9, %v316_v32  ;;  %v297_v49 = vld [vmem:[%s1412_s19 + $0xb0] sm:$0xff]  ;;  %v298_v50 = vld [vmem:[%s1412_s19 + $0xb8] sm:$0xff]  ;;  %v283_v53 = vld [vmem:[%s1412_s19 + $0x40] sm:$0xff] }
  0x3a   : > { %v401_v22 = vmax.f32 %v369_v17, 0.0  ;;  %v417_v27 = vpack.c.bf16 %v386_v20, %v385_v19  ;;  %v356_v45 = vadd.f32 %v1442_v9, %v317_v35  ;;  %v371_v46 = vadd.f32 %v1442_v9, %v332_v36  ;;  %v284_v57 = vld [vmem:[%s1412_s19 + $0x48] sm:$0xff]  ;;  %v299_v58 = vld [vmem:[%s1412_s19 + $0xc0] sm:$0xff]  ;;  %v1222_v60 = vld [vmem:[%s1712_s3 + $0x38] sm:$0xff]  }
  0x3b   : > { %1115 = vmatpush3.bf16.msra.mxu0 %v1217_v2  ;;  %1168 = vmatpush3.bf16.msra.mxu1 %v1217_v2  ;;  %v372_v47 = vadd.f32 %v1442_v9, %v333_v37  ;;  %v357_v51 = vadd.f32 %v1442_v9, %v318_v38  ;;  %v358_v52 = vadd.f32 %v1442_v9, %v319_v39  ;;  %v300_v59 = vld [vmem:[%s1412_s19 + $0xc8] sm:$0xff]  ;;  %v387_v61 = vmax.f32 %v355_v43, 0.0  ;;  %v285_v20 = vld [vmem:[%s1412_s19 + $0x50] sm:$0xff]  ;;  %v286_v25 = vld [vmem:[%s1412_s19 + $0x58] sm:$0xff] }
  0x3c   : > { %1116 = vmatprep.subr.bf16.mxu0 %v1218_v3  ;;  %1161 = vmatprep.subr.bf16.mxu1 %v1218_v3  ;;  %v425_v31 = vpack.c.bf16 %v402_v23, %v401_v22  ;;  %v373_v54 = vadd.f32 %v1442_v9, %v334_v40  ;;  %v374_v55 = vadd.f32 %v1442_v9, %v335_v41  ;;  %v388_v1 = vmax.f32 %v356_v45, 0.0  ;;  %v301_v26 = vld [vmem:[%s1412_s19 + $0xd0] sm:$0xff]  ;;  %v288_v36 = vld [vmem:[%s1412_s19 + $0x68] sm:$0xff]  ;;  %v303_v37 = vld [vmem:[%s1412_s19 + $0xe0] sm:$0xff] }
  0x3d   : > { %1126 = vmatprep.mubr.bf16.mxu0 %v417_v27  ;;  %v320_v56 = vmul.f32 %v1435_v6, %v281_v44  ;;  %v321_v62 = vmul.f32 %v1435_v6, %v282_v48  ;;  %v336_v63 = vmul.f32 %v1435_v6, %v297_v49  ;;  %v337_v0 = vmul.f32 %v1435_v6, %v298_v50  ;;  %v302_v27 = vld [vmem:[%s1412_s19 + $0xd8] sm:$0xff]  ;;  %v304_v38 = vld [vmem:[%s1412_s19 + $0xe8] sm:$0xff] }
  0x3e   : > { %1142 = vmatprep.mubr.bf16.mxu1 %v425_v31  ;;  %v403_v2 = vmax.f32 %v371_v46, 0.0  ;;  %v322_v4 = vmul.f32 %v1435_v6, %v283_v53  ;;  %v389_v5 = vmax.f32 %v357_v51, 0.0  ;;  %v323_v7 = vmul.f32 %v1435_v6, %v284_v57  ;;  %v287_v31 = vld [vmem:[%s1412_s19 + $0x60] sm:$0xff] }
  0x3f   : > { %1117 = vmatpush3.bf16.msra.mxu0 %v1218_v3  ;;  %1169 = vmatpush3.bf16.msra.mxu1 %v1218_v3  ;;  %v404_v3 = vmax.f32 %v372_v47, 0.0  ;;  %v338_v8 = vmul.f32 %v1435_v6, %v299_v58  ;;  %v339_v10 = vmul.f32 %v1435_v6, %v300_v59  ;;  %v390_v11 = vmax.f32 %v358_v52, 0.0  ;;  %v289_v58 = vld [vmem:[%s1412_s19 + $0x70] sm:$0xff] }
  0x40   : > { %1118 = vmatprep.subr.bf16.mxu0 %v1219_v16  ;;  %1162 = vmatprep.subr.bf16.mxu1 %v1219_v16  ;;  %v405_v12 = vmax.f32 %v373_v54, 0.0  ;;  %v406_v13 = vmax.f32 %v374_v55, 0.0  ;;  %v359_v14 = vadd.f32 %v1442_v9, %v320_v56  ;;  %v360_v15 = vadd.f32 %v1442_v9, %v321_v62 }
  0x41   : > { %v376_v17 = vadd.f32 %v1442_v9, %v337_v0  ;;  %v418_v18 = vpack.c.bf16 %v388_v1, %v387_v61  ;;  %v361_v19 = vadd.f32 %v1442_v9, %v322_v4  ;;  %v426_v21 = vpack.c.bf16 %v404_v3, %v403_v2  ;;  %v305_v0 = vld [vmem:[%s1412_s19 + $0xf0] sm:$0xff]  ;;  %v306_v1 = vld [vmem:[%s1412_s19 + $0xf8] sm:$0xff] }
  0x42   : > { %v362_v22 = vadd.f32 %v1442_v9, %v323_v7  ;;  %v377_v23 = vadd.f32 %v1442_v9, %v338_v8  ;;  %v378_v24 = vadd.f32 %v1442_v9, %v339_v10  ;;  %v419_v28 = vpack.c.bf16 %v390_v11, %v389_v5 }
  0x43   : > { %1119 = vmatpush3.bf16.msra.mxu0 %v1219_v16  ;;  %1170 = vmatpush3.bf16.msra.mxu1 %v1219_v16  ;;  %v375_v16 = vadd.f32 %v1442_v9, %v336_v63  ;;  %v427_v29 = vpack.c.bf16 %v406_v13, %v405_v12  ;;  %v392_v32 = vmax.f32 %v360_v15, 0.0  ;;  %v408_v34 = vmax.f32 %v376_v17, 0.0  ;;  %v290_v63 = vld [vmem:[%s1412_s19 + $0x78] sm:$0xff]  ;;  %s1005_s19 = sshll.u32 %s996_s25, 5 }
  0x44   : > { %1120 = vmatprep.subr.bf16.mxu0 %v1220_v30  ;;  %1163 = vmatprep.subr.bf16.mxu1 %v1220_v30  ;;  %v324_v35 = vmul.f32 %v1435_v6, %v285_v20  ;;  %v393_v39 = vmax.f32 %v361_v19, 0.0  ;;  %v325_v40 = vmul.f32 %v1435_v6, %v286_v25  ;;  %v340_v41 = vmul.f32 %v1435_v6, %v301_v26  ;;  %p269_p7 = scmp.lt.s32.totalorder %s1005_s19, 63 }
  0x45   : > { %v407_v33 = vmax.f32 %v375_v16, 0.0  ;;  %v394_v43 = vmax.f32 %v362_v22, 0.0  ;;  %v409_v44 = vmax.f32 %v377_v23, 0.0  ;;  %v410_v45 = vmax.f32 %v378_v24, 0.0 }
  0x46   : > { %v326_v46 = vmul.f32 %v1435_v6, %v287_v31  ;;  %v327_v47 = vmul.f32 %v1435_v6, %v288_v36  ;;  %v342_v48 = vmul.f32 %v1435_v6, %v303_v37  ;;  %v343_v49 = vmul.f32 %v1435_v6, %v304_v38  ;;  %s1724_s19 = smov (!%p269_p7, %s1005_s19), 63 }
  0x47   : > { %1121 = vmatpush3.bf16.msra.mxu0 %v1220_v30  ;;  %1171 = vmatpush3.bf16.msra.mxu1 %v1220_v30  ;;  %v391_v30 = vmax.f32 %v359_v14, 0.0  ;;  %v363_v50 = vadd.f32 %v1442_v9, %v324_v35  ;;  %v364_v51 = vadd.f32 %v1442_v9, %v325_v40  ;;  %v379_v52 = vadd.f32 %v1442_v9, %v340_v41  ;;  %s1006_s24 = sshll.u32 %s1724_s19, 2 }
  0x48   : > { %1122 = vmatprep.subr.bf16.mxu0 %v1221_v42  ;;  %1164 = vmatprep.subr.bf16.mxu1 %v1221_v42  ;;  %v428_v55 = vpack.c.bf16 %v408_v34, %v407_v33  ;;  %v421_v56 = vpack.c.bf16 %v394_v43, %v393_v39  ;;  %v429_v57 = vpack.c.bf16 %v410_v45, %v409_v44  ;;  %s1580_s28 = scalar_lea.vmem %s1715_s6, %s1006_s24 }
  0x49   : > { %v420_v54 = vpack.c.bf16 %v392_v32, %v391_v30  ;;  %v365_v59 = vadd.f32 %v1442_v9, %v326_v46  ;;  %v381_v61 = vadd.f32 %v1442_v9, %v342_v48  ;;  %v382_v62 = vadd.f32 %v1442_v9, %v343_v49  ;;  %v1560_v30 = vld [vmem:[%s1714_s5] ss:$0 sm:$0xff] }
  0x4a   : > { %v395_v2 = vmax.f32 %v363_v50, 0.0  ;;  %v396_v3 = vmax.f32 %v364_v51, 0.0  ;;  %v411_v4 = vmax.f32 %v379_v52, 0.0  ;;  %v328_v7 = vmul.f32 %v1435_v6, %v289_v58 }
  0x4b   : > { %1123 = vmatpush3.bf16.msra.mxu0 %v1221_v42  ;;  %1172 = vmatpush3.bf16.msra.mxu1 %v1221_v42  ;;  %v341_v42 = vmul.f32 %v1435_v6, %v302_v27  ;;  %v329_v8 = vmul.f32 %v1435_v6, %v290_v63  ;;  %v344_v10 = vmul.f32 %v1435_v6, %v305_v0  ;;  %v397_v12 = vmax.f32 %v365_v59, 0.0 }
  0x4c   : > { %1124 = vmatprep.subr.bf16.mxu0 %v1222_v60  ;;  %1165 = vmatprep.subr.bf16.mxu1 %v1222_v60  ;;  %v345_v11 = vmul.f32 %v1435_v6, %v306_v1  ;;  %v413_v14 = vmax.f32 %v381_v61, 0.0  ;;  %v414_v15 = vmax.f32 %v382_v62, 0.0  ;;  %v422_v16 = vpack.c.bf16 %v396_v3, %v395_v2 }
  0x4d   : > { %v380_v53 = vadd.f32 %v1442_v9, %v341_v42  ;;  %v368_v19 = vadd.f32 %v1442_v9, %v329_v8  ;;  %v383_v20 = vadd.f32 %v1442_v9, %v344_v10 }
  0x4e   : > { %v431_v23 = vpack.c.bf16 %v414_v15, %v413_v14 }
  0x4f   : > { %1125 = vmatpush3.bf16.msra.mxu0 %v1222_v60  ;;  %1173 = vmatpush3.bf16.msra.mxu1 %v1222_v60  ;;  %v366_v60 = vadd.f32 %v1442_v9, %v327_v47  ;;  %v412_v5 = vmax.f32 %v380_v53, 0.0  ;;  %v400_v24 = vmax.f32 %v368_v19, 0.0  ;;  %v415_v25 = vmax.f32 %v383_v20, 0.0 }
  0x51   : > { %v398_v13 = vmax.f32 %v366_v60, 0.0  ;;  %v430_v17 = vpack.c.bf16 %v412_v5, %v411_v4 }
  0x52   : > { %1127 = vmatmul.mubr.bf16.vlgmr.msra.gmra.mrb[0].mxu0 %v418_v18  ;;  %1143 = vmatmul.mubr.bf16.vlgmr.msra.gmra.mrb[0].mxu1 %v426_v21  ;;  %v367_v18 = vadd.f32 %v1442_v9, %v328_v7  ;;  %v384_v21 = vadd.f32 %v1442_v9, %v345_v11  ;;  %v1553_v9 = vld [vmem:[%s1713_s4] ss:$0 sm:$0xff] }
  0x53   : > { %1130 = vmatprep.mubr.bf16.mxu0 %v419_v28  ;;  %1146 = vmatprep.mubr.bf16.mxu1 %v427_v29  ;;  %v423_v22 = vpack.c.bf16 %v398_v13, %v397_v12 }
  0x54   : > { %v399_v6 = vmax.f32 %v367_v18, 0.0  ;;  %v416_v26 = vmax.f32 %v384_v21, 0.0 }
  0x56   : > { %v424_v27 = vpack.c.bf16 %v400_v24, %v399_v6  ;;  %v432_v28 = vpack.c.bf16 %v416_v26, %v415_v25 }
  0x5a   : > { %1131 = vmatmul.mubr.bf16.gmra.mrb[4].mxu0 %v420_v54  ;;  %1147 = vmatmul.mubr.bf16.gmra.mrb[4].mxu1 %v428_v55 }
  0x5b   : > { %1134 = vmatprep.mubr.bf16.mxu0 %v421_v56  ;;  %1150 = vmatprep.mubr.bf16.mxu1 %v429_v57 }
  0x62   : > { %1135 = vmatmul.mubr.bf16.gmra.mrb[8].mxu0 %v422_v16  ;;  %1151 = vmatmul.mubr.bf16.gmra.mrb[8].mxu1 %v430_v17 }
  0x63   : > { %1138 = vmatprep.mubr.bf16.mxu0 %v423_v22  ;;  %1154 = vmatprep.mubr.bf16.mxu1 %v431_v23 }
  0x6a   : > { %1139 = vmatmul.mubr.bf16.gmra.mrb[12].mxu0 %v424_v27  ;;  %1155 = vmatmul.mubr.bf16.gmra.mrb[12].mxu1 %v432_v28 }
 0x125   : > { %v1128_v29 = vpop.f32.mrb[0].mxu0  ;;  %v1144_v31 = vpop.f32.mrb[0].mxu1 }
 0x126   : > { %v667_v32 = vmul.f32 %v1128_v29, %v1553_v9  ;;  %v683_v33 = vmul.f32 %v1144_v31, %v1553_v9  ;;  %v531_v34 = vpop.f32.mrb[1].mxu0  ;;  %v595_v35 = vpop.f32.mrb[1].mxu1 }
 0x127   : > { %v665_v36 = vmul.f32 %v1553_v9, %v531_v34  ;;  %v681_v37 = vmul.f32 %v1553_v9, %v595_v35  ;;  %v1129_v38 = vpop.f32.mrb[2].mxu0  ;;  %v1145_v39 = vpop.f32.mrb[2].mxu1 }
 0x128   : > { %v706_v40 = vadd.f32 %v1560_v30, %v667_v32  ;;  %v722_v41 = vadd.f32 %v1560_v30, %v683_v33  ;;  %v668_v42 = vmul.f32 %v1129_v38, %v1553_v9  ;;  %v684_v43 = vmul.f32 %v1145_v39, %v1553_v9  ;;  %v534_v44 = vpop.f32.mrb[3].mxu0  ;;  %v598_v45 = vpop.f32.mrb[3].mxu1 }
 0x129   : > { %v704_v46 = vadd.f32 %v1560_v30, %v665_v36  ;;  %v720_v47 = vadd.f32 %v1560_v30, %v681_v37  ;;  %v666_v48 = vmul.f32 %v1553_v9, %v534_v44  ;;  %v682_v49 = vmul.f32 %v1553_v9, %v598_v45 }
 0x12a   : > { %v738_v50 = vmax.f32 %v706_v40, 0.0  ;;  %v754_v51 = vmax.f32 %v722_v41, 0.0  ;;  %v707_v52 = vadd.f32 %v1560_v30, %v668_v42  ;;  %v723_v53 = vadd.f32 %v1560_v30, %v684_v43 }
 0x12b   : > { %v736_v54 = vmax.f32 %v704_v46, 0.0  ;;  %v752_v55 = vmax.f32 %v720_v47, 0.0  ;;  %v705_v56 = vadd.f32 %v1560_v30, %v666_v48  ;;  %v721_v57 = vadd.f32 %v1560_v30, %v682_v49 }
 0x12c   : > { %v1056_v58 = vpack.c.bf16 %v738_v50, %v738_v50  ;;  %v1072_v59 = vpack.c.bf16 %v754_v51, %v754_v51  ;;  %v739_v60 = vmax.f32 %v707_v52, 0.0  ;;  %v755_v61 = vmax.f32 %v723_v53, 0.0 }
 0x12d   : > { %v1054_v62 = vpack.c.bf16 %v736_v54, %v736_v54  ;;  %v1070_v63 = vpack.c.bf16 %v752_v55, %v752_v55  ;;  %v737_v0 = vmax.f32 %v705_v56, 0.0  ;;  %v753_v1 = vmax.f32 %v721_v57, 0.0  ;;  %v1132_v2 = vpop.f32.mrb[4].mxu0  ;;  %v1148_v3 = vpop.f32.mrb[4].mxu1 }
 0x12e   : > { %899 = vst.msk [vmem:[%s1580_s28 + $0x8] sm:$0xf] %vm896_vm0, %v1056_v58  ;;  %915 = vst.msk [vmem:[%s1580_s28 + $0x48] sm:$0xf] %vm896_vm0, %v1072_v59  ;;  %v1057_v4 = vpack.c.bf16 %v739_v60, %v739_v60  ;;  %v1073_v5 = vpack.c.bf16 %v755_v61, %v755_v61  ;;  %v671_v7 = vmul.f32 %v1132_v2, %v1553_v9  ;;  %v547_v10 = vpop.f32.mrb[5].mxu0  ;;  %v611_v11 = vpop.f32.mrb[5].mxu1 }
 0x12f   : > { %v687_v8 = vmul.f32 %v1148_v3, %v1553_v9  ;;  %897 = vst.msk [vmem:[%s1580_s28] sm:$0xf] %vm896_vm0, %v1054_v62  ;;  %913 = vst.msk [vmem:[%s1580_s28 + $0x40] sm:$0xf] %vm896_vm0, %v1070_v63  ;;  %v1055_v12 = vpack.c.bf16 %v737_v0, %v737_v0  ;;  %v1071_v13 = vpack.c.bf16 %v753_v1, %v753_v1  ;;  %v1133_v16 = vpop.f32.mrb[6].mxu0  ;;  %v1149_v17 = vpop.f32.mrb[6].mxu1 }
 0x130   : > { %v669_v14 = vmul.f32 %v1553_v9, %v547_v10  ;;  %v685_v15 = vmul.f32 %v1553_v9, %v611_v11  ;;  %900 = vst.msk [vmem:[%s1580_s28 + $0xc] sm:$0xf] %vm896_vm0, %v1057_v4  ;;  %916 = vst.msk [vmem:[%s1580_s28 + $0x4c] sm:$0xf] %vm896_vm0, %v1073_v5  ;;  %v710_v18 = vadd.f32 %v1560_v30, %v671_v7  ;;  %v550_v22 = vpop.f32.mrb[7].mxu0  ;;  %v614_v23 = vpop.f32.mrb[7].mxu1 }
 0x131   : > { %v726_v19 = vadd.f32 %v1560_v30, %v687_v8  ;;  %v672_v20 = vmul.f32 %v1133_v16, %v1553_v9  ;;  %v688_v21 = vmul.f32 %v1149_v17, %v1553_v9  ;;  %898 = vst.msk [vmem:[%s1580_s28 + $0x4] sm:$0xf] %vm896_vm0, %v1055_v12  ;;  %914 = vst.msk [vmem:[%s1580_s28 + $0x44] sm:$0xf] %vm896_vm0, %v1071_v13 }
 0x132   : > { %v708_v6 = vadd.f32 %v1560_v30, %v669_v14  ;;  %v724_v24 = vadd.f32 %v1560_v30, %v685_v15  ;;  %v670_v25 = vmul.f32 %v1553_v9, %v550_v22  ;;  %v686_v26 = vmul.f32 %v1553_v9, %v614_v23 }
 0x133   : > { %v742_v27 = vmax.f32 %v710_v18, 0.0  ;;  %v758_v28 = vmax.f32 %v726_v19, 0.0  ;;  %v711_v29 = vadd.f32 %v1560_v30, %v672_v20  ;;  %v727_v31 = vadd.f32 %v1560_v30, %v688_v21 }
 0x134   : > { %v740_v32 = vmax.f32 %v708_v6, 0.0  ;;  %v756_v33 = vmax.f32 %v724_v24, 0.0  ;;  %v709_v34 = vadd.f32 %v1560_v30, %v670_v25  ;;  %v725_v35 = vadd.f32 %v1560_v30, %v686_v26 }
 0x135   : > { %v1060_v36 = vpack.c.bf16 %v742_v27, %v742_v27  ;;  %v1076_v37 = vpack.c.bf16 %v758_v28, %v758_v28  ;;  %v743_v38 = vmax.f32 %v711_v29, 0.0  ;;  %v759_v39 = vmax.f32 %v727_v31, 0.0  ;;  %v1136_v44 = vpop.f32.mrb[8].mxu0  ;;  %v1152_v45 = vpop.f32.mrb[8].mxu1 }
 0x136   : > { %v1058_v40 = vpack.c.bf16 %v740_v32, %v740_v32  ;;  %v1074_v41 = vpack.c.bf16 %v756_v33, %v756_v33  ;;  %v741_v42 = vmax.f32 %v709_v34, 0.0  ;;  %v757_v43 = vmax.f32 %v725_v35, 0.0  ;;  %v563_v50 = vpop.f32.mrb[9].mxu0  ;;  %v627_v51 = vpop.f32.mrb[9].mxu1 }
 0x137   : > { %903 = vst.msk [vmem:[%s1580_s28 + $0x18] sm:$0xf] %vm896_vm0, %v1060_v36  ;;  %919 = vst.msk [vmem:[%s1580_s28 + $0x58] sm:$0xf] %vm896_vm0, %v1076_v37  ;;  %v1061_v46 = vpack.c.bf16 %v743_v38, %v743_v38  ;;  %v1077_v47 = vpack.c.bf16 %v759_v39, %v759_v39  ;;  %v675_v48 = vmul.f32 %v1136_v44, %v1553_v9  ;;  %v1137_v56 = vpop.f32.mrb[10].mxu0  ;;  %v1153_v57 = vpop.f32.mrb[10].mxu1 }
 0x138   : > { %v691_v49 = vmul.f32 %v1152_v45, %v1553_v9  ;;  %901 = vst.msk [vmem:[%s1580_s28 + $0x10] sm:$0xf] %vm896_vm0, %v1058_v40  ;;  %917 = vst.msk [vmem:[%s1580_s28 + $0x50] sm:$0xf] %vm896_vm0, %v1074_v41  ;;  %v1059_v52 = vpack.c.bf16 %v741_v42, %v741_v42  ;;  %v1075_v53 = vpack.c.bf16 %v757_v43, %v757_v43  ;;  %v566_v62 = vpop.f32.mrb[11].mxu0  ;;  %v630_v63 = vpop.f32.mrb[11].mxu1 }
 0x139   : > { %v673_v54 = vmul.f32 %v1553_v9, %v563_v50  ;;  %v689_v55 = vmul.f32 %v1553_v9, %v627_v51  ;;  %904 = vst.msk [vmem:[%s1580_s28 + $0x1c] sm:$0xf] %vm896_vm0, %v1061_v46  ;;  %920 = vst.msk [vmem:[%s1580_s28 + $0x5c] sm:$0xf] %vm896_vm0, %v1077_v47  ;;  %v714_v58 = vadd.f32 %v1560_v30, %v675_v48 }
 0x13a   : > { %v730_v59 = vadd.f32 %v1560_v30, %v691_v49  ;;  %v676_v60 = vmul.f32 %v1137_v56, %v1553_v9  ;;  %v692_v61 = vmul.f32 %v1153_v57, %v1553_v9  ;;  %902 = vst.msk [vmem:[%s1580_s28 + $0x14] sm:$0xf] %vm896_vm0, %v1059_v52  ;;  %918 = vst.msk [vmem:[%s1580_s28 + $0x54] sm:$0xf] %vm896_vm0, %v1075_v53 }
 0x13b   : > { %v712_v0 = vadd.f32 %v1560_v30, %v673_v54  ;;  %v728_v1 = vadd.f32 %v1560_v30, %v689_v55  ;;  %v674_v2 = vmul.f32 %v1553_v9, %v566_v62  ;;  %v690_v3 = vmul.f32 %v1553_v9, %v630_v63 }
 0x13c   : > { %v746_v4 = vmax.f32 %v714_v58, 0.0  ;;  %v762_v5 = vmax.f32 %v730_v59, 0.0  ;;  %v715_v7 = vadd.f32 %v1560_v30, %v676_v60  ;;  %v731_v8 = vadd.f32 %v1560_v30, %v692_v61 }
 0x13d   : > { %v744_v10 = vmax.f32 %v712_v0, 0.0  ;;  %v760_v11 = vmax.f32 %v728_v1, 0.0  ;;  %v713_v12 = vadd.f32 %v1560_v30, %v674_v2  ;;  %v729_v13 = vadd.f32 %v1560_v30, %v690_v3  ;;  %v1140_v22 = vpop.f32.mrb[12].mxu0  ;;  %v1156_v23 = vpop.f32.mrb[12].mxu1 }
 0x13e   : > { %v1064_v14 = vpack.c.bf16 %v746_v4, %v746_v4  ;;  %v1080_v15 = vpack.c.bf16 %v762_v5, %v762_v5  ;;  %v747_v16 = vmax.f32 %v715_v7, 0.0  ;;  %v763_v17 = vmax.f32 %v731_v8, 0.0  ;;  %v579_v27 = vpop.f32.mrb[13].mxu0  ;;  %v643_v28 = vpop.f32.mrb[13].mxu1 }
 0x13f   : > { %v1062_v18 = vpack.c.bf16 %v744_v10, %v744_v10  ;;  %v1078_v19 = vpack.c.bf16 %v760_v11, %v760_v11  ;;  %v745_v20 = vmax.f32 %v713_v12, 0.0  ;;  %v761_v21 = vmax.f32 %v729_v13, 0.0  ;;  %v1141_v34 = vpop.f32.mrb[14].mxu0  ;;  %v1157_v35 = vpop.f32.mrb[14].mxu1 }
 0x140   : > { %907 = vst.msk [vmem:[%s1580_s28 + $0x28] sm:$0xf] %vm896_vm0, %v1064_v14  ;;  %923 = vst.msk [vmem:[%s1580_s28 + $0x68] sm:$0xf] %vm896_vm0, %v1080_v15  ;;  %v1065_v6 = vpack.c.bf16 %v747_v16, %v747_v16  ;;  %v1081_v24 = vpack.c.bf16 %v763_v17, %v763_v17  ;;  %v679_v25 = vmul.f32 %v1140_v22, %v1553_v9  ;;  %v582_v40 = vpop.f32.mrb[15].mxu0  ;;  %v646_v41 = vpop.f32.mrb[15].mxu1 }
 0x141   : > { %v695_v26 = vmul.f32 %v1156_v23, %v1553_v9  ;;  %905 = vst.msk [vmem:[%s1580_s28 + $0x20] sm:$0xf] %vm896_vm0, %v1062_v18  ;;  %921 = vst.msk [vmem:[%s1580_s28 + $0x60] sm:$0xf] %vm896_vm0, %v1078_v19  ;;  %v1063_v29 = vpack.c.bf16 %v745_v20, %v745_v20  ;;  %v1079_v31 = vpack.c.bf16 %v761_v21, %v761_v21 }
 0x142   : > { %v677_v32 = vmul.f32 %v1553_v9, %v579_v27  ;;  %v693_v33 = vmul.f32 %v1553_v9, %v643_v28  ;;  %908 = vst.msk [vmem:[%s1580_s28 + $0x2c] sm:$0xf] %vm896_vm0, %v1065_v6  ;;  %924 = vst.msk [vmem:[%s1580_s28 + $0x6c] sm:$0xf] %vm896_vm0, %v1081_v24  ;;  %v718_v36 = vadd.f32 %v1560_v30, %v679_v25 }
 0x143   : > { %v734_v37 = vadd.f32 %v1560_v30, %v695_v26  ;;  %v680_v38 = vmul.f32 %v1141_v34, %v1553_v9  ;;  %v696_v39 = vmul.f32 %v1157_v35, %v1553_v9  ;;  %906 = vst.msk [vmem:[%s1580_s28 + $0x24] sm:$0xf] %vm896_vm0, %v1063_v29  ;;  %922 = vst.msk [vmem:[%s1580_s28 + $0x64] sm:$0xf] %vm896_vm0, %v1079_v31 }
 0x144   : > { %v716_v42 = vadd.f32 %v1560_v30, %v677_v32  ;;  %v732_v43 = vadd.f32 %v1560_v30, %v693_v33  ;;  %v678_v44 = vmul.f32 %v1553_v9, %v582_v40  ;;  %v694_v45 = vmul.f32 %v1553_v9, %v646_v41 }
 0x145   : > { %v750_v46 = vmax.f32 %v718_v36, 0.0  ;;  %v766_v47 = vmax.f32 %v734_v37, 0.0  ;;  %v719_v48 = vadd.f32 %v1560_v30, %v680_v38  ;;  %v735_v49 = vadd.f32 %v1560_v30, %v696_v39 }
 0x146   : > { %v748_v50 = vmax.f32 %v716_v42, 0.0  ;;  %v764_v51 = vmax.f32 %v732_v43, 0.0  ;;  %v717_v52 = vadd.f32 %v1560_v30, %v678_v44  ;;  %v733_v53 = vadd.f32 %v1560_v30, %v694_v45 }
 0x147   : > { %v1068_v54 = vpack.c.bf16 %v750_v46, %v750_v46  ;;  %v1084_v55 = vpack.c.bf16 %v766_v47, %v766_v47  ;;  %v751_v9 = vmax.f32 %v719_v48, 0.0  ;;  %v767_v56 = vmax.f32 %v735_v49, 0.0 }
 0x148   : > { %v1066_v57 = vpack.c.bf16 %v748_v50, %v748_v50  ;;  %v1082_v58 = vpack.c.bf16 %v764_v51, %v764_v51  ;;  %v749_v59 = vmax.f32 %v717_v52, 0.0  ;;  %v765_v60 = vmax.f32 %v733_v53, 0.0 }
 0x149   : > { %911 = vst.msk [vmem:[%s1580_s28 + $0x38] sm:$0xf] %vm896_vm0, %v1068_v54  ;;  %927 = vst.msk [vmem:[%s1580_s28 + $0x78] sm:$0xf] %vm896_vm0, %v1084_v55  ;;  %v1069_v61 = vpack.c.bf16 %v751_v9, %v751_v9  ;;  %v1085_v62 = vpack.c.bf16 %v767_v56, %v767_v56 }
 0x14a   : > { %909 = vst.msk [vmem:[%s1580_s28 + $0x30] sm:$0xf] %vm896_vm0, %v1066_v57  ;;  %925 = vst.msk [vmem:[%s1580_s28 + $0x70] sm:$0xf] %vm896_vm0, %v1082_v58  ;;  %v1067_v30 = vpack.c.bf16 %v749_v59, %v749_v59  ;;  %v1083_v63 = vpack.c.bf16 %v765_v60, %v765_v60 }
 0x14b   : > { %912 = vst.msk [vmem:[%s1580_s28 + $0x3c] sm:$0xf] %vm896_vm0, %v1069_v61  ;;  %928 = vst.msk [vmem:[%s1580_s28 + $0x7c] sm:$0xf] %vm896_vm0, %v1085_v62 }
 0x14c   : > { %910 = vst.msk [vmem:[%s1580_s28 + $0x34] sm:$0xf] %vm896_vm0, %v1067_v30  ;;  %926 = vst.msk [vmem:[%s1580_s28 + $0x74] sm:$0xf] %vm896_vm0, %v1083_v63 }
 0x14d PF: > { %p16_p8 = scmp.ge.s32.totalorder %s1347_s26, 4   ;;  %s1719_s21 = smov %s1279_s22 }
 0x14e   : > { %s1720_s22 = smov %s1283_s23  ;;  %s1721_s23 = smov %s1357_s29 }
 0x14f   : > { %s1722_s24 = smov %s1347_s26  ;;  %18 = sbr.rel (!%p16_p8) target bundleno = 3 (0x3), region = 84 }
 0x156   :  { %951 = vsyncpa [#allocation3], 1 }
 0x157   :  { %953 = vsyncpa [#allocation3 + $0x1], 1 }

// kernel: preact_bottleneck_forward.5
= control target key start
LH: loop header
LB: loop body
LE: loop exit
PB: predicated region body
PF: predicated region fallthrough
CT: control target
= control target key end

     0   :  { %8 = vsyncpa [#allocation3], 0  ;;  %s1160_s0 = inlined_call_operand.vmem [shape: bf16[512,32], index: 0, kind: input, shape index: {}]   ;;  %s1161_s1 = inlined_call_operand.vmem [shape: bf16[32,128], index: 1, kind: input, shape index: {}]   ;;  %s1162_s2 = inlined_call_operand.vmem [shape: f32[512,128], index: 2, kind: input, shape index: {}]   ;;  %s1163_s3 = inlined_call_operand.hbm [shape: f32[512,128], index: 3, kind: output, shape index: {}]  }
   0x1   :  { %10 = vsyncpa [#allocation3 + $0x1], 0  ;;  %s938_s12 = smov 0   ;;  %s940_s13 = smov 0  }
   0x2   :  { %s942_s14 = smov 0   ;;  %s944_s15 = smov 0  }
   0x3 LB: > { %s959_s16 = sadd.s32 4294967295, %s913_s15   ;;  %s685_s17 = sadd.s32 4294967294, %s913_s15   ;;  %s913_s15 = sphi %s944_s15, %s1169_s15   ;;  %s909_s14 = sphi %s942_s14, %s1168_s14   ;;  %s905_s13 = sphi %s940_s13, %s1167_s13   ;;  %s901_s12 = sphi %s938_s12, %s1166_s12  }
   0x4   : > { %s963_s18 = sadd.s32 1, %s913_s15   ;;  %s96_s19 = sadd.s32 1, %s909_s14 }
   0x5   : > { %s93_s20 = ssub.s32 %s913_s15, %s963_s18  ;;  %p106_p0 = scmp.ne.s32.totalorder %s909_s14, %s905_s13 }
   0x6   : > { %p94_p1 = scmp.eq.s32.totalorder %s93_s20, 0  ;;  %p107_p2 = scmp.eq.s32.totalorder %s959_s16, 1 }
   0x7   : > { %p112_p3 = scmp.ne.s32.totalorder %s905_s13, %s901_s12  ;;  %p113_p4 = scmp.eq.s32.totalorder %s685_s17, 1 }
   0x8   : > { %s974_s21 = scalar_select %p94_p1, %s909_s14, %s96_s19  }
   0x9   : > { %p976_p5 = por %p107_p2, %p106_p0  ;;  %p980_p6 = por %p113_p4, %p112_p3 }
   0xa   : > { %p688_p7 = scmp.ge.s32.totalorder %s913_s15, 1  ;;  %p152_p8 = scmp.lt.s32.totalorder %s913_s15, 3 }
   0xc   : > { %p153_p9 = pnand %p688_p7, %p152_p8 }
   0xd   : > { %v833_v0 = vld [vmem:[%s1161_s1] sm:$0xff] (!%p153_p9)   ;;  %s690_s26 = sshll.u32 (!%p153_p9), %s959_s16, 5  ;;  %v834_v1 = vld [vmem:[%s1161_s1 + $0x8] sm:$0xff] (!%p153_p9)   ;;  %vm355_vm0 = vcmask (!%p153_p9), 261120   ;;  %s178_s7 = sand.u32 (!%p153_p9), 1, %s905_s13  }
   0xe   : > { %156 = sbr.rel (%p153_p9) target bundleno = 283 (0x11b), region = 32  ;;  %p182_p10 = scmp.lt.s32.totalorder (!%p153_p9), %s690_s26, 63  ;;  %752 = vmatprep.subr.bf16.mxu0 (!%p153_p9), %v833_v0  ;;  %788 = vmatprep.subr.bf16.mxu1 (!%p153_p9), %v833_v0 }
   0xf   : > { %753 = vmatpush3.bf16.msra.mxu0 (!%p153_p9), %v833_v0  ;;  %790 = vmatpush3.bf16.msra.mxu1 (!%p153_p9), %v833_v0  ;;  %s689_s11 = sshll.u32 (!%p153_p9), %s178_s7, 8  ;;  %s733_s19 = sshll.u32 (!%p153_p9), %s959_s16, 12 }
  0x10   : > { %754 = vmatprep.subr.bf16.mxu0 (!%p153_p9), %v834_v1  ;;  %789 = vmatprep.subr.bf16.mxu1 (!%p153_p9), %v834_v1  ;;  %s1050_s17 = scalar_lea.vmem (!%p153_p9), [#allocation2], %s689_s11  ;;  %s1108_s25 = scalar_lea.hbm (!%p153_p9), %s1163_s3, %s733_s19 }
  0x11   : > { %s611_s20 = sshll.u32 (!%p153_p9), %s1050_s17, 4  ;;  %s915_s28 = smov (!%p153_p9), [#allocation2]   ;;  %s1110_s20 = int_to_ptr.vmem [resolvable:$true] %s611_s20 }
  0x12   : > { %s851_s27 = scalar_lea.vmem (!%p153_p9), %s1110_s20, 4096 }
  0x13   : > { %755 = vmatpush3.bf16.msra.mxu0 (!%p153_p9), %v834_v1  ;;  %791 = vmatpush3.bf16.msra.mxu1 (!%p153_p9), %v834_v1  ;;  %p852_p11 = scmp.ne.s32.totalorder (!%p153_p9), %s1110_s20, %s851_s27 }
  0x15   : > { %s1171_s26 = smov (!%p182_p10, %s690_s26), 63  ;;  %p853_p12 = pnand %p852_p11, %p976_p5 }
  0x16   : > { %s691_s29 = sshll.u32 %s1171_s26, 2  ;;  %s693_s6 = sshll.u32 %s1171_s26, 3 }
  0x17   : > { %s999_s5 = scalar_lea.vmem %s1160_s0, %s691_s29  ;;  %s1038_s10 = scalar_lea.vmem %s1162_s2, %s693_s6 }
  0x18   : > { %v835_v2 = vld [vmem:[%s999_s5] sm:$0xff]   ;;  %v837_v4 = vld [vmem:[%s999_s5 + $0x8] sm:$0xff]   ;;  %v839_v6 = vld [vmem:[%s999_s5 + $0x10] sm:$0xff]   ;;  %s1119_s26 = scalar_lea.sflag [#allocation3], %s178_s7  ;;  %p854_p13 = pneg %p853_p12 }
  0x19   : > { %v836_v3 = vld [vmem:[%s999_s5 + $0x40] sm:$0xff]   ;;  %756 = vmatprep.mubr.msk.bf16.mxu0 %vm355_vm0, %v835_v2  ;;  %v838_v5 = vld [vmem:[%s999_s5 + $0x48] sm:$0xff]   ;;  %v840_v7 = vld [vmem:[%s999_s5 + $0x50] sm:$0xff]   ;;  %s855_s29 = sshll.u32 %s915_s28, 4  ;;  %s856_s29 = int_to_ptr.vmem [resolvable:$false] %s855_s29 }
  0x1a   : > { %772 = vmatprep.mubr.msk.bf16.mxu1 %vm355_vm0, %v836_v3  ;;  %757 = vmatmul.mubr.msk.bf16.vlgmr.msra.gmra.mrb[0].mxu0 %vm355_vm0, %v837_v4  ;;  %v841_v8 = vld [vmem:[%s999_s5 + $0x18] sm:$0xff]   ;;  %v843_v10 = vld [vmem:[%s999_s5 + $0x20] sm:$0xff]   ;;  %v845_v12 = vld [vmem:[%s999_s5 + $0x28] sm:$0xff]   ;;  %s857_s30 = scalar_lea.vmem %s856_s29, 8192  ;;  %p858_p0 = scmp.lt.s32.totalorder %s1110_s20, %s856_s29 }
  0x1b   : > { %773 = vmatmul.mubr.msk.bf16.vlgmr.msra.gmra.mrb[0].mxu1 %vm355_vm0, %v838_v5  ;;  %760 = vmatprep.mubr.msk.bf16.mxu0 %vm355_vm0, %v839_v6  ;;  %v842_v9 = vld [vmem:[%s999_s5 + $0x58] sm:$0xff]   ;;  %v844_v11 = vld [vmem:[%s999_s5 + $0x60] sm:$0xff]   ;;  %v846_v13 = vld [vmem:[%s999_s5 + $0x68] sm:$0xff]   ;;  %p859_p1 = scmp.lt.s32.totalorder %s857_s30, %s851_s27 }
  0x1c   : > { %776 = vmatprep.mubr.msk.bf16.mxu1 %vm355_vm0, %v840_v7  ;;  %v847_v14 = vld [vmem:[%s999_s5 + $0x30] sm:$0xff]   ;;  %v849_v16 = vld [vmem:[%s999_s5 + $0x38] sm:$0xff]   ;;  %v231_v20 = vld [vmem:[%s1038_s10] sm:$0xff] }
  0x1d   : > { %v848_v15 = vld [vmem:[%s999_s5 + $0x70] sm:$0xff]   ;;  %v850_v17 = vld [vmem:[%s999_s5 + $0x78] sm:$0xff]   ;;  %v247_v22 = vld [vmem:[%s1038_s10 + $0x80] sm:$0xff]  ;;  %p860_p2 = por %p859_p1, %p858_p0 }
  0x1e   : > { %v233_v18 = vld [vmem:[%s1038_s10 + $0x10] sm:$0xff]  ;;  %v234_v23 = vld [vmem:[%s1038_s10 + $0x18] sm:$0xff]  ;;  %v232_v28 = vld [vmem:[%s1038_s10 + $0x8] sm:$0xff] }
  0x1f   : > { %v249_v19 = vld [vmem:[%s1038_s10 + $0x90] sm:$0xff]  ;;  %v250_v27 = vld [vmem:[%s1038_s10 + $0x98] sm:$0xff]  ;;  %v248_v33 = vld [vmem:[%s1038_s10 + $0x88] sm:$0xff]  ;;  %p861_p3 = pnand %p860_p2, %p854_p13 }
  0x20   : > { %v237_v42 = vld [vmem:[%s1038_s10 + $0x30] sm:$0xff]  ;;  %v235_v44 = vld [vmem:[%s1038_s10 + $0x20] sm:$0xff]  ;;  %v238_v47 = vld [vmem:[%s1038_s10 + $0x38] sm:$0xff] }
  0x21   : > { %v253_v43 = vld [vmem:[%s1038_s10 + $0xb0] sm:$0xff]  ;;  %v251_v46 = vld [vmem:[%s1038_s10 + $0xa0] sm:$0xff]  ;;  %v254_v51 = vld [vmem:[%s1038_s10 + $0xb8] sm:$0xff] }
  0x22   : > { %761 = vmatmul.mubr.msk.bf16.gmra.mrb[4].mxu0 %vm355_vm0, %v841_v8  ;;  %v236_v52 = vld [vmem:[%s1038_s10 + $0x28] sm:$0xff]  ;;  %v241_v2 = vld [vmem:[%s1038_s10 + $0x50] sm:$0xff]  ;;  %v239_v4 = vld [vmem:[%s1038_s10 + $0x40] sm:$0xff] }
  0x23   : > { %777 = vmatmul.mubr.msk.bf16.gmra.mrb[4].mxu1 %vm355_vm0, %v842_v9  ;;  %764 = vmatprep.mubr.msk.bf16.mxu0 %vm355_vm0, %v843_v10  ;;  %v252_v57 = vld [vmem:[%s1038_s10 + $0xa8] sm:$0xff]  ;;  %v257_v3 = vld [vmem:[%s1038_s10 + $0xd0] sm:$0xff]  ;;  %v255_v6 = vld [vmem:[%s1038_s10 + $0xc0] sm:$0xff] }
  0x24   : > { %780 = vmatprep.mubr.msk.bf16.mxu1 %vm355_vm0, %v844_v11  ;;  %v242_v7 = vld [vmem:[%s1038_s10 + $0x58] sm:$0xff] }
  0x25   : > { %v258_v11 = vld [vmem:[%s1038_s10 + $0xd8] sm:$0xff] }
  0x2a   : > { %765 = vmatmul.mubr.msk.bf16.gmra.mrb[8].mxu0 %vm355_vm0, %v845_v12  ;;  %v240_v12 = vld [vmem:[%s1038_s10 + $0x48] sm:$0xff] }
  0x2b   : > { %781 = vmatmul.mubr.msk.bf16.gmra.mrb[8].mxu1 %vm355_vm0, %v846_v13  ;;  %768 = vmatprep.mubr.msk.bf16.mxu0 %vm355_vm0, %v847_v14 }
  0x2c   : > { %784 = vmatprep.mubr.msk.bf16.mxu1 %vm355_vm0, %v848_v15 }
  0x32   : > { %769 = vmatmul.mubr.msk.bf16.gmra.mrb[12].mxu0 %vm355_vm0, %v849_v16 }
  0x33   : > { %785 = vmatmul.mubr.msk.bf16.gmra.mrb[12].mxu1 %vm355_vm0, %v850_v17  ;;  %v256_v17 = vld [vmem:[%s1038_s10 + $0xc8] sm:$0xff] }
  0xed   : > { %v758_v21 = vpop.f32.mrb[0].mxu0 }
  0xee   : > { %v447_v24 = vadd.f32 %v758_v21, %v233_v18  ;;  %v774_v25 = vpop.f32.mrb[0].mxu1  ;;  %v438_v26 = vpop.f32.mrb[1].mxu0 }
  0xef   : > { %v511_v29 = vadd.f32 %v774_v25, %v249_v19  ;;  %v439_v30 = vadd.f32 %v438_v26, %v231_v20  ;;  %v502_v31 = vpop.f32.mrb[1].mxu1  ;;  %v759_v32 = vpop.f32.mrb[2].mxu0  ;;  %v245_v26 = vld [vmem:[%s1038_s10 + $0x70] sm:$0xff] }
  0xf0   : > { %567 = vst [vmem:[%s1050_s17 + $0x10] sm:$0xff] %v447_v24  ;;  %v503_v34 = vadd.f32 %v502_v31, %v247_v22  ;;  %v450_v35 = vadd.f32 %v759_v32, %v234_v23  ;;  %v775_v36 = vpop.f32.mrb[2].mxu1  ;;  %v441_v37 = vpop.f32.mrb[3].mxu0  ;;  %v246_v31 = vld [vmem:[%s1038_s10 + $0x78] sm:$0xff] }
  0xf1   : > { %583 = vst [vmem:[%s1050_s17 + $0x90] sm:$0xff] %v511_v29  ;;  %565 = vst [vmem:[%s1050_s17] sm:$0xff] %v439_v30  ;;  %v514_v38 = vadd.f32 %v775_v36, %v250_v27  ;;  %v442_v39 = vadd.f32 %v441_v37, %v232_v28  ;;  %v505_v40 = vpop.f32.mrb[3].mxu1  ;;  %v261_v27 = vld [vmem:[%s1038_s10 + $0xf0] sm:$0xff]  ;;  %v243_v28 = vld [vmem:[%s1038_s10 + $0x60] sm:$0xff] }
  0xf2   : > { %581 = vst [vmem:[%s1050_s17 + $0x80] sm:$0xff] %v503_v34  ;;  %568 = vst [vmem:[%s1050_s17 + $0x18] sm:$0xff] %v450_v35  ;;  %v506_v41 = vadd.f32 %v505_v40, %v248_v33  ;;  %v259_v30 = vld [vmem:[%s1038_s10 + $0xe0] sm:$0xff]  ;;  %v262_v35 = vld [vmem:[%s1038_s10 + $0xf8] sm:$0xff] }
  0xf3   : > { %584 = vst [vmem:[%s1050_s17 + $0x98] sm:$0xff] %v514_v38  ;;  %566 = vst [vmem:[%s1050_s17 + $0x8] sm:$0xff] %v442_v39  ;;  %v244_v36 = vld [vmem:[%s1038_s10 + $0x68] sm:$0xff] }
  0xf4   : > { %582 = vst [vmem:[%s1050_s17 + $0x88] sm:$0xff] %v506_v41  ;;  %v260_v41 = vld [vmem:[%s1038_s10 + $0xe8] sm:$0xff] }
  0xf5   : > { %v762_v45 = vpop.f32.mrb[4].mxu0 }
  0xf6   : > { %v463_v48 = vadd.f32 %v762_v45, %v237_v42  ;;  %v778_v49 = vpop.f32.mrb[4].mxu1  ;;  %v454_v50 = vpop.f32.mrb[5].mxu0 }
  0xf7   : > { %v527_v53 = vadd.f32 %v778_v49, %v253_v43  ;;  %v455_v54 = vadd.f32 %v454_v50, %v235_v44  ;;  %v518_v55 = vpop.f32.mrb[5].mxu1  ;;  %v763_v56 = vpop.f32.mrb[6].mxu0 }
  0xf8   : > { %571 = vst [vmem:[%s1050_s17 + $0x30] sm:$0xff] %v463_v48  ;;  %v519_v58 = vadd.f32 %v518_v55, %v251_v46  ;;  %v466_v59 = vadd.f32 %v763_v56, %v238_v47  ;;  %v779_v60 = vpop.f32.mrb[6].mxu1  ;;  %v457_v61 = vpop.f32.mrb[7].mxu0 }
  0xf9   : > { %587 = vst [vmem:[%s1050_s17 + $0xb0] sm:$0xff] %v527_v53  ;;  %569 = vst [vmem:[%s1050_s17 + $0x20] sm:$0xff] %v455_v54  ;;  %v530_v62 = vadd.f32 %v779_v60, %v254_v51  ;;  %v458_v63 = vadd.f32 %v457_v61, %v236_v52  ;;  %v521_v0 = vpop.f32.mrb[7].mxu1 }
  0xfa   : > { %585 = vst [vmem:[%s1050_s17 + $0xa0] sm:$0xff] %v519_v58  ;;  %572 = vst [vmem:[%s1050_s17 + $0x38] sm:$0xff] %v466_v59  ;;  %v522_v1 = vadd.f32 %v521_v0, %v252_v57 }
  0xfb   : > { %588 = vst [vmem:[%s1050_s17 + $0xb8] sm:$0xff] %v530_v62  ;;  %570 = vst [vmem:[%s1050_s17 + $0x28] sm:$0xff] %v458_v63 }
  0xfc   : > { %586 = vst [vmem:[%s1050_s17 + $0xa8] sm:$0xff] %v522_v1 }
  0xfd   : > { %v766_v5 = vpop.f32.mrb[8].mxu0 }
  0xfe   : > { %v479_v8 = vadd.f32 %v766_v5, %v241_v2  ;;  %v782_v9 = vpop.f32.mrb[8].mxu1  ;;  %v470_v10 = vpop.f32.mrb[9].mxu0 }
  0xff   : > { %v543_v13 = vadd.f32 %v782_v9, %v257_v3  ;;  %v471_v14 = vadd.f32 %v470_v10, %v239_v4  ;;  %v534_v15 = vpop.f32.mrb[9].mxu1  ;;  %v767_v16 = vpop.f32.mrb[10].mxu0 }
 0x100   : > { %575 = vst [vmem:[%s1050_s17 + $0x50] sm:$0xff] %v479_v8  ;;  %v535_v18 = vadd.f32 %v534_v15, %v255_v6  ;;  %v482_v19 = vadd.f32 %v767_v16, %v242_v7  ;;  %v783_v20 = vpop.f32.mrb[10].mxu1  ;;  %v473_v21 = vpop.f32.mrb[11].mxu0 }
 0x101   : > { %591 = vst [vmem:[%s1050_s17 + $0xd0] sm:$0xff] %v543_v13  ;;  %573 = vst [vmem:[%s1050_s17 + $0x40] sm:$0xff] %v471_v14  ;;  %v546_v22 = vadd.f32 %v783_v20, %v258_v11  ;;  %v474_v23 = vadd.f32 %v473_v21, %v240_v12  ;;  %v537_v24 = vpop.f32.mrb[11].mxu1 }
 0x102   : > { %589 = vst [vmem:[%s1050_s17 + $0xc0] sm:$0xff] %v535_v18  ;;  %576 = vst [vmem:[%s1050_s17 + $0x58] sm:$0xff] %v482_v19  ;;  %v538_v25 = vadd.f32 %v537_v24, %v256_v17 }
 0x103   : > { %592 = vst [vmem:[%s1050_s17 + $0xd8] sm:$0xff] %v546_v22  ;;  %574 = vst [vmem:[%s1050_s17 + $0x48] sm:$0xff] %v474_v23 }
 0x104   : > { %590 = vst [vmem:[%s1050_s17 + $0xc8] sm:$0xff] %v538_v25 }
 0x105   : > { %v770_v29 = vpop.f32.mrb[12].mxu0 }
 0x106   : > { %v495_v32 = vadd.f32 %v770_v29, %v245_v26  ;;  %v786_v33 = vpop.f32.mrb[12].mxu1  ;;  %v486_v34 = vpop.f32.mrb[13].mxu0 }
 0x107   : > { %v559_v37 = vadd.f32 %v786_v33, %v261_v27  ;;  %v487_v38 = vadd.f32 %v486_v34, %v243_v28  ;;  %v550_v39 = vpop.f32.mrb[13].mxu1  ;;  %v771_v40 = vpop.f32.mrb[14].mxu0 }
 0x108   : > { %579 = vst [vmem:[%s1050_s17 + $0x70] sm:$0xff] %v495_v32  ;;  %v551_v42 = vadd.f32 %v550_v39, %v259_v30  ;;  %v498_v43 = vadd.f32 %v771_v40, %v246_v31  ;;  %v787_v44 = vpop.f32.mrb[14].mxu1  ;;  %v489_v45 = vpop.f32.mrb[15].mxu0 }
 0x109   : > { %595 = vst [vmem:[%s1050_s17 + $0xf0] sm:$0xff] %v559_v37  ;;  %577 = vst [vmem:[%s1050_s17 + $0x60] sm:$0xff] %v487_v38  ;;  %v562_v46 = vadd.f32 %v787_v44, %v262_v35  ;;  %v490_v47 = vadd.f32 %v489_v45, %v244_v36  ;;  %v553_v48 = vpop.f32.mrb[15].mxu1 }
 0x10a   : > { %593 = vst [vmem:[%s1050_s17 + $0xe0] sm:$0xff] %v551_v42  ;;  %580 = vst [vmem:[%s1050_s17 + $0x78] sm:$0xff] %v498_v43  ;;  %v554_v49 = vadd.f32 %v553_v48, %v260_v41 }
 0x10b   : > { %596 = vst [vmem:[%s1050_s17 + $0xf8] sm:$0xff] %v562_v46  ;;  %578 = vst [vmem:[%s1050_s17 + $0x68] sm:$0xff] %v490_v47 }
 0x10c   : > { %594 = vst [vmem:[%s1050_s17 + $0xe8] sm:$0xff] %v554_v49 }
 0x10d   : > { %864 = shalt.err (!%p861_p3)
}
 0x10e   : > { %s865_s4 = scalar_lea.hbm %s1108_s25, 4096  ;;  %s869_s7 = scalar_lea.hbm %s1163_s3, 8192 }
 0x10f   : > { %p866_p4 = scmp.ne.s32.totalorder %s1108_s25, %s865_s4  ;;  %p870_p9 = scmp.lt.u32.totalorder %s1108_s25, %s1163_s3 }
 0x110   : > { %p871_p10 = scmp.lt.u32.totalorder %s869_s7, %s865_s4  ;;  %p873_p12 = scmp.lt.u32.totalorder %s865_s4, %s1108_s25 }
 0x111   : > { %p867_p7 = pnand %p866_p4, %p976_p5 }
 0x112   : > { %p872_p11 = por %p871_p10, %p870_p9 }
 0x113   : > { %p868_p8 = pneg %p867_p7 }
 0x114   : > { %p874_p13 = por %p873_p12, %p872_p11 }
 0x116   : > { %p875_p0 = pnand %p874_p13, %p868_p8 }
 0x118   : > { %878 = shalt.err (!%p875_p0)
}
 0x119   : > { %s916_s10 = smov 128   ;;  %s917_s11 = smov 8  }
 0x11a   : > { %792 = dma.vmem_to_hbm [thread:$0]  (%p976_p5), %s1110_s20, 4096, %s1108_s25, %s1119_s26, %s916_s10, %s916_s10, %s917_s11  }
 0x11b PF: > { %p798_p1 = scmp.ge.s32.totalorder %s913_s15, 2  ;;  %s626_s17 = sand.u32 1, %s901_s12  }
 0x11c   : > { %s627_s19 = scalar_lea.sflag [#allocation3], %s626_s17 }
 0x11d   : > { %p795_p2 = pnand %p798_p1, %p980_p6 }
 0x11f   : > { %896 = dma.done.wait (!%p795_p2), %s627_s19, 4096  }
 0x120   : > { %898 = vsyncadd (!%p795_p2), %s627_s19, 4294963200  ;;  %p13_p3 = scmp.ge.s32.totalorder %s963_s18, 4   ;;  %s1166_s12 = smov %s905_s13 }
 0x121   : > { %s1167_s13 = smov %s909_s14  ;;  %s1168_s14 = smov %s974_s21 }
 0x122   : > { %s1169_s15 = smov %s963_s18  ;;  %15 = sbr.rel (!%p13_p3) target bundleno = 3 (0x3), region = 70 }
 0x129   :  { %632 = vsyncpa [#allocation3], 1 }
 0x12a   :  { %634 = vsyncpa [#allocation3 + $0x1], 1 }

// kernel: preact_bottleneck_forward.4
= control target key start
LH: loop header
LB: loop body
LE: loop exit
PB: predicated region body
PF: predicated region fallthrough
CT: control target
= control target key end

     0   :  { %s3125_s15 = smov 0   ;;  %s4443_s0 = inlined_call_operand.vmem [shape: bf16[2,16,16,32], index: 0, kind: input, shape index: {}]   ;;  %s4444_s1 = inlined_call_operand.vmem [shape: bf16[288,32], index: 1, kind: input, shape index: {}]   ;;  %s4445_s2 = inlined_call_operand.vmem [shape: f32[1,32], index: 2, kind: input, shape index: {}]   ;;  %s4446_s3 = inlined_call_operand.vmem [shape: f32[1,32], index: 3, kind: input, shape index: {}]   ;;  %s4447_s4 = inlined_call_operand.vmem [shape: bf16[2,256,32], index: 4, kind: output, shape index: {}]  }
   0x1 LB: > { %s2684_s16 = sadd.s32 4294967295, %s3094_s15   ;;  %p2688_p0 = scmp.ge.s32.totalorder %s3094_s15, 1  ;;  %s3094_s15 = sphi %s3125_s15, %s14_s15  }
   0x2   : > { %p162_p1 = scmp.lt.s32.totalorder %s3094_s15, 3 }
   0x4   : > { %p163_p2 = pnand %p2688_p0, %p162_p1 }
   0x5   : > { %vm199_vm0 = vcmask (!%p163_p2), 261120   ;;  %vm202_vm1 = vcmask (!%p163_p2), 254976   ;;  %v3096_v0 = vmov (!%p163_p2), 0.0   ;;  %p188_p3 = scmp.lt.s32.totalorder (!%p163_p2), %s2684_s16, 1  ;;  %v3070_v1 = vld [vmem:[%s4444_s1 + $0x40] sm:$0xff] (!%p163_p2)   ;;  %s3097_s25 = smov (!%p163_p2), 32  }
   0x6   : > { %166 = sbr.rel (%p163_p2) target bundleno = 770 (0x302), region = 36  ;;  %200 = vst.msk [vmem:[#allocation2] sm:$0xff] (!%p163_p2), %vm199_vm0, %v3096_v0  ;;  %201 = vst.msk [vmem:[#allocation2 + $0x8] sm:$0xff] (!%p163_p2), %vm199_vm0, %v3096_v0  ;;  %v3071_v2 = vld [vmem:[%s4444_s1] sm:$0xff] (!%p163_p2)   ;;  %2876 = vmatprep.subr.bf16.mxu0 (!%p163_p2), %v3070_v1  ;;  %3042 = vmatprep.subr.bf16.mxu1 (!%p163_p2), %v3070_v1  ;;  %s3098_s26 = smov (!%p163_p2), 64   ;;  %v3072_v30 = vld [vmem:[%s4444_s1 + $0x48] sm:$0xff] (!%p163_p2)  }
   0x7   : > { %204 = vst.msk [vmem:[#allocation2 + $0x18] sm:$0xff] (!%p163_p2), %vm199_vm0, %v3096_v0  ;;  %205 = vst.msk [vmem:[#allocation2 + $0x20] sm:$0xff] (!%p163_p2), %vm199_vm0, %v3096_v0  ;;  %2877 = vmatpush3.bf16.msra.mxu0 (!%p163_p2), %v3071_v2  ;;  %3050 = vmatpush3.bf16.msra.mxu1 (!%p163_p2), %v3071_v2  ;;  %v3073_v34 = vld [vmem:[%s4444_s1 + $0x8] sm:$0xff] (!%p163_p2)   ;;  %v3074_v38 = vld [vmem:[%s4444_s1 + $0x50] sm:$0xff] (!%p163_p2)   ;;  %s3099_s9 = smov (!%p163_p2), 96   ;;  %vm576_vm2 = vcmask (!%p163_p2), 523520  }
   0x8   : > { %207 = vst.msk [vmem:[#allocation2 + $0x30] sm:$0xff] (!%p163_p2), %vm199_vm0, %v3096_v0  ;;  %208 = vst.msk [vmem:[#allocation2 + $0x38] sm:$0xff] (!%p163_p2), %vm199_vm0, %v3096_v0  ;;  %2878 = vmatprep.subr.bf16.mxu0 (!%p163_p2), %v3072_v30  ;;  %v3075_v39 = vld [vmem:[%s4444_s1 + $0x10] sm:$0xff] (!%p163_p2)   ;;  %3043 = vmatprep.subr.bf16.mxu1 (!%p163_p2), %v3072_v30  ;;  %v3076_v1 = vld [vmem:[%s4444_s1 + $0x58] sm:$0xff] (!%p163_p2)   ;;  %vm769_vm3 = vcmask (!%p163_p2), 785920   ;;  %vm962_vm4 = vcmask (!%p163_p2), 1048320  }
   0x9   : > { %210 = vst.msk [vmem:[#allocation2 + $0x48] sm:$0xff] (!%p163_p2), %vm199_vm0, %v3096_v0  ;;  %211 = vst.msk [vmem:[#allocation2 + $0x50] sm:$0xff] (!%p163_p2), %vm199_vm0, %v3096_v0  ;;  %v3077_v2 = vld [vmem:[%s4444_s1 + $0x18] sm:$0xff] (!%p163_p2)   ;;  %vm2596_vm5 = vcmask (!%p163_p2), 257024  }
   0xa   : > { %213 = vst.msk [vmem:[#allocation2 + $0x60] sm:$0xff] (!%p163_p2), %vm199_vm0, %v3096_v0  ;;  %214 = vst.msk [vmem:[#allocation2 + $0x68] sm:$0xff] (!%p163_p2), %vm199_vm0, %v3096_v0 }
   0xb   : > { %216 = vst.msk [vmem:[#allocation2 + $0x78] sm:$0xff] (!%p163_p2), %vm199_vm0, %v3096_v0  ;;  %217 = vst.msk [vmem:[#allocation2 + $0x80] sm:$0xff] (!%p163_p2), %vm199_vm0, %v3096_v0  ;;  %2879 = vmatpush3.bf16.msra.mxu0 (!%p163_p2), %v3073_v34  ;;  %3051 = vmatpush3.bf16.msra.mxu1 (!%p163_p2), %v3073_v34 }
   0xc   : > { %219 = vst.msk [vmem:[#allocation2 + $0x90] sm:$0xff] (!%p163_p2), %vm199_vm0, %v3096_v0  ;;  %220 = vst.msk [vmem:[#allocation2 + $0x98] sm:$0xff] (!%p163_p2), %vm199_vm0, %v3096_v0  ;;  %2880 = vmatprep.subr.bf16.mxu0 (!%p163_p2), %v3074_v38  ;;  %3044 = vmatprep.subr.bf16.mxu1 (!%p163_p2), %v3074_v38 }
   0xd   : > { %222 = vst.msk [vmem:[#allocation2 + $0xa8] sm:$0xff] %vm199_vm0, %v3096_v0  ;;  %223 = vst.msk [vmem:[#allocation2 + $0xb0] sm:$0xff] %vm199_vm0, %v3096_v0  ;;  %s4449_s16 = smov (!%p188_p3, %s2684_s16), 1  ;;  %v416_v6 = vld [vmem:[#allocation2 + $0x1] sm:$0xff] }
   0xe   : > { %225 = vst.msk [vmem:[#allocation2 + $0xc0] sm:$0xff] %vm199_vm0, %v3096_v0  ;;  %226 = vst.msk [vmem:[#allocation2 + $0xc8] sm:$0xff] %vm199_vm0, %v3096_v0  ;;  %s2763_s17 = sshll.u32 %s4449_s16, 7  ;;  %v609_v7 = vld [vmem:[#allocation2 + $0x2] sm:$0xff]  ;;  %480 = vrot.lane.b32.xlu1 %v416_v6, %s3097_s25 }
   0xf   : > { %228 = vst.msk [vmem:[#allocation2 + $0xd8] sm:$0xff] %vm199_vm0, %v3096_v0  ;;  %229 = vst.msk [vmem:[#allocation2 + $0xe0] sm:$0xff] %vm199_vm0, %v3096_v0  ;;  %s3202_s22 = scalar_lea.vmem %s4443_s0, %s2763_s17  ;;  %673 = vrot.lane.b32.xlu0 %v609_v7, %s3098_s26  ;;  %v352_v28 = vld [vmem:[#allocation2] sm:$0xff]  ;;  %v353_v29 = vld [vmem:[#allocation2 + $0x8] sm:$0xff]  ;;  %2881 = vmatpush3.bf16.msra.mxu0 %v3075_v39  ;;  %s4271_s20 = scalar_lea.vmem %s4447_s4, %s2763_s17 }
  0x10   : > { %231 = vst.msk [vmem:[#allocation2 + $0xf0] sm:$0xff] %vm199_vm0, %v3096_v0  ;;  %232 = vst.msk [vmem:[#allocation2 + $0xf8] sm:$0xff] %vm199_vm0, %v3096_v0  ;;  %v2798_v3 = vld [vmem:[%s3202_s22] sm:$0xff]   ;;  %v2861_v4 = vld [vmem:[%s3202_s22 + $0x8] sm:$0xff]   ;;  %3052 = vmatpush3.bf16.msra.mxu1 %v3075_v39  ;;  %2882 = vmatprep.subr.bf16.mxu0 %v3076_v1 }
  0x11   : > { %234 = vst.msk [vmem:[#allocation2 + $0x108] sm:$0xff] %vm199_vm0, %v3096_v0  ;;  %235 = vst.msk [vmem:[#allocation2 + $0x110] sm:$0xff] %vm199_vm0, %v3096_v0  ;;  %v2872_v5 = vld [vmem:[%s3202_s22 + $0x60] sm:$0xff]   ;;  %v2799_v8 = vunpack.c.l.bf16 %v2798_v3  ;;  %v2800_v9 = vunpack.c.h.bf16 %v2798_v3  ;;  %v2803_v10 = vunpack.c.l.bf16 %v2861_v4  ;;  %v2804_v11 = vunpack.c.h.bf16 %v2861_v4  ;;  %v2871_v15 = vld [vmem:[%s3202_s22 + $0x58] sm:$0xff]   ;;  %3045 = vmatprep.subr.bf16.mxu1 %v3076_v1 }
  0x12   : > { %237 = vst.msk [vmem:[#allocation2 + $0x120] sm:$0xff] %vm199_vm0, %v3096_v0  ;;  %238 = vst.msk [vmem:[#allocation2 + $0x128] sm:$0xff] %vm199_vm0, %v3096_v0  ;;  %v2848_v13 = vunpack.c.h.bf16 %v2872_v5  ;;  %v2847_v14 = vunpack.c.l.bf16 %v2872_v5  ;;  %v2873_v16 = vld [vmem:[%s3202_s22 + $0x68] sm:$0xff]   ;;  %v2844_v17 = vunpack.c.h.bf16 %v2871_v15  ;;  %v2843_v18 = vunpack.c.l.bf16 %v2871_v15  ;;  %v2862_v21 = vld [vmem:[%s3202_s22 + $0x10] sm:$0xff]  }
  0x13   : > { %240 = vst.msk [vmem:[#allocation2 + $0x138] sm:$0xff] %vm199_vm0, %v3096_v0  ;;  %241 = vst.msk [vmem:[#allocation2 + $0x140] sm:$0xff] %vm199_vm0, %v3096_v0  ;;  %v2851_v19 = vunpack.c.l.bf16 %v2873_v16  ;;  %v2852_v20 = vunpack.c.h.bf16 %v2873_v16  ;;  %v2874_v22 = vld [vmem:[%s3202_s22 + $0x70] sm:$0xff]   ;;  %v2863_v23 = vld [vmem:[%s3202_s22 + $0x18] sm:$0xff]   ;;  %v2807_v24 = vunpack.c.l.bf16 %v2862_v21  ;;  %v2808_v25 = vunpack.c.h.bf16 %v2862_v21  ;;  %2883 = vmatpush3.bf16.msra.mxu0 %v3077_v2 }
  0x14   : > { %243 = vst.msk [vmem:[#allocation2 + $0x150] sm:$0xff] %vm199_vm0, %v3096_v0  ;;  %244 = vst.msk [vmem:[#allocation2 + $0x158] sm:$0xff] %vm199_vm0, %v3096_v0  ;;  %v2855_v26 = vunpack.c.l.bf16 %v2874_v22  ;;  %v2856_v27 = vunpack.c.h.bf16 %v2874_v22  ;;  %v2811_v32 = vunpack.c.l.bf16 %v2863_v23  ;;  %v2812_v33 = vunpack.c.h.bf16 %v2863_v23  ;;  %v2875_v35 = vld [vmem:[%s3202_s22 + $0x78] sm:$0xff]   ;;  %v3078_v5 = vld [vmem:[%s4444_s1 + $0x60] sm:$0xff]   ;;  %3053 = vmatpush3.bf16.msra.mxu1 %v3077_v2 }
  0x15   : > { %246 = vst.msk [vmem:[#allocation2 + $0x168] sm:$0xff] %vm199_vm0, %v3096_v0  ;;  %247 = vst.msk [vmem:[#allocation2 + $0x170] sm:$0xff] %vm199_vm0, %v3096_v0  ;;  %v2859_v36 = vunpack.c.l.bf16 %v2875_v35  ;;  %v2860_v37 = vunpack.c.h.bf16 %v2875_v35  ;;  %2884 = vmatprep.subr.bf16.mxu0 %v3078_v5  ;;  %3046 = vmatprep.subr.bf16.mxu1 %v3078_v5  ;;  %v3085_v22 = vld [vmem:[%s4444_s1 + $0x38] sm:$0xff]  }
  0x16   : > { %249 = vst.msk [vmem:[#allocation2 + $0x180] sm:$0xff] %vm199_vm0, %v3096_v0  ;;  %250 = vst.msk [vmem:[#allocation2 + $0x188] sm:$0xff] %vm199_vm0, %v3096_v0  ;;  %v2867_v1 = vld [vmem:[%s3202_s22 + $0x38] sm:$0xff]  }
  0x17   : > { %252 = vst.msk [vmem:[#allocation2 + $0x198] sm:$0xff] %vm199_vm0, %v3096_v0  ;;  %253 = vst.msk [vmem:[#allocation2 + $0x1a0] sm:$0xff] %vm199_vm0, %v3096_v0  ;;  %v2827_v2 = vunpack.c.l.bf16 %v2867_v1  ;;  %v2828_v5 = vunpack.c.h.bf16 %v2867_v1 }
  0x18   : > { %203 = vst.msk [vmem:[#allocation2 + $0x10] sm:$0x3] %vm202_vm1, %v3096_v0  ;;  %206 = vst.msk [vmem:[#allocation2 + $0x28] sm:$0x3] %vm202_vm1, %v3096_v0 }
  0x19   : > { %209 = vst.msk [vmem:[#allocation2 + $0x40] sm:$0x3] %vm202_vm1, %v3096_v0  ;;  %212 = vst.msk [vmem:[#allocation2 + $0x58] sm:$0x3] %vm202_vm1, %v3096_v0 }
  0x1a   : > { %215 = vst.msk [vmem:[#allocation2 + $0x70] sm:$0x3] %vm202_vm1, %v3096_v0  ;;  %218 = vst.msk [vmem:[#allocation2 + $0x88] sm:$0x3] %vm202_vm1, %v3096_v0 }
  0x1b   : > { %221 = vst.msk [vmem:[#allocation2 + $0xa0] sm:$0x3] %vm202_vm1, %v3096_v0  ;;  %224 = vst.msk [vmem:[#allocation2 + $0xb8] sm:$0x3] %vm202_vm1, %v3096_v0 }
  0x1c   : > { %227 = vst.msk [vmem:[#allocation2 + $0xd0] sm:$0x3] %vm202_vm1, %v3096_v0  ;;  %230 = vst.msk [vmem:[#allocation2 + $0xe8] sm:$0x3] %vm202_vm1, %v3096_v0 }
  0x1d   : > { %233 = vst.msk [vmem:[#allocation2 + $0x100] sm:$0x3] %vm202_vm1, %v3096_v0  ;;  %236 = vst.msk [vmem:[#allocation2 + $0x118] sm:$0x3] %vm202_vm1, %v3096_v0 }
  0x1e   : > { %239 = vst.msk [vmem:[#allocation2 + $0x130] sm:$0x3] %vm202_vm1, %v3096_v0  ;;  %242 = vst.msk [vmem:[#allocation2 + $0x148] sm:$0x3] %vm202_vm1, %v3096_v0 }
  0x1f   : > { %245 = vst.msk [vmem:[#allocation2 + $0x160] sm:$0x3] %vm202_vm1, %v3096_v0  ;;  %248 = vst.msk [vmem:[#allocation2 + $0x178] sm:$0x3] %vm202_vm1, %v3096_v0  ;;  %v417_v12 = vld [vmem:[#allocation2 + $0x9] sm:$0xff] }
  0x20   : > { %251 = vst.msk [vmem:[#allocation2 + $0x190] sm:$0x3] %vm202_vm1, %v3096_v0  ;;  %254 = vst.msk [vmem:[#allocation2 + $0x1a8] sm:$0x3] %vm202_vm1, %v3096_v0  ;;  %v610_v31 = vld [vmem:[#allocation2 + $0xa] sm:$0xff]  ;;  %482 = vrot.lane.b32.xlu1 %v417_v12, %s3097_s25 }
  0x21   : > { %320 = vst.msk [vmem:[#allocation2 + $0x19] sm:$0xff] %vm199_vm0, %v2799_v8  ;;  %321 = vst.msk [vmem:[#allocation2 + $0x21] sm:$0xff] %vm199_vm0, %v2800_v9  ;;  %v3079_v9 = vld [vmem:[%s4444_s1 + $0x20] sm:$0xff]   ;;  %v3081_v12 = vld [vmem:[%s4444_s1 + $0x28] sm:$0xff]  }
  0x22   : > { %322 = vst.msk [vmem:[#allocation2 + $0x31] sm:$0xff] %vm199_vm0, %v2803_v10  ;;  %323 = vst.msk [vmem:[#allocation2 + $0x39] sm:$0xff] %vm199_vm0, %v2804_v11  ;;  %v3080_v10 = vld [vmem:[%s4444_s1 + $0x68] sm:$0xff]   ;;  %2885 = vmatpush3.bf16.msra.mxu0 %v3079_v9  ;;  %3054 = vmatpush3.bf16.msra.mxu1 %v3079_v9 }
  0x23   : > { %345 = vst.msk [vmem:[#allocation2 + $0x141] sm:$0xff] %vm199_vm0, %v2848_v13  ;;  %344 = vst.msk [vmem:[#allocation2 + $0x139] sm:$0xff] %vm199_vm0, %v2847_v14  ;;  %2886 = vmatprep.subr.bf16.mxu0 %v3080_v10  ;;  %v3082_v13 = vld [vmem:[%s4444_s1 + $0x70] sm:$0xff]   ;;  %v2864_v14 = vld [vmem:[%s3202_s22 + $0x20] sm:$0xff]   ;;  %3047 = vmatprep.subr.bf16.mxu1 %v3080_v10 }
  0x24   : > { %343 = vst.msk [vmem:[#allocation2 + $0x129] sm:$0xff] %vm199_vm0, %v2844_v17  ;;  %342 = vst.msk [vmem:[#allocation2 + $0x121] sm:$0xff] %vm199_vm0, %v2843_v18  ;;  %675 = vrot.lane.b32.xlu1 %v610_v31, %s3098_s26  ;;  %v2815_v15 = vunpack.c.l.bf16 %v2864_v14  ;;  %v2816_v16 = vunpack.c.h.bf16 %v2864_v14  ;;  %v2865_v31 = vld [vmem:[%s3202_s22 + $0x28] sm:$0xff]  }
  0x25   : > { %346 = vst.msk [vmem:[#allocation2 + $0x151] sm:$0xff] %vm199_vm0, %v2851_v19  ;;  %347 = vst.msk [vmem:[#allocation2 + $0x159] sm:$0xff] %vm199_vm0, %v2852_v20  ;;  %v3083_v19 = vld [vmem:[%s4444_s1 + $0x30] sm:$0xff]   ;;  %v3084_v20 = vld [vmem:[%s4444_s1 + $0x78] sm:$0xff]  }
  0x26   : > { %384 = vst.msk [vmem:[#allocation3] sm:$0xff] %vm199_vm0, %v352_v28  ;;  %385 = vst.msk [vmem:[#allocation3 + $0x18] sm:$0xff] %vm199_vm0, %v353_v29  ;;  %2887 = vmatpush3.bf16.msra.mxu0 %v3081_v12  ;;  %3055 = vmatpush3.bf16.msra.mxu1 %v3081_v12 }
  0x27   : > { %324 = vst.msk [vmem:[#allocation2 + $0x49] sm:$0xff] %vm199_vm0, %v2807_v24  ;;  %325 = vst.msk [vmem:[#allocation2 + $0x51] sm:$0xff] %vm199_vm0, %v2808_v25  ;;  %2888 = vmatprep.subr.bf16.mxu0 %v3082_v13  ;;  %3048 = vmatprep.subr.bf16.mxu1 %v3082_v13 }
  0x28   : > { %348 = vst.msk [vmem:[#allocation2 + $0x169] sm:$0xff] %vm199_vm0, %v2855_v26  ;;  %349 = vst.msk [vmem:[#allocation2 + $0x171] sm:$0xff] %vm199_vm0, %v2856_v27  ;;  %v3251_v40 = vld [vmem:[#allocation2 + $0x1a] sm:$0xff]  ;;  %v3262_v43 = vld [vmem:[#allocation2 + $0x22] sm:$0xff] }
  0x29   : > { %326 = vst.msk [vmem:[#allocation2 + $0x61] sm:$0xff] %vm199_vm0, %v2811_v32  ;;  %327 = vst.msk [vmem:[#allocation2 + $0x69] sm:$0xff] %vm199_vm0, %v2812_v33  ;;  %v3254_v41 = vld [vmem:[#allocation2 + $0x38] sm:$0xff]  ;;  %1123 = vrot.lane.b32.xlu0 %v3251_v40, %s3097_s25  ;;  %v3258_v42 = vld [vmem:[#allocation2 + $0x30] sm:$0xff]  ;;  %v2819_v32 = vunpack.c.l.bf16 %v2865_v31  ;;  %v2820_v33 = vunpack.c.h.bf16 %v2865_v31 }
  0x2a   : > { %350 = vst.msk [vmem:[#allocation2 + $0x181] sm:$0xff] %vm199_vm0, %v2859_v36  ;;  %351 = vst.msk [vmem:[#allocation2 + $0x189] sm:$0xff] %vm199_vm0, %v2860_v37  ;;  %v3264_v44 = vld [vmem:[#allocation2 + $0x39] sm:$0xff]  ;;  %v3266_v45 = vld [vmem:[#allocation2 + $0x31] sm:$0xff]  ;;  %1318 = vrot.lane.b32.xlu1 %v3254_v41, %s3098_s26  ;;  %2889 = vmatpush3.bf16.msra.mxu0 %v3083_v19 }
  0x2b   : > { %389 = vst.msk [vmem:[#allocation3 + $0x78] sm:$0xff] %vm199_vm0, %v3254_v41  ;;  %388 = vst.msk [vmem:[#allocation3 + $0x60] sm:$0xff] %vm199_vm0, %v3258_v42  ;;  %v3270_v46 = vld [vmem:[#allocation2 + $0x20] sm:$0xff]  ;;  %v3272_v47 = vld [vmem:[#allocation2 + $0x18] sm:$0xff]  ;;  %2890 = vmatprep.subr.bf16.mxu0 %v3084_v20  ;;  %3056 = vmatpush3.bf16.msra.mxu1 %v3083_v19 }
  0x2c   : > { %1030 = vst.msk [vmem:[#allocation3 + $0x50] sm:$0xff] %vm199_vm0, %v3264_v44  ;;  %1029 = vst.msk [vmem:[#allocation3 + $0x38] sm:$0xff] %vm199_vm0, %v3266_v45  ;;  %v3286_v48 = vld [vmem:[#allocation2 + $0x142] sm:$0xff]  ;;  %v3288_v49 = vld [vmem:[#allocation2 + $0x159] sm:$0xff]  ;;  %3049 = vmatprep.subr.bf16.mxu1 %v3084_v20 }
  0x2d   : > { %387 = vst.msk [vmem:[#allocation3 + $0x48] sm:$0xff] %vm199_vm0, %v3270_v46  ;;  %386 = vst.msk [vmem:[#allocation3 + $0x30] sm:$0xff] %vm199_vm0, %v3272_v47  ;;  %1125 = vrot.lane.b32.xlu0 %v3262_v43, %s3097_s25  ;;  %v3290_v50 = vld [vmem:[#allocation2 + $0x151] sm:$0xff]  ;;  %v3292_v51 = vld [vmem:[#allocation2 + $0x140] sm:$0xff] }
  0x2e   : > { %v3294_v52 = vld [vmem:[#allocation2 + $0x138] sm:$0xff]  ;;  %1054 = vst.msk [vmem:[#allocation3 + $0x290] sm:$0xff] %vm199_vm0, %v3288_v49  ;;  %1053 = vst.msk [vmem:[#allocation3 + $0x278] sm:$0xff] %vm199_vm0, %v3290_v50  ;;  %v3300_v53 = vld [vmem:[#allocation2 + $0x21] sm:$0xff]  ;;  %1173 = vrot.lane.b32.xlu1 %v3286_v48, %s3097_s25  ;;  %2891 = vmatpush3.bf16.msra.mxu0 %v3085_v22 }
  0x2f   : > { %v3302_v54 = vld [vmem:[#allocation2 + $0x19] sm:$0xff]  ;;  %411 = vst.msk [vmem:[#allocation3 + $0x288] sm:$0xff] %vm199_vm0, %v3292_v51  ;;  %410 = vst.msk [vmem:[#allocation3 + $0x270] sm:$0xff] %vm199_vm0, %v3294_v52  ;;  %v3316_v55 = vld [vmem:[#allocation2 + $0x51] sm:$0xff]  ;;  %3057 = vmatpush3.bf16.msra.mxu1 %v3085_v22 }
  0x30   : > { %1027 = vst.msk [vmem:[#allocation3 + $0x8] sm:$0xff] %vm199_vm0, %v3302_v54  ;;  %1028 = vst.msk [vmem:[#allocation3 + $0x20] sm:$0xff] %vm199_vm0, %v3300_v53  ;;  %v3318_v56 = vld [vmem:[#allocation2 + $0x49] sm:$0xff]  ;;  %v3320_v57 = vld [vmem:[#allocation2 + $0x13a] sm:$0xff] }
  0x31   : > { %1316 = vrot.lane.b32.xlu0 %v3258_v42, %s3098_s26  ;;  %v3322_v58 = vld [vmem:[#allocation2 + $0x141] sm:$0xff]  ;;  %v3324_v59 = vld [vmem:[#allocation2 + $0x139] sm:$0xff]  ;;  %1032 = vst.msk [vmem:[#allocation3 + $0x80] sm:$0xff] %vm199_vm0, %v3316_v55  ;;  %1031 = vst.msk [vmem:[#allocation3 + $0x68] sm:$0xff] %vm199_vm0, %v3318_v56 }
  0x32   : > { %v3330_v60 = vld [vmem:[#allocation2 + $0x171] sm:$0xff]  ;;  %v3332_v61 = vld [vmem:[#allocation2 + $0x169] sm:$0xff]  ;;  %1052 = vst.msk [vmem:[#allocation3 + $0x260] sm:$0xff] %vm199_vm0, %v3322_v58  ;;  %1051 = vst.msk [vmem:[#allocation3 + $0x248] sm:$0xff] %vm199_vm0, %v3324_v59  ;;  %1510 = vrot.lane.b32.xlu1 %v3264_v44, %s3099_s9 }
  0x33   : > { %1056 = vst.msk [vmem:[#allocation3 + $0x2c0] sm:$0xff] %vm199_vm0, %v3330_v60  ;;  %1055 = vst.msk [vmem:[#allocation3 + $0x2a8] sm:$0xff] %vm199_vm0, %v3332_v61  ;;  %v441_v62 = vld [vmem:[#allocation2 + $0x129] sm:$0xff]  ;;  %v3348_v0 = vld [vmem:[#allocation2 + $0x61] sm:$0xff] }
  0x34   : > { %v3346_v63 = vld [vmem:[#allocation2 + $0x69] sm:$0xff]  ;;  %1033 = vst.msk [vmem:[#allocation3 + $0x98] sm:$0xff] %vm199_vm0, %v3348_v0  ;;  %v3363_v4 = vld [vmem:[#allocation2 + $0x181] sm:$0xff]  ;;  %v3385_v11 = vld [vmem:[#allocation2 + $0x158] sm:$0xff] }
  0x35   : > { %1171 = vrot.lane.b32.xlu0 %v3320_v57, %s3097_s25  ;;  %1034 = vst.msk [vmem:[#allocation3 + $0xb0] sm:$0xff] %vm199_vm0, %v3346_v63  ;;  %v3361_v3 = vld [vmem:[#allocation2 + $0x189] sm:$0xff]  ;;  %v376_v7 = vld [vmem:[#allocation2 + $0x120] sm:$0xff]  ;;  %1057 = vst.msk [vmem:[#allocation3 + $0x2d8] sm:$0xff] %vm199_vm0, %v3363_v4 }
  0x36   : > { %530 = vrot.lane.b32.xlu1 %v441_v62, %s3097_s25  ;;  %v377_v6 = vld [vmem:[#allocation2 + $0x128] sm:$0xff]  ;;  %1058 = vst.msk [vmem:[#allocation3 + $0x2f0] sm:$0xff] %vm199_vm0, %v3361_v3  ;;  %408 = vst.msk [vmem:[#allocation3 + $0x240] sm:$0xff] %vm199_vm0, %v376_v7  ;;  %v3398_v18 = vld [vmem:[#allocation2 + $0x150] sm:$0xff] }
  0x37   : > { %v440_v8 = vld [vmem:[#allocation2 + $0x121] sm:$0xff]  ;;  %409 = vst.msk [vmem:[#allocation3 + $0x258] sm:$0xff] %vm199_vm0, %v377_v6  ;;  %v634_v17 = vld [vmem:[#allocation2 + $0x12a] sm:$0xff]  ;;  %328 = vst.msk [vmem:[#allocation2 + $0x79] sm:$0xff] %vm199_vm0, %v2815_v15 }
  0x38   : > { %329 = vst.msk [vmem:[#allocation2 + $0x81] sm:$0xff] %vm199_vm0, %v2816_v16  ;;  %v633_v21 = vld [vmem:[#allocation2 + $0x122] sm:$0xff]  ;;  %v3429_v25 = vld [vmem:[#allocation2 + $0x3a] sm:$0xff]  ;;  %v3435_v26 = vld [vmem:[#allocation2 + $0x32] sm:$0xff] }
  0x39   : > { %1508 = vrot.lane.b32.xlu0 %v3266_v45, %s3099_s9  ;;  %v3441_v27 = vld [vmem:[#allocation2 + $0x50] sm:$0xff]  ;;  %v3447_v28 = vld [vmem:[#allocation2 + $0x48] sm:$0xff]  ;;  %v3453_v29 = vld [vmem:[#allocation2 + $0x15a] sm:$0xff]  ;;  %330 = vst.msk [vmem:[#allocation2 + $0x91] sm:$0xff] %vm199_vm0, %v2819_v32 }
  0x3a   : > { %868 = vrot.lane.b32.xlu1 %v3270_v46, %s3099_s9  ;;  %v3459_v30 = vld [vmem:[#allocation2 + $0x152] sm:$0xff]  ;;  %331 = vst.msk [vmem:[#allocation2 + $0x99] sm:$0xff] %vm199_vm0, %v2820_v33  ;;  %v3490_v37 = vld [vmem:[#allocation2 + $0x168] sm:$0xff]  ;;  %334 = vst.msk [vmem:[#allocation2 + $0xc1] sm:$0xff] %vm199_vm0, %v2827_v2 }
  0x3b   : > { %v3484_v36 = vld [vmem:[#allocation2 + $0x170] sm:$0xff]  ;;  %335 = vst.msk [vmem:[#allocation2 + $0xc9] sm:$0xff] %vm199_vm0, %v2828_v5  ;;  %v2868_v22 = vld [vmem:[%s3202_s22 + $0x40] sm:$0xff]  }
  0x3c   : > { %v359_v20 = vld [vmem:[#allocation2 + $0x50] sm:$0xff]  ;;  %v3650_v32 = vld [vmem:[#allocation2 + $0x62] sm:$0xff] }
  0x3d   : > { %528 = vrot.lane.b32.xlu0 %v440_v8, %s3097_s25  ;;  %391 = vst.msk [vmem:[#allocation3 + $0xa8] sm:$0xff] %vm199_vm0, %v359_v20 }
  0x3e   : > { %1366 = vrot.lane.b32.xlu1 %v3385_v11, %s3098_s26  ;;  %v3419_v24 = vld [vmem:[#allocation2 + $0x79] sm:$0xff] }
  0x3f   : > { %v3417_v23 = vld [vmem:[#allocation2 + $0x81] sm:$0xff]  ;;  %1035 = vst.msk [vmem:[#allocation3 + $0xc8] sm:$0xff] %vm199_vm0, %v3419_v24 }
  0x40   : > { %1036 = vst.msk [vmem:[#allocation3 + $0xe0] sm:$0xff] %vm199_vm0, %v3417_v23  ;;  %v3464_v34 = vld [vmem:[#allocation2 + $0x82] sm:$0xff]  ;;  %v3466_v35 = vld [vmem:[#allocation2 + $0x7a] sm:$0xff]  ;;  %v3496_v39 = vld [vmem:[#allocation2 + $0x91] sm:$0xff] }
  0x41   : > { %866 = vrot.lane.b32.xlu0 %v3272_v47, %s3099_s9  ;;  %1674 = vst.msk [vmem:[#allocation3 + $0xa0] sm:$0xff] %vm199_vm0, %v3466_v35  ;;  %1675 = vst.msk [vmem:[#allocation3 + $0xb8] sm:$0xff] %vm199_vm0, %v3464_v34  ;;  %v3494_v38 = vld [vmem:[#allocation2 + $0x99] sm:$0xff]  ;;  %v3609_v16 = vld [vmem:[#allocation2 + $0xc1] sm:$0xff] }
  0x42   : > { %723 = vrot.lane.b32.xlu1 %v634_v17, %s3098_s26  ;;  %1038 = vst.msk [vmem:[#allocation3 + $0x110] sm:$0xff] %vm199_vm0, %v3494_v38  ;;  %1037 = vst.msk [vmem:[#allocation3 + $0xf8] sm:$0xff] %vm199_vm0, %v3496_v39  ;;  %v3513_v46 = vld [vmem:[#allocation2 + $0x92] sm:$0xff] }
  0x43   : > { %v3517_v47 = vld [vmem:[#allocation2 + $0x52] sm:$0xff]  ;;  %1676 = vst.msk [vmem:[#allocation3 + $0xd0] sm:$0xff] %vm199_vm0, %v3513_v46  ;;  %1041 = vst.msk [vmem:[#allocation3 + $0x158] sm:$0xff] %vm199_vm0, %v3609_v16 }
  0x45   : > { %1364 = vrot.lane.b32.xlu0 %v3398_v18, %s3098_s26 }
  0x46   : > { %1558 = vrot.lane.b32.xlu1 %v3288_v49, %s3099_s9 }
  0x49   : > { %721 = vrot.lane.b32.xlu0 %v633_v21, %s3098_s26  ;;  %v358_v21 = vld [vmem:[#allocation2 + $0x48] sm:$0xff] }
  0x4a   : > { %916 = vrot.lane.b32.xlu1 %v3292_v51, %s3099_s9  ;;  %v3535_v51 = vld [vmem:[#allocation2 + $0x68] sm:$0xff]  ;;  %390 = vst.msk [vmem:[#allocation3 + $0x90] sm:$0xff] %vm199_vm0, %v358_v21 }
  0x4d   : > { %1556 = vrot.lane.b32.xlu0 %v3290_v50, %s3099_s9 }
  0x4e   : > { %1129 = vrot.lane.b32.xlu1 %v3429_v25, %s3097_s25 }
  0x51   : > { %914 = vrot.lane.b32.xlu0 %v3294_v52, %s3099_s9  ;;  %v3541_v52 = vld [vmem:[#allocation2 + $0x60] sm:$0xff] }
  0x52   : > { %486 = vrot.lane.b32.xlu1 %v3300_v53, %s3097_s25 }
  0x55   : > { %1127 = vrot.lane.b32.xlu0 %v3435_v26, %s3097_s25 }
  0x56   : > { %1322 = vrot.lane.b32.xlu1 %v3441_v27, %s3098_s26 }
  0x59   : > { %484 = vrot.lane.b32.xlu0 %v3302_v54, %s3097_s25 }
  0x5a   : > { %679 = vrot.lane.b32.xlu1 %v3262_v43, %s3098_s26  ;;  %v3511_v43 = vld [vmem:[#allocation2 + $0x9a] sm:$0xff] }
  0x5b   : > { %1677 = vst.msk [vmem:[#allocation3 + $0xe8] sm:$0xff] %vm199_vm0, %v3511_v43 }
  0x5d   : > { %1320 = vrot.lane.b32.xlu0 %v3447_v28, %s3098_s26 }
  0x5e   : > { %1177 = vrot.lane.b32.xlu1 %v3453_v29, %s3097_s25 }
  0x61   : > { %677 = vrot.lane.b32.xlu0 %v3251_v40, %s3098_s26  ;;  %v2866_v40 = vld [vmem:[%s3202_s22 + $0x30] sm:$0xff]  }
  0x62   : > { %1514 = vrot.lane.b32.xlu1 %v3316_v55, %s3099_s9 }
  0x65   : > { %1175 = vrot.lane.b32.xlu0 %v3459_v30, %s3097_s25 }
  0x66   : > { %534 = vrot.lane.b32.xlu1 %v3322_v58, %s3097_s25  ;;  %v380_v58 = vld [vmem:[#allocation2 + $0x150] sm:$0xff] }
  0x67   : > { %412 = vst.msk [vmem:[#allocation3 + $0x2a0] sm:$0xff] %vm199_vm0, %v380_v58 }
  0x69   : > { %1512 = vrot.lane.b32.xlu0 %v3318_v56, %s3099_s9 }
  0x6a   : > { %872 = vrot.lane.b32.xlu1 %v3254_v41, %s3099_s9  ;;  %v2823_v41 = vunpack.c.l.bf16 %v2866_v40 }
  0x6c   : > { %332 = vst.msk [vmem:[#allocation2 + $0xa9] sm:$0xff] %vm199_vm0, %v2823_v41 }
  0x6d   : > { %532 = vrot.lane.b32.xlu0 %v3324_v59, %s3097_s25 }
  0x6e   : > { %1370 = vrot.lane.b32.xlu1 %v3484_v36, %s3098_s26 }
  0x71   : > { %870 = vrot.lane.b32.xlu0 %v3258_v42, %s3099_s9  ;;  %v2824_v42 = vunpack.c.h.bf16 %v2866_v40 }
  0x72   : > { %727 = vrot.lane.b32.xlu1 %v3286_v48, %s3098_s26  ;;  %v3529_v48 = vld [vmem:[#allocation2 + $0x4a] sm:$0xff] }
  0x73   : > { %333 = vst.msk [vmem:[#allocation2 + $0xb1] sm:$0xff] %vm199_vm0, %v2824_v42  ;;  %v3547_v54 = vld [vmem:[#allocation2 + $0xa9] sm:$0xff]  ;;  %v3658_v42 = vld [vmem:[#allocation2 + $0x80] sm:$0xff] }
  0x74   : > { %1039 = vst.msk [vmem:[#allocation3 + $0x128] sm:$0xff] %vm199_vm0, %v3547_v54 }
  0x75   : > { %1368 = vrot.lane.b32.xlu0 %v3490_v37, %s3098_s26 }
  0x76   : > { %1562 = vrot.lane.b32.xlu1 %v3330_v60, %s3099_s9 }
  0x79   : > { %725 = vrot.lane.b32.xlu0 %v3320_v57, %s3098_s26  ;;  %v381_v57 = vld [vmem:[#allocation2 + $0x158] sm:$0xff] }
  0x7a   : > { %920 = vrot.lane.b32.xlu1 %v3385_v11, %s3099_s9  ;;  %v3545_v53 = vld [vmem:[#allocation2 + $0xb1] sm:$0xff]  ;;  %413 = vst.msk [vmem:[#allocation3 + $0x2b8] sm:$0xff] %vm199_vm0, %v381_v57  ;;  %v3593_v11 = vld [vmem:[#allocation2 + $0x188] sm:$0xff] }
  0x7b   : > { %1040 = vst.msk [vmem:[#allocation3 + $0x140] sm:$0xff] %vm199_vm0, %v3545_v53  ;;  %v3570_v6 = vld [vmem:[#allocation2 + $0xb2] sm:$0xff]  ;;  %v3572_v7 = vld [vmem:[#allocation2 + $0xaa] sm:$0xff] }
  0x7c   : > { %1678 = vst.msk [vmem:[#allocation3 + $0x100] sm:$0xff] %vm199_vm0, %v3572_v7  ;;  %1679 = vst.msk [vmem:[#allocation3 + $0x118] sm:$0xff] %vm199_vm0, %v3570_v6 }
  0x7d   : > { %1560 = vrot.lane.b32.xlu0 %v3332_v61, %s3099_s9 }
  0x7e   : > { %1133 = vrot.lane.b32.xlu1 %v3517_v47, %s3097_s25 }
  0x80   : > { %v481_v59 = vpop.permute.xlu1 %480 }
  0x81   : > { %918 = vrot.lane.b32.xlu0 %v3398_v18, %s3099_s9  ;;  %v674_v62 = vpop.permute.xlu0 %673  ;;  %577 = vst.msk [vmem:[#allocation3] sm:$0xff] %vm576_vm2, %v481_v59 }
  0x82   : > { %490 = vrot.lane.b32.xlu1 %v3264_v44, %s3097_s25  ;;  %v3551_v44 = vld [vmem:[#allocation2 + $0x172] sm:$0xff]  ;;  %770 = vst.msk [vmem:[#allocation3] sm:$0xff] %vm769_vm3, %v674_v62 }
  0x85   : > { %1131 = vrot.lane.b32.xlu0 %v3529_v48, %s3097_s25 }
  0x86   : > { %1326 = vrot.lane.b32.xlu1 %v3535_v51, %s3098_s26 }
  0x89   : > { %488 = vrot.lane.b32.xlu0 %v3266_v45, %s3097_s25  ;;  %v3563_v45 = vld [vmem:[#allocation2 + $0x16a] sm:$0xff] }
  0x8a   : > { %683 = vrot.lane.b32.xlu1 %v3429_v25, %s3098_s26 }
  0x8d   : > { %1324 = vrot.lane.b32.xlu0 %v3541_v52, %s3098_s26 }
  0x8e   : > { %1181 = vrot.lane.b32.xlu1 %v3551_v44, %s3097_s25 }
  0x91   : > { %681 = vrot.lane.b32.xlu0 %v3435_v26, %s3098_s26  ;;  %v2831_v26 = vunpack.c.l.bf16 %v2868_v22 }
  0x92   : > { %1518 = vrot.lane.b32.xlu1 %v3346_v63, %s3099_s9  ;;  %v483_v8 = vpop.permute.xlu1 %482 }
  0x93   : > { %578 = vst.msk [vmem:[#allocation3 + $0x18] sm:$0xff] %vm576_vm2, %v483_v8 }
  0x94   : > { %336 = vst.msk [vmem:[#allocation2 + $0xd9] sm:$0xff] %vm199_vm0, %v2831_v26 }
  0x95   : > { %1179 = vrot.lane.b32.xlu0 %v3563_v45, %s3097_s25 }
  0x96   : > { %538 = vrot.lane.b32.xlu1 %v3288_v49, %s3097_s25  ;;  %v676_v9 = vpop.permute.xlu1 %675  ;;  %v3601_v49 = vld [vmem:[#allocation2 + $0x180] sm:$0xff] }
  0x97   : > { %771 = vst.msk [vmem:[#allocation3 + $0x18] sm:$0xff] %vm769_vm3, %v676_v9  ;;  %v383_v9 = vld [vmem:[#allocation2 + $0x170] sm:$0xff] }
  0x98   : > { %415 = vst.msk [vmem:[#allocation3 + $0x2e8] sm:$0xff] %vm199_vm0, %v383_v9  ;;  %v2870_v9 = vld [vmem:[%s3202_s22 + $0x50] sm:$0xff]  }
  0x99   : > { %1516 = vrot.lane.b32.xlu0 %v3348_v0, %s3099_s9 }
  0x9a   : > { %876 = vrot.lane.b32.xlu1 %v3441_v27, %s3099_s9  ;;  %v2832_v27 = vunpack.c.h.bf16 %v2868_v22 }
  0x9b   : > { %v1124_v10 = vpop.permute.xlu0 %1123  ;;  %v3674_v8 = vld [vmem:[#allocation2 + $0xd9] sm:$0xff] }
  0x9c   : > { %1219 = vst.msk [vmem:[#allocation3 + $0x8] sm:$0xff] %vm576_vm2, %v1124_v10  ;;  %v1319_v12 = vpop.permute.xlu1 %1318  ;;  %v382_v10 = vld [vmem:[#allocation2 + $0x168] sm:$0xff] }
  0x9d   : > { %536 = vrot.lane.b32.xlu0 %v3290_v50, %s3097_s25  ;;  %v3607_v50 = vld [vmem:[#allocation2 + $0xc9] sm:$0xff]  ;;  %337 = vst.msk [vmem:[#allocation2 + $0xe1] sm:$0xff] %vm199_vm0, %v2832_v27  ;;  %1043 = vst.msk [vmem:[#allocation3 + $0x188] sm:$0xff] %vm199_vm0, %v3674_v8 }
  0x9e   : > { %1374 = vrot.lane.b32.xlu1 %v3593_v11, %s3098_s26  ;;  %1042 = vst.msk [vmem:[#allocation3 + $0x170] sm:$0xff] %vm199_vm0, %v3607_v50  ;;  %414 = vst.msk [vmem:[#allocation3 + $0x2d0] sm:$0xff] %vm199_vm0, %v382_v10 }
  0x9f   : > { %v1126_v13 = vpop.permute.xlu0 %1125 }
  0xa0   : > { %1220 = vst.msk [vmem:[#allocation3 + $0x20] sm:$0xff] %vm576_vm2, %v1126_v13  ;;  %v1174_v14 = vpop.permute.xlu1 %1173  ;;  %v1089_v13 = vld [vmem:[#allocation2 + $0x182] sm:$0xff] }
  0xa1   : > { %874 = vrot.lane.b32.xlu0 %v3447_v28, %s3099_s9  ;;  %1413 = vst.msk [vmem:[#allocation3 + $0x20] sm:$0xff] %vm769_vm3, %v1319_v12  ;;  %v3632_v28 = vld [vmem:[#allocation2 + $0xc2] sm:$0xff] }
  0xa2   : > { %1244 = vst.msk [vmem:[#allocation3 + $0x260] sm:$0xff] %vm576_vm2, %v1174_v14  ;;  %731 = vrot.lane.b32.xlu1 %v3453_v29, %s3098_s26  ;;  %v3636_v29 = vld [vmem:[#allocation2 + $0x6a] sm:$0xff] }
  0xa3   : > { %v1317_v15 = vpop.permute.xlu0 %1316  ;;  %1680 = vst.msk [vmem:[#allocation3 + $0x130] sm:$0xff] %vm199_vm0, %v3632_v28 }
  0xa4   : > { %1412 = vst.msk [vmem:[#allocation3 + $0x8] sm:$0xff] %vm769_vm3, %v1317_v15  ;;  %v1511_v17 = vpop.permute.xlu1 %1510  ;;  %v3672_v5 = vld [vmem:[#allocation2 + $0xe1] sm:$0xff] }
  0xa5   : > { %1372 = vrot.lane.b32.xlu0 %v3601_v49, %s3098_s26  ;;  %1605 = vst.msk [vmem:[#allocation3 + $0x20] sm:$0xff] %vm962_vm4, %v1511_v17  ;;  %v2869_v15 = vld [vmem:[%s3202_s22 + $0x48] sm:$0xff]   ;;  %v3696_v21 = vld [vmem:[#allocation2 + $0xda] sm:$0xff] }
  0xa6   : > { %1566 = vrot.lane.b32.xlu1 %v3361_v3, %s3099_s9  ;;  %v3630_v3 = vld [vmem:[#allocation2 + $0xca] sm:$0xff]  ;;  %1044 = vst.msk [vmem:[#allocation3 + $0x1a0] sm:$0xff] %vm199_vm0, %v3672_v5  ;;  %v3694_v20 = vld [vmem:[#allocation2 + $0xe2] sm:$0xff]  ;;  %1682 = vst.msk [vmem:[#allocation3 + $0x160] sm:$0xff] %vm199_vm0, %v3696_v21 }
  0xa7   : > { %v1172_v18 = vpop.permute.xlu0 %1171  ;;  %1681 = vst.msk [vmem:[#allocation3 + $0x148] sm:$0xff] %vm199_vm0, %v3630_v3  ;;  %1683 = vst.msk [vmem:[#allocation3 + $0x178] sm:$0xff] %vm199_vm0, %v3694_v20 }
  0xa8   : > { %1243 = vst.msk [vmem:[#allocation3 + $0x248] sm:$0xff] %vm576_vm2, %v1172_v18  ;;  %v531_v19 = vpop.permute.xlu1 %530  ;;  %v2835_v18 = vunpack.c.l.bf16 %v2869_v15 }
  0xa9   : > { %729 = vrot.lane.b32.xlu0 %v3459_v30, %s3098_s26  ;;  %602 = vst.msk [vmem:[#allocation3 + $0x258] sm:$0xff] %vm576_vm2, %v531_v19  ;;  %v2836_v19 = vunpack.c.h.bf16 %v2869_v15  ;;  %v1638_v15 = vld [vmem:[#allocation2 + $0x4a] sm:$0xff] }
  0xaa   : > { %924 = vrot.lane.b32.xlu1 %v3484_v36, %s3099_s9  ;;  %338 = vst.msk [vmem:[#allocation2 + $0xf1] sm:$0xff] %vm199_vm0, %v2835_v18  ;;  %v3086_v18 = vld [vmem:[%s4444_s1 + $0x80] sm:$0xff]   ;;  %1670 = vst.msk [vmem:[#allocation3 + $0x40] sm:$0xff] %vm199_vm0, %v1638_v15 }
  0xab   : > { %v1509_v25 = vpop.permute.xlu0 %1508  ;;  %339 = vst.msk [vmem:[#allocation2 + $0xf9] sm:$0xff] %vm199_vm0, %v2836_v19  ;;  %3006 = vmatprep.subr.bf16.mxu1 %v3086_v18 }
  0xac   : > { %1604 = vst.msk [vmem:[#allocation3 + $0x8] sm:$0xff] %vm962_vm4, %v1509_v25  ;;  %v869_v30 = vpop.permute.xlu1 %868 }
  0xad   : > { %1564 = vrot.lane.b32.xlu0 %v3363_v4, %s3099_s9  ;;  %964 = vst.msk [vmem:[#allocation3 + $0x18] sm:$0xff] %vm962_vm4, %v869_v30  ;;  %v1704_v4 = vld [vmem:[#allocation3 + $0x20] sm:$0xff] }
  0xae   : > { %1137 = vrot.lane.b32.xlu1 %v3636_v29, %s3097_s25 }
  0xaf   : > { %v529_v31 = vpop.permute.xlu0 %528 }
  0xb0   : > { %601 = vst.msk [vmem:[#allocation3 + $0x240] sm:$0xff] %vm576_vm2, %v529_v31  ;;  %v1367_v33 = vpop.permute.xlu1 %1366 }
  0xb1   : > { %922 = vrot.lane.b32.xlu0 %v3490_v37, %s3099_s9  ;;  %1437 = vst.msk [vmem:[#allocation3 + $0x260] sm:$0xff] %vm769_vm3, %v1367_v33 }
  0xb2   : > { %494 = vrot.lane.b32.xlu1 %v3316_v55, %s3097_s25  ;;  %v3666_v55 = vld [vmem:[#allocation2 + $0x78] sm:$0xff] }
  0xb3   : > { %v867_v36 = vpop.permute.xlu0 %866  ;;  %v1701_v40 = vld [vmem:[#allocation3 + $0x8] sm:$0xff] }
  0xb4   : > { %963 = vst.msk [vmem:[#allocation3] sm:$0xff] %vm962_vm4, %v867_v36  ;;  %v1797_v41 = vpack.c.bf16 %v1704_v4, %v1701_v40  ;;  %v724_v37 = vpop.permute.xlu1 %723  ;;  %v1703_v58 = vld [vmem:[#allocation3 + $0x18] sm:$0xff] }
  0xb5   : > { %1135 = vrot.lane.b32.xlu0 %v3650_v32, %s3097_s25  ;;  %795 = vst.msk [vmem:[#allocation3 + $0x258] sm:$0xff] %vm769_vm3, %v724_v37  ;;  %v1282_v37 = vld [vmem:[#allocation2 + $0x198] sm:$0xff] }
  0xb6   : > { %2068 = vmatprep.mubr.bf16.mxu0 %v1797_v41  ;;  %1330 = vrot.lane.b32.xlu1 %v3658_v42, %s3098_s26 }
  0xb7   : > { %v1365_v57 = vpop.permute.xlu0 %1364 }
  0xb8   : > { %1436 = vst.msk [vmem:[#allocation3 + $0x248] sm:$0xff] %vm769_vm3, %v1365_v57  ;;  %v1559_v59 = vpop.permute.xlu1 %1558 }
  0xb9   : > { %492 = vrot.lane.b32.xlu0 %v3318_v56, %s3097_s25  ;;  %1629 = vst.msk [vmem:[#allocation3 + $0x260] sm:$0xff] %vm962_vm4, %v1559_v59  ;;  %v1090_v56 = vld [vmem:[#allocation2 + $0x18a] sm:$0xff]  ;;  %v1475_v59 = vld [vmem:[#allocation2 + $0x1a1] sm:$0xff] }
  0xba   : > { %687 = vrot.lane.b32.xlu1 %v3517_v47, %s3098_s26 }
  0xbb   : > { %v722_v62 = vpop.permute.xlu0 %721  ;;  %v1700_v1 = vld [vmem:[#allocation3] sm:$0xff] }
  0xbc   : > { %794 = vst.msk [vmem:[#allocation3 + $0x240] sm:$0xff] %vm769_vm3, %v722_v62  ;;  %v1796_v2 = vpack.c.bf16 %v1703_v58, %v1700_v1  ;;  %v917_v12 = vpop.permute.xlu1 %916 }
  0xbd   : > { %1328 = vrot.lane.b32.xlu0 %v3666_v55, %s3098_s26  ;;  %988 = vst.msk [vmem:[#allocation3 + $0x258] sm:$0xff] %vm962_vm4, %v917_v12  ;;  %v2839_v12 = vunpack.c.l.bf16 %v2870_v9 }
  0xbe   : > { %2069 = vmatmul.mubr.bf16.vlgmr.msra.gmra.mrb[0].mxu0 %v1796_v2  ;;  %1185 = vrot.lane.b32.xlu1 %v1090_v56, %s3097_s25  ;;  %v361_v2 = vld [vmem:[#allocation2 + $0x68] sm:$0xff]  ;;  %v360_v56 = vld [vmem:[#allocation2 + $0x60] sm:$0xff] }
  0xbf   : > { %v1557_v47 = vpop.permute.xlu0 %1556  ;;  %393 = vst.msk [vmem:[#allocation3 + $0xd8] sm:$0xff] %vm199_vm0, %v361_v2  ;;  %392 = vst.msk [vmem:[#allocation3 + $0xc0] sm:$0xff] %vm199_vm0, %v360_v56  ;;  %v363_v2 = vld [vmem:[#allocation2 + $0x80] sm:$0xff]  ;;  %v362_v56 = vld [vmem:[#allocation2 + $0x78] sm:$0xff] }
  0xc0   : > { %1628 = vst.msk [vmem:[#allocation3 + $0x248] sm:$0xff] %vm962_vm4, %v1557_v47  ;;  %v1130_v14 = vpop.permute.xlu1 %1129  ;;  %v2840_v47 = vunpack.c.h.bf16 %v2870_v9 }
  0xc1   : > { %685 = vrot.lane.b32.xlu0 %v3529_v48, %s3098_s26  ;;  %1222 = vst.msk [vmem:[#allocation3 + $0x50] sm:$0xff] %vm576_vm2, %v1130_v14  ;;  %v1776_v48 = vld [vmem:[#allocation3 + $0x260] sm:$0xff]  ;;  %v1637_v14 = vld [vmem:[#allocation2 + $0x3a] sm:$0xff] }
  0xc2   : > { %1522 = vrot.lane.b32.xlu1 %v3417_v23, %s3099_s9  ;;  %1669 = vst.msk [vmem:[#allocation3 + $0x28] sm:$0xff] %vm199_vm0, %v1637_v14  ;;  %340 = vst.msk [vmem:[#allocation2 + $0x109] sm:$0xff] %vm199_vm0, %v2839_v12 }
  0xc3   : > { %v915_v17 = vpop.permute.xlu0 %914  ;;  %341 = vst.msk [vmem:[#allocation2 + $0x111] sm:$0xff] %vm199_vm0, %v2840_v47  ;;  %395 = vst.msk [vmem:[#allocation3 + $0x108] sm:$0xff] %vm199_vm0, %v363_v2 }
  0xc4   : > { %987 = vst.msk [vmem:[#allocation3 + $0x240] sm:$0xff] %vm962_vm4, %v915_v17  ;;  %v487_v22 = vpop.permute.xlu1 %486  ;;  %v1775_v30 = vld [vmem:[#allocation3 + $0x258] sm:$0xff]  ;;  %v3749_v17 = vld [vmem:[#allocation2 + $0xf2] sm:$0xff] }
  0xc5   : > { %1183 = vrot.lane.b32.xlu0 %v1089_v13, %s3097_s25  ;;  %580 = vst.msk [vmem:[#allocation3 + $0x48] sm:$0xff] %vm576_vm2, %v487_v22  ;;  %v1636_v13 = vld [vmem:[#allocation2 + $0x32] sm:$0xff]  ;;  %v3087_v22 = vld [vmem:[%s4444_s1 + $0x88] sm:$0xff]  }
  0xc6   : > { %542 = vrot.lane.b32.xlu1 %v3330_v60, %s3097_s25  ;;  %v1283_v60 = vld [vmem:[#allocation2 + $0x1a0] sm:$0xff]  ;;  %1668 = vst.msk [vmem:[#allocation3 + $0x10] sm:$0xff] %vm199_vm0, %v1636_v13  ;;  %1684 = vst.msk [vmem:[#allocation3 + $0x190] sm:$0xff] %vm199_vm0, %v3749_v17 }
  0xc7   : > { %v1128_v25 = vpop.permute.xlu0 %1127  ;;  %v1773_v26 = vld [vmem:[#allocation3 + $0x248] sm:$0xff]  ;;  %394 = vst.msk [vmem:[#allocation3 + $0xf0] sm:$0xff] %vm199_vm0, %v362_v56 }
  0xc8   : > { %1221 = vst.msk [vmem:[#allocation3 + $0x38] sm:$0xff] %vm576_vm2, %v1128_v25  ;;  %v1833_v27 = vpack.c.bf16 %v1776_v48, %v1773_v26  ;;  %v1323_v31 = vpop.permute.xlu1 %1322 }
  0xc9   : > { %1520 = vrot.lane.b32.xlu0 %v3419_v24, %s3099_s9  ;;  %1415 = vst.msk [vmem:[#allocation3 + $0x50] sm:$0xff] %vm769_vm3, %v1323_v31 }
  0xca   : > { %2164 = vmatprep.mubr.bf16.mxu1 %v1833_v27  ;;  %880 = vrot.lane.b32.xlu1 %v3535_v51, %s3099_s9  ;;  %v3728_v51 = vld [vmem:[#allocation2 + $0xf1] sm:$0xff]  ;;  %v1640_v27 = vld [vmem:[#allocation2 + $0x62] sm:$0xff] }
  0xcb   : > { %v485_v4 = vpop.permute.xlu0 %484  ;;  %v1772_v33 = vld [vmem:[#allocation3 + $0x240] sm:$0xff]  ;;  %1045 = vst.msk [vmem:[#allocation3 + $0x1b8] sm:$0xff] %vm199_vm0, %v3728_v51  ;;  %1672 = vst.msk [vmem:[#allocation3 + $0x70] sm:$0xff] %vm199_vm0, %v1640_v27 }
  0xcc   : > { %579 = vst.msk [vmem:[#allocation3 + $0x30] sm:$0xff] %vm576_vm2, %v485_v4  ;;  %v1832_v36 = vpack.c.bf16 %v1775_v30, %v1772_v33  ;;  %v680_v40 = vpop.permute.xlu1 %679  ;;  %v1641_v30 = vld [vmem:[#allocation2 + $0x6a] sm:$0xff] }
  0xcd   : > { %540 = vrot.lane.b32.xlu0 %v3332_v61, %s3097_s25  ;;  %773 = vst.msk [vmem:[#allocation3 + $0x48] sm:$0xff] %vm769_vm3, %v680_v40  ;;  %v3726_v61 = vld [vmem:[#allocation2 + $0xf9] sm:$0xff]  ;;  %v3828_v12 = vld [vmem:[#allocation2 + $0x10a] sm:$0xff] }
  0xce   : > { %2165 = vmatmul.mubr.bf16.vlgmr.msra.gmra.mrb[0].mxu1 %v1832_v36  ;;  %1378 = vrot.lane.b32.xlu1 %v1283_v60, %s3098_s26  ;;  %1046 = vst.msk [vmem:[#allocation3 + $0x1d0] sm:$0xff] %vm199_vm0, %v3726_v61  ;;  %1673 = vst.msk [vmem:[#allocation3 + $0x88] sm:$0xff] %vm199_vm0, %v1641_v30  ;;  %v3782_v36 = vld [vmem:[#allocation2 + $0x108] sm:$0xff]  ;;  %v3786_v60 = vld [vmem:[#allocation2 + $0x98] sm:$0xff] }
  0xcf   : > { %v1321_v41 = vpop.permute.xlu0 %1320  ;;  %3007 = vmatpush3.bf16.msra.mxu1 %v3086_v18  ;;  %406 = vst.msk [vmem:[#allocation3 + $0x210] sm:$0xff] %vm199_vm0, %v3782_v36  ;;  %1686 = vst.msk [vmem:[#allocation3 + $0x1c0] sm:$0xff] %vm199_vm0, %v3828_v12  ;;  %v3858_v27 = vld [vmem:[#allocation2 + $0x12a] sm:$0xff] }
  0xd0   : > { %1414 = vst.msk [vmem:[#allocation3 + $0x38] sm:$0xff] %vm769_vm3, %v1321_v41  ;;  %v1178_v57 = vpop.permute.xlu1 %1177  ;;  %3008 = vmatprep.subr.bf16.mxu1 %v3087_v22 }
  0xd1   : > { %878 = vrot.lane.b32.xlu0 %v3541_v52, %s3099_s9  ;;  %1246 = vst.msk [vmem:[#allocation3 + $0x290] sm:$0xff] %vm576_vm2, %v1178_v57 }
  0xd2   : > { %735 = vrot.lane.b32.xlu1 %v3551_v44, %s3098_s26  ;;  %v1474_v44 = vld [vmem:[#allocation2 + $0x199] sm:$0xff]  ;;  %1689 = vst.msk [vmem:[#allocation3 + $0x208] sm:$0xff] %vm199_vm0, %v3858_v27 }
  0xd3   : > { %v678_v58 = vpop.permute.xlu0 %677  ;;  %3009 = vmatpush3.bf16.msra.mxu1 %v3087_v22  ;;  %v3848_v22 = vld [vmem:[#allocation2 + $0xb0] sm:$0xff] }
  0xd4   : > { %772 = vst.msk [vmem:[#allocation3 + $0x30] sm:$0xff] %vm769_vm3, %v678_v58  ;;  %v1515_v52 = vpop.permute.xlu1 %1514 }
  0xd5   : > { %1376 = vrot.lane.b32.xlu0 %v1282_v37, %s3098_s26  ;;  %1607 = vst.msk [vmem:[#allocation3 + $0x50] sm:$0xff] %vm962_vm4, %v1515_v52  ;;  %v3798_v37 = vld [vmem:[#allocation2 + $0x90] sm:$0xff] }
  0xd6   : > { %1570 = vrot.lane.b32.xlu1 %v1475_v59, %s3099_s9 }
  0xd7   : > { %v1176_v62 = vpop.permute.xlu0 %1175 }
  0xd8   : > { %1245 = vst.msk [vmem:[#allocation3 + $0x278] sm:$0xff] %vm576_vm2, %v1176_v62  ;;  %v535_v1 = vpop.permute.xlu1 %534  ;;  %v3804_v62 = vld [vmem:[#allocation2 + $0x111] sm:$0xff] }
  0xd9   : > { %733 = vrot.lane.b32.xlu0 %v3563_v45, %s3098_s26  ;;  %604 = vst.msk [vmem:[#allocation3 + $0x288] sm:$0xff] %vm576_vm2, %v535_v1  ;;  %v3747_v45 = vld [vmem:[#allocation2 + $0xfa] sm:$0xff] }
  0xda   : > { %928 = vrot.lane.b32.xlu1 %v3593_v11, %s3099_s9  ;;  %v1639_v11 = vld [vmem:[#allocation2 + $0x52] sm:$0xff]  ;;  %1685 = vst.msk [vmem:[#allocation3 + $0x1a8] sm:$0xff] %vm199_vm0, %v3747_v45  ;;  %1048 = vst.msk [vmem:[#allocation3 + $0x200] sm:$0xff] %vm199_vm0, %v3804_v62 }
  0xdb   : > { %v1513_v10 = vpop.permute.xlu0 %1512  ;;  %1671 = vst.msk [vmem:[#allocation3 + $0x58] sm:$0xff] %vm199_vm0, %v1639_v11 }
  0xdc   : > { %1606 = vst.msk [vmem:[#allocation3 + $0x38] sm:$0xff] %vm962_vm4, %v1513_v10  ;;  %v873_v19 = vpop.permute.xlu1 %872  ;;  %v1710_v25 = vld [vmem:[#allocation3 + $0x50] sm:$0xff]  ;;  %v3826_v10 = vld [vmem:[#allocation2 + $0x112] sm:$0xff] }
  0xdd   : > { %1568 = vrot.lane.b32.xlu0 %v1474_v44, %s3099_s9  ;;  %966 = vst.msk [vmem:[#allocation3 + $0x48] sm:$0xff] %vm962_vm4, %v873_v19  ;;  %v3806_v44 = vld [vmem:[#allocation2 + $0x109] sm:$0xff] }
  0xde   : > { %1141 = vrot.lane.b32.xlu1 %v3464_v34, %s3097_s25  ;;  %1047 = vst.msk [vmem:[#allocation3 + $0x1e8] sm:$0xff] %vm199_vm0, %v3806_v44  ;;  %1687 = vst.msk [vmem:[#allocation3 + $0x1d8] sm:$0xff] %vm199_vm0, %v3826_v10 }
  0xdf   : > { %v533_v48 = vpop.permute.xlu0 %532 }
  0xe0   : > { %603 = vst.msk [vmem:[#allocation3 + $0x270] sm:$0xff] %vm576_vm2, %v533_v48  ;;  %v1371_v26 = vpop.permute.xlu1 %1370 }
  0xe1   : > { %926 = vrot.lane.b32.xlu0 %v3601_v49, %s3099_s9  ;;  %1439 = vst.msk [vmem:[#allocation3 + $0x290] sm:$0xff] %vm769_vm3, %v1371_v26  ;;  %v3780_v49 = vld [vmem:[#allocation2 + $0x110] sm:$0xff]  ;;  %v3856_v26 = vld [vmem:[#allocation2 + $0xa8] sm:$0xff] }
  0xe2   : > { %498 = vrot.lane.b32.xlu1 %v3346_v63, %s3097_s25  ;;  %407 = vst.msk [vmem:[#allocation3 + $0x228] sm:$0xff] %vm199_vm0, %v3780_v49 }
  0xe3   : > { %v871_v31 = vpop.permute.xlu0 %870  ;;  %v1707_v4 = vld [vmem:[#allocation3 + $0x38] sm:$0xff] }
  0xe4   : > { %965 = vst.msk [vmem:[#allocation3 + $0x30] sm:$0xff] %vm962_vm4, %v871_v31  ;;  %v1800_v33 = vpack.c.bf16 %v1710_v25, %v1707_v4  ;;  %v728_v40 = vpop.permute.xlu1 %727  ;;  %v1709_v63 = vld [vmem:[#allocation3 + $0x48] sm:$0xff]  ;;  %v3861_v31 = vld [vmem:[#allocation2 + $0x122] sm:$0xff] }
  0xe5   : > { %1139 = vrot.lane.b32.xlu0 %v3466_v35, %s3097_s25  ;;  %797 = vst.msk [vmem:[#allocation3 + $0x288] sm:$0xff] %vm769_vm3, %v728_v40  ;;  %v3868_v4 = vld [vmem:[#allocation2 + $0x129] sm:$0xff] }
  0xe6   : > { %2076 = vmatprep.mubr.bf16.mxu0 %v1800_v33  ;;  %1334 = vrot.lane.b32.xlu1 %v3786_v60, %s3098_s26  ;;  %1688 = vst.msk [vmem:[#allocation3 + $0x1f0] sm:$0xff] %vm199_vm0, %v3861_v31  ;;  %v1658_v33 = vld [vmem:[#allocation2 + $0x13a] sm:$0xff]  ;;  %v1659_v40 = vld [vmem:[#allocation2 + $0x142] sm:$0xff]  ;;  %1050 = vst.msk [vmem:[#allocation3 + $0x230] sm:$0xff] %vm199_vm0, %v3868_v4 }
  0xe7   : > { %v1369_v41 = vpop.permute.xlu0 %1368  ;;  %1690 = vst.msk [vmem:[#allocation3 + $0x220] sm:$0xff] %vm199_vm0, %v1658_v33  ;;  %1691 = vst.msk [vmem:[#allocation3 + $0x238] sm:$0xff] %vm199_vm0, %v1659_v40  ;;  %v367_v40 = vld [vmem:[#allocation2 + $0xb0] sm:$0xff] }
  0xe8   : > { %1438 = vst.msk [vmem:[#allocation3 + $0x278] sm:$0xff] %vm769_vm3, %v1369_v41  ;;  %v1563_v57 = vpop.permute.xlu1 %1562 }
  0xe9   : > { %496 = vrot.lane.b32.xlu0 %v3348_v0, %s3097_s25  ;;  %1631 = vst.msk [vmem:[#allocation3 + $0x290] sm:$0xff] %vm962_vm4, %v1563_v57  ;;  %v365_v57 = vld [vmem:[#allocation2 + $0x98] sm:$0xff] }
  0xea   : > { %691 = vrot.lane.b32.xlu1 %v3636_v29, %s3098_s26  ;;  %397 = vst.msk [vmem:[#allocation3 + $0x138] sm:$0xff] %vm199_vm0, %v365_v57  ;;  %399 = vst.msk [vmem:[#allocation3 + $0x168] sm:$0xff] %vm199_vm0, %v367_v40  ;;  %v371_v40 = vld [vmem:[#allocation2 + $0xe0] sm:$0xff] }
  0xeb   : > { %v726_v58 = vpop.permute.xlu0 %725  ;;  %v1706_v59 = vld [vmem:[#allocation3 + $0x30] sm:$0xff]  ;;  %403 = vst.msk [vmem:[#allocation3 + $0x1c8] sm:$0xff] %vm199_vm0, %v371_v40 }
  0xec   : > { %796 = vst.msk [vmem:[#allocation3 + $0x270] sm:$0xff] %vm769_vm3, %v726_v58  ;;  %v1799_v52 = vpack.c.bf16 %v1709_v63, %v1706_v59  ;;  %v921_v0 = vpop.permute.xlu1 %920  ;;  %v364_v58 = vld [vmem:[#allocation2 + $0x90] sm:$0xff] }
  0xed   : > { %1332 = vrot.lane.b32.xlu0 %v3798_v37, %s3098_s26  ;;  %990 = vst.msk [vmem:[#allocation3 + $0x288] sm:$0xff] %vm962_vm4, %v921_v0  ;;  %v1661_v0 = vld [vmem:[#allocation2 + $0x15a] sm:$0xff] }
  0xee   : > { %2077 = vmatmul.mubr.bf16.gmra.mrb[4].mxu0 %v1799_v52  ;;  %1526 = vrot.lane.b32.xlu1 %v3494_v38, %s3099_s9  ;;  %396 = vst.msk [vmem:[#allocation3 + $0x120] sm:$0xff] %vm199_vm0, %v364_v58  ;;  %v1660_v52 = vld [vmem:[#allocation2 + $0x152] sm:$0xff]  ;;  %1693 = vst.msk [vmem:[#allocation3 + $0x268] sm:$0xff] %vm199_vm0, %v1661_v0 }
  0xef   : > { %v1561_v1 = vpop.permute.xlu0 %1560  ;;  %1692 = vst.msk [vmem:[#allocation3 + $0x250] sm:$0xff] %vm199_vm0, %v1660_v52 }
  0xf0   : > { %1630 = vst.msk [vmem:[#allocation3 + $0x278] sm:$0xff] %vm962_vm4, %v1561_v1  ;;  %v1134_v29 = vpop.permute.xlu1 %1133  ;;  %v1663_v1 = vld [vmem:[#allocation2 + $0x172] sm:$0xff] }
  0xf1   : > { %689 = vrot.lane.b32.xlu0 %v3650_v32, %s3098_s26  ;;  %1224 = vst.msk [vmem:[#allocation3 + $0x80] sm:$0xff] %vm576_vm2, %v1134_v29  ;;  %v1782_v32 = vld [vmem:[#allocation3 + $0x290] sm:$0xff] }
  0xf2   : > { %884 = vrot.lane.b32.xlu1 %v3658_v42, %s3099_s9  ;;  %1695 = vst.msk [vmem:[#allocation3 + $0x298] sm:$0xff] %vm199_vm0, %v1663_v1  ;;  %v3958_v1 = vld [vmem:[#allocation2 + $0xe0] sm:$0xff] }
  0xf3   : > { %v919_v9 = vpop.permute.xlu0 %918 }
  0xf4   : > { %989 = vst.msk [vmem:[#allocation3 + $0x270] sm:$0xff] %vm962_vm4, %v919_v9  ;;  %v491_v47 = vpop.permute.xlu1 %490  ;;  %v1781_v15 = vld [vmem:[#allocation3 + $0x288] sm:$0xff]  ;;  %v1664_v9 = vld [vmem:[#allocation2 + $0x182] sm:$0xff] }
  0xf5   : > { %1524 = vrot.lane.b32.xlu0 %v3496_v39, %s3099_s9  ;;  %582 = vst.msk [vmem:[#allocation3 + $0x78] sm:$0xff] %vm576_vm2, %v491_v47 }
  0xf6   : > { %1145 = vrot.lane.b32.xlu1 %v3511_v43, %s3097_s25  ;;  %1696 = vst.msk [vmem:[#allocation3 + $0x2b0] sm:$0xff] %vm199_vm0, %v1664_v9 }
  0xf7   : > { %v1132_v13 = vpop.permute.xlu0 %1131  ;;  %v1779_v14 = vld [vmem:[#allocation3 + $0x278] sm:$0xff] }
  0xf8   : > { %1223 = vst.msk [vmem:[#allocation3 + $0x68] sm:$0xff] %vm576_vm2, %v1132_v13  ;;  %v1836_v42 = vpack.c.bf16 %v1782_v32, %v1779_v14  ;;  %v1327_v18 = vpop.permute.xlu1 %1326  ;;  %v1665_v32 = vld [vmem:[#allocation2 + $0x18a] sm:$0xff] }
  0xf9   : > { %882 = vrot.lane.b32.xlu0 %v3666_v55, %s3099_s9  ;;  %1417 = vst.msk [vmem:[#allocation3 + $0x80] sm:$0xff] %vm769_vm3, %v1327_v18 }
  0xfa   : > { %2172 = vmatprep.mubr.bf16.mxu1 %v1836_v42  ;;  %502 = vrot.lane.b32.xlu1 %v3417_v23, %s3097_s25  ;;  %1697 = vst.msk [vmem:[#allocation3 + $0x2c8] sm:$0xff] %vm199_vm0, %v1665_v32  ;;  %v1666_v42 = vld [vmem:[#allocation2 + $0x19a] sm:$0xff]  ;;  %v369_v32 = vld [vmem:[#allocation2 + $0xc8] sm:$0xff] }
  0xfb   : > { %v489_v11 = vpop.permute.xlu0 %488  ;;  %v1778_v19 = vld [vmem:[#allocation3 + $0x270] sm:$0xff]  ;;  %1698 = vst.msk [vmem:[#allocation3 + $0x2e0] sm:$0xff] %vm199_vm0, %v1666_v42  ;;  %401 = vst.msk [vmem:[#allocation3 + $0x198] sm:$0xff] %vm199_vm0, %v369_v32 }
  0xfc   : > { %581 = vst.msk [vmem:[#allocation3 + $0x60] sm:$0xff] %vm576_vm2, %v489_v11  ;;  %v1835_v48 = vpack.c.bf16 %v1781_v15, %v1778_v19  ;;  %v684_v55 = vpop.permute.xlu1 %683  ;;  %v1667_v15 = vld [vmem:[#allocation2 + $0x1a2] sm:$0xff] }
  0xfd   : > { %1143 = vrot.lane.b32.xlu0 %v3513_v46, %s3097_s25  ;;  %775 = vst.msk [vmem:[#allocation3 + $0x78] sm:$0xff] %vm769_vm3, %v684_v55  ;;  %v3924_v19 = vld [vmem:[#allocation2 + $0xc0] sm:$0xff] }
  0xfe   : > { %2173 = vmatmul.mubr.bf16.gmra.mrb[4].mxu1 %v1835_v48  ;;  %1338 = vrot.lane.b32.xlu1 %v3848_v22, %s3098_s26  ;;  %1699 = vst.msk [vmem:[#allocation3 + $0x2f8] sm:$0xff] %vm199_vm0, %v1667_v15 }
  0xff   : > { %v1325_v25 = vpop.permute.xlu0 %1324 }
 0x100   : > { %1416 = vst.msk [vmem:[#allocation3 + $0x68] sm:$0xff] %vm769_vm3, %v1325_v25  ;;  %v1182_v23 = vpop.permute.xlu1 %1181 }
 0x101   : > { %500 = vrot.lane.b32.xlu0 %v3419_v24, %s3097_s25  ;;  %1248 = vst.msk [vmem:[#allocation3 + $0x2c0] sm:$0xff] %vm576_vm2, %v1182_v23  ;;  %v3870_v24 = vld [vmem:[#allocation2 + $0x121] sm:$0xff] }
 0x102   : > { %695 = vrot.lane.b32.xlu1 %v3464_v34, %s3098_s26  ;;  %1049 = vst.msk [vmem:[#allocation3 + $0x218] sm:$0xff] %vm199_vm0, %v3870_v24 }
 0x103   : > { %v682_v30 = vpop.permute.xlu0 %681 }
 0x104   : > { %774 = vst.msk [vmem:[#allocation3 + $0x60] sm:$0xff] %vm769_vm3, %v682_v30  ;;  %v1519_v34 = vpop.permute.xlu1 %1518 }
 0x105   : > { %1336 = vrot.lane.b32.xlu0 %v3856_v26, %s3098_s26  ;;  %1609 = vst.msk [vmem:[#allocation3 + $0x80] sm:$0xff] %vm962_vm4, %v1519_v34  ;;  %v366_v34 = vld [vmem:[#allocation2 + $0xa8] sm:$0xff] }
 0x106   : > { %1530 = vrot.lane.b32.xlu1 %v3545_v53, %s3099_s9  ;;  %398 = vst.msk [vmem:[#allocation3 + $0x150] sm:$0xff] %vm199_vm0, %v366_v34  ;;  %v370_v34 = vld [vmem:[#allocation2 + $0xd8] sm:$0xff] }
 0x107   : > { %v1180_v41 = vpop.permute.xlu0 %1179  ;;  %402 = vst.msk [vmem:[#allocation3 + $0x1b0] sm:$0xff] %vm199_vm0, %v370_v34 }
 0x108   : > { %1247 = vst.msk [vmem:[#allocation3 + $0x2a8] sm:$0xff] %vm576_vm2, %v1180_v41  ;;  %v539_v63 = vpop.permute.xlu1 %538 }
 0x109   : > { %693 = vrot.lane.b32.xlu0 %v3466_v35, %s3098_s26  ;;  %606 = vst.msk [vmem:[#allocation3 + $0x2b8] sm:$0xff] %vm576_vm2, %v539_v63  ;;  %v1662_v35 = vld [vmem:[#allocation2 + $0x16a] sm:$0xff] }
 0x10a   : > { %888 = vrot.lane.b32.xlu1 %v3786_v60, %s3099_s9  ;;  %1694 = vst.msk [vmem:[#allocation3 + $0x280] sm:$0xff] %vm199_vm0, %v1662_v35 }
 0x10b   : > { %v1517_v59 = vpop.permute.xlu0 %1516 }
 0x10c   : > { %1608 = vst.msk [vmem:[#allocation3 + $0x68] sm:$0xff] %vm962_vm4, %v1517_v59  ;;  %v877_v29 = vpop.permute.xlu1 %876  ;;  %v1716_v60 = vld [vmem:[#allocation3 + $0x80] sm:$0xff] }
 0x10d   : > { %1528 = vrot.lane.b32.xlu0 %v3547_v54, %s3099_s9  ;;  %968 = vst.msk [vmem:[#allocation3 + $0x78] sm:$0xff] %vm962_vm4, %v877_v29 }
 0x10e   : > { %1149 = vrot.lane.b32.xlu1 %v3570_v6, %s3097_s25 }
 0x10f   : > { %v537_v2 = vpop.permute.xlu0 %536 }
 0x110   : > { %605 = vst.msk [vmem:[#allocation3 + $0x2a0] sm:$0xff] %vm576_vm2, %v537_v2  ;;  %v1375_v56 = vpop.permute.xlu1 %1374  ;;  %v3966_v2 = vld [vmem:[#allocation2 + $0xd8] sm:$0xff] }
 0x111   : > { %886 = vrot.lane.b32.xlu0 %v3798_v37, %s3099_s9  ;;  %1441 = vst.msk [vmem:[#allocation3 + $0x2c0] sm:$0xff] %vm769_vm3, %v1375_v56  ;;  %v3914_v37 = vld [vmem:[#allocation2 + $0xc8] sm:$0xff] }
 0x112   : > { %506 = vrot.lane.b32.xlu1 %v3494_v38, %s3097_s25 }
 0x113   : > { %v875_v47 = vpop.permute.xlu0 %874  ;;  %v1713_v13 = vld [vmem:[#allocation3 + $0x68] sm:$0xff] }
 0x114   : > { %967 = vst.msk [vmem:[#allocation3 + $0x60] sm:$0xff] %vm962_vm4, %v875_v47  ;;  %v1803_v14 = vpack.c.bf16 %v1716_v60, %v1713_v13  ;;  %v732_v18 = vpop.permute.xlu1 %731  ;;  %v1715_v38 = vld [vmem:[#allocation3 + $0x78] sm:$0xff]  ;;  %v368_v47 = vld [vmem:[#allocation2 + $0xc0] sm:$0xff] }
 0x115   : > { %1147 = vrot.lane.b32.xlu0 %v3572_v7, %s3097_s25  ;;  %799 = vst.msk [vmem:[#allocation3 + $0x2b8] sm:$0xff] %vm769_vm3, %v732_v18 }
 0x116   : > { %2084 = vmatprep.mubr.bf16.mxu0 %v1803_v14  ;;  %1342 = vrot.lane.b32.xlu1 %v3914_v37, %s3098_s26  ;;  %400 = vst.msk [vmem:[#allocation3 + $0x180] sm:$0xff] %vm199_vm0, %v368_v47 }
 0x117   : > { %v1373_v11 = vpop.permute.xlu0 %1372 }
 0x118   : > { %1440 = vst.msk [vmem:[#allocation3 + $0x2a8] sm:$0xff] %vm769_vm3, %v1373_v11  ;;  %v1567_v48 = vpop.permute.xlu1 %1566  ;;  %v4000_v11 = vld [vmem:[#allocation2 + $0xf8] sm:$0xff] }
 0x119   : > { %504 = vrot.lane.b32.xlu0 %v3496_v39, %s3097_s25  ;;  %1633 = vst.msk [vmem:[#allocation3 + $0x2c0] sm:$0xff] %vm962_vm4, %v1567_v48 }
 0x11a   : > { %699 = vrot.lane.b32.xlu1 %v3511_v43, %s3098_s26 }
 0x11b   : > { %v730_v55 = vpop.permute.xlu0 %729  ;;  %v1712_v25 = vld [vmem:[#allocation3 + $0x60] sm:$0xff] }
 0x11c   : > { %798 = vst.msk [vmem:[#allocation3 + $0x2a0] sm:$0xff] %vm769_vm3, %v730_v55  ;;  %v1802_v23 = vpack.c.bf16 %v1715_v38, %v1712_v25  ;;  %v925_v30 = vpop.permute.xlu1 %924 }
 0x11d   : > { %1340 = vrot.lane.b32.xlu0 %v3924_v19, %s3098_s26  ;;  %992 = vst.msk [vmem:[#allocation3 + $0x2b8] sm:$0xff] %vm962_vm4, %v925_v30 }
 0x11e   : > { %2085 = vmatmul.mubr.bf16.gmra.mrb[8].mxu0 %v1802_v23  ;;  %1534 = vrot.lane.b32.xlu1 %v3607_v50, %s3099_s9 }
 0x11f   : > { %v1565_v39 = vpop.permute.xlu0 %1564 }
 0x120   : > { %1632 = vst.msk [vmem:[#allocation3 + $0x2a8] sm:$0xff] %vm962_vm4, %v1565_v39  ;;  %v1138_v33 = vpop.permute.xlu1 %1137  ;;  %v1788_v41 = vld [vmem:[#allocation3 + $0x2c0] sm:$0xff] }
 0x121   : > { %697 = vrot.lane.b32.xlu0 %v3513_v46, %s3098_s26  ;;  %1226 = vst.msk [vmem:[#allocation3 + $0xb0] sm:$0xff] %vm576_vm2, %v1138_v33 }
 0x122   : > { %892 = vrot.lane.b32.xlu1 %v3848_v22, %s3099_s9 }
 0x123   : > { %v923_v43 = vpop.permute.xlu0 %922 }
 0x124   : > { %991 = vst.msk [vmem:[#allocation3 + $0x2a0] sm:$0xff] %vm962_vm4, %v923_v43  ;;  %v495_v46 = vpop.permute.xlu1 %494  ;;  %v1787_v59 = vld [vmem:[#allocation3 + $0x2b8] sm:$0xff] }
 0x125   : > { %1532 = vrot.lane.b32.xlu0 %v3609_v16, %s3099_s9  ;;  %584 = vst.msk [vmem:[#allocation3 + $0xa8] sm:$0xff] %vm576_vm2, %v495_v46 }
 0x126   : > { %1153 = vrot.lane.b32.xlu1 %v3630_v3, %s3097_s25 }
 0x127   : > { %v1136_v63 = vpop.permute.xlu0 %1135  ;;  %v1785_v57 = vld [vmem:[#allocation3 + $0x2a8] sm:$0xff] }
 0x128   : > { %1225 = vst.msk [vmem:[#allocation3 + $0x98] sm:$0xff] %vm576_vm2, %v1136_v63  ;;  %v1839_v58 = vpack.c.bf16 %v1788_v41, %v1785_v57  ;;  %v1331_v22 = vpop.permute.xlu1 %1330  ;;  %v1702_v57 = vld [vmem:[#allocation3 + $0x10] sm:$0xff] }
 0x129   : > { %890 = vrot.lane.b32.xlu0 %v3856_v26, %s3099_s9  ;;  %1419 = vst.msk [vmem:[#allocation3 + $0xb0] sm:$0xff] %vm769_vm3, %v1331_v22 }
 0x12a   : > { %2180 = vmatprep.mubr.bf16.mxu1 %v1839_v58  ;;  %510 = vrot.lane.b32.xlu1 %v3545_v53, %s3097_s25  ;;  %v1705_v58 = vld [vmem:[#allocation3 + $0x28] sm:$0xff] }
 0x12b   : > { %v493_v52 = vpop.permute.xlu0 %492  ;;  %v1784_v0 = vld [vmem:[#allocation3 + $0x2a0] sm:$0xff] }
 0x12c   : > { %583 = vst.msk [vmem:[#allocation3 + $0x90] sm:$0xff] %vm576_vm2, %v493_v52  ;;  %v1838_v35 = vpack.c.bf16 %v1787_v59, %v1784_v0  ;;  %v688_v26 = vpop.permute.xlu1 %687 }
 0x12d   : > { %1151 = vrot.lane.b32.xlu0 %v3632_v28, %s3097_s25  ;;  %777 = vst.msk [vmem:[#allocation3 + $0xa8] sm:$0xff] %vm769_vm3, %v688_v26 }
 0x12e   : > { %2181 = vmatmul.mubr.bf16.gmra.mrb[8].mxu1 %v1838_v35  ;;  %1346 = vrot.lane.b32.xlu1 %v3958_v1, %s3098_s26  ;;  %v1798_v35 = vpack.c.bf16 %v1705_v58, %v1702_v57  ;;  %v1747_v57 = vld [vmem:[#allocation3 + $0x178] sm:$0xff]  ;;  %v1753_v58 = vld [vmem:[#allocation3 + $0x1a8] sm:$0xff] }
 0x12f   : > { %v1329_v29 = vpop.permute.xlu0 %1328 }
 0x130   : > { %1418 = vst.msk [vmem:[#allocation3 + $0x98] sm:$0xff] %vm769_vm3, %v1329_v29  ;;  %v1186_v53 = vpop.permute.xlu1 %1185 }
 0x131   : > { %508 = vrot.lane.b32.xlu0 %v3547_v54, %s3097_s25  ;;  %1250 = vst.msk [vmem:[#allocation3 + $0x2f0] sm:$0xff] %vm576_vm2, %v1186_v53  ;;  %v1711_v53 = vld [vmem:[#allocation3 + $0x58] sm:$0xff] }
 0x132   : > { %703 = vrot.lane.b32.xlu1 %v3570_v6, %s3098_s26 }
 0x133   : > { %v686_v60 = vpop.permute.xlu0 %685 }
 0x134   : > { %776 = vst.msk [vmem:[#allocation3 + $0x90] sm:$0xff] %vm769_vm3, %v686_v60  ;;  %v1523_v56 = vpop.permute.xlu1 %1522  ;;  %v1714_v60 = vld [vmem:[#allocation3 + $0x70] sm:$0xff] }
 0x135   : > { %1344 = vrot.lane.b32.xlu0 %v3966_v2, %s3098_s26  ;;  %1611 = vst.msk [vmem:[#allocation3 + $0xb0] sm:$0xff] %vm962_vm4, %v1523_v56  ;;  %v1717_v56 = vld [vmem:[#allocation3 + $0x88] sm:$0xff] }
 0x136   : > { %1538 = vrot.lane.b32.xlu1 %v3672_v5, %s3099_s9  ;;  %v1804_v32 = vpack.c.bf16 %v1717_v56, %v1714_v60 }
 0x137   : > { %v1184_v9 = vpop.permute.xlu0 %1183 }
 0x138   : > { %1249 = vst.msk [vmem:[#allocation3 + $0x2d8] sm:$0xff] %vm576_vm2, %v1184_v9  ;;  %v543_v54 = vpop.permute.xlu1 %542 }
 0x139   : > { %701 = vrot.lane.b32.xlu0 %v3572_v7, %s3098_s26  ;;  %608 = vst.msk [vmem:[#allocation3 + $0x2e8] sm:$0xff] %vm576_vm2, %v543_v54 }
 0x13a   : > { %896 = vrot.lane.b32.xlu1 %v3914_v37, %s3099_s9 }
 0x13b   : > { %v1521_v13 = vpop.permute.xlu0 %1520 }
 0x13c   : > { %1610 = vst.msk [vmem:[#allocation3 + $0x98] sm:$0xff] %vm962_vm4, %v1521_v13  ;;  %v881_v6 = vpop.permute.xlu1 %880  ;;  %v1722_v14 = vld [vmem:[#allocation3 + $0xb0] sm:$0xff] }
 0x13d   : > { %1536 = vrot.lane.b32.xlu0 %v3674_v8, %s3099_s9  ;;  %970 = vst.msk [vmem:[#allocation3 + $0xa8] sm:$0xff] %vm962_vm4, %v881_v6  ;;  %v1723_v6 = vld [vmem:[#allocation3 + $0xb8] sm:$0xff] }
 0x13e   : > { %1157 = vrot.lane.b32.xlu1 %v3694_v20, %s3097_s25 }
 0x13f   : > { %v541_v7 = vpop.permute.xlu0 %540 }
 0x140   : > { %607 = vst.msk [vmem:[#allocation3 + $0x2d0] sm:$0xff] %vm576_vm2, %v541_v7  ;;  %v1379_v42 = vpop.permute.xlu1 %1378  ;;  %v1726_v7 = vld [vmem:[#allocation3 + $0xd0] sm:$0xff] }
 0x141   : > { %894 = vrot.lane.b32.xlu0 %v3924_v19, %s3099_s9  ;;  %1443 = vst.msk [vmem:[#allocation3 + $0x2f0] sm:$0xff] %vm769_vm3, %v1379_v42 }
 0x142   : > { %514 = vrot.lane.b32.xlu1 %v3607_v50, %s3097_s25  ;;  %v4008_v50 = vld [vmem:[#allocation2 + $0xf0] sm:$0xff] }
 0x143   : > { %v879_v15 = vpop.permute.xlu0 %878  ;;  %v1719_v18 = vld [vmem:[#allocation3 + $0x98] sm:$0xff] }
 0x144   : > { %969 = vst.msk [vmem:[#allocation3 + $0x90] sm:$0xff] %vm962_vm4, %v879_v15  ;;  %v1806_v37 = vpack.c.bf16 %v1722_v14, %v1719_v18  ;;  %v736_v38 = vpop.permute.xlu1 %735  ;;  %v1721_v48 = vld [vmem:[#allocation3 + $0xa8] sm:$0xff]  ;;  %v372_v18 = vld [vmem:[#allocation2 + $0xf0] sm:$0xff] }
 0x145   : > { %1155 = vrot.lane.b32.xlu0 %v3696_v21, %s3097_s25  ;;  %801 = vst.msk [vmem:[#allocation3 + $0x2e8] sm:$0xff] %vm769_vm3, %v736_v38  ;;  %v373_v15 = vld [vmem:[#allocation2 + $0xf8] sm:$0xff] }
 0x146   : > { %2092 = vmatprep.mubr.bf16.mxu0 %v1806_v37  ;;  %1350 = vrot.lane.b32.xlu1 %v4000_v11, %s3098_s26  ;;  %405 = vst.msk [vmem:[#allocation3 + $0x1f8] sm:$0xff] %vm199_vm0, %v373_v15  ;;  %404 = vst.msk [vmem:[#allocation3 + $0x1e0] sm:$0xff] %vm199_vm0, %v372_v18 }
 0x147   : > { %v1377_v19 = vpop.permute.xlu0 %1376 }
 0x148   : > { %1442 = vst.msk [vmem:[#allocation3 + $0x2d8] sm:$0xff] %vm769_vm3, %v1377_v19  ;;  %v1571_v55 = vpop.permute.xlu1 %1570 }
 0x149   : > { %512 = vrot.lane.b32.xlu0 %v3609_v16, %s3097_s25  ;;  %1635 = vst.msk [vmem:[#allocation3 + $0x2f0] sm:$0xff] %vm962_vm4, %v1571_v55 }
 0x14a   : > { %707 = vrot.lane.b32.xlu1 %v3630_v3, %s3098_s26 }
 0x14b   : > { %v734_v25 = vpop.permute.xlu0 %733  ;;  %v1718_v23 = vld [vmem:[#allocation3 + $0x90] sm:$0xff] }
 0x14c   : > { %800 = vst.msk [vmem:[#allocation3 + $0x2d0] sm:$0xff] %vm769_vm3, %v734_v25  ;;  %v1805_v30 = vpack.c.bf16 %v1721_v48, %v1718_v23  ;;  %v929_v39 = vpop.permute.xlu1 %928  ;;  %v1732_v25 = vld [vmem:[#allocation3 + $0x100] sm:$0xff]  ;;  %v1735_v23 = vld [vmem:[#allocation3 + $0x118] sm:$0xff] }
 0x14d   : > { %1348 = vrot.lane.b32.xlu0 %v4008_v50, %s3098_s26  ;;  %994 = vst.msk [vmem:[#allocation3 + $0x2e8] sm:$0xff] %vm962_vm4, %v929_v39  ;;  %v1741_v39 = vld [vmem:[#allocation3 + $0x148] sm:$0xff] }
 0x14e   : > { %2093 = vmatmul.mubr.bf16.gmra.mrb[12].mxu0 %v1805_v30  ;;  %1542 = vrot.lane.b32.xlu1 %v3726_v61, %s3099_s9 }
 0x14f   : > { %v1569_v16 = vpop.permute.xlu0 %1568 }
 0x150   : > { %1634 = vst.msk [vmem:[#allocation3 + $0x2d8] sm:$0xff] %vm962_vm4, %v1569_v16  ;;  %v1142_v33 = vpop.permute.xlu1 %1141  ;;  %v1794_v43 = vld [vmem:[#allocation3 + $0x2f0] sm:$0xff] }
 0x151   : > { %705 = vrot.lane.b32.xlu0 %v3632_v28, %s3098_s26  ;;  %1228 = vst.msk [vmem:[#allocation3 + $0xe0] sm:$0xff] %vm576_vm2, %v1142_v33  ;;  %v1813_v33 = vpack.c.bf16 %v1735_v23, %v1732_v25 }
 0x152   : > { %900 = vrot.lane.b32.xlu1 %v3958_v1, %s3099_s9 }
 0x153   : > { %v927_v3 = vpop.permute.xlu0 %926 }
 0x154   : > { %993 = vst.msk [vmem:[#allocation3 + $0x2d0] sm:$0xff] %vm962_vm4, %v927_v3  ;;  %v499_v28 = vpop.permute.xlu1 %498  ;;  %v1793_v59 = vld [vmem:[#allocation3 + $0x2e8] sm:$0xff] }
 0x155   : > { %1540 = vrot.lane.b32.xlu0 %v3728_v51, %s3099_s9  ;;  %586 = vst.msk [vmem:[#allocation3 + $0xd8] sm:$0xff] %vm576_vm2, %v499_v28 }
 0x156   : > { %1161 = vrot.lane.b32.xlu1 %v3747_v45, %s3097_s25 }
 0x157   : > { %v1140_v41 = vpop.permute.xlu0 %1139  ;;  %v1791_v46 = vld [vmem:[#allocation3 + $0x2d8] sm:$0xff] }
 0x158   : > { %1227 = vst.msk [vmem:[#allocation3 + $0xc8] sm:$0xff] %vm576_vm2, %v1140_v41  ;;  %v1842_v63 = vpack.c.bf16 %v1794_v43, %v1791_v46  ;;  %v1335_v22 = vpop.permute.xlu1 %1334  ;;  %v4085_v41 = vld [vmem:[#allocation2 + $0x128] sm:$0xff] }
 0x159   : > { %898 = vrot.lane.b32.xlu0 %v3966_v2, %s3099_s9  ;;  %1421 = vst.msk [vmem:[#allocation3 + $0xe0] sm:$0xff] %vm769_vm3, %v1335_v22  ;;  %v1708_v2 = vld [vmem:[#allocation3 + $0x40] sm:$0xff] }
 0x15a   : > { %2188 = vmatprep.mubr.bf16.mxu1 %v1842_v63  ;;  %518 = vrot.lane.b32.xlu1 %v3672_v5, %s3097_s25  ;;  %v1801_v5 = vpack.c.bf16 %v1711_v53, %v1708_v2  ;;  %v1744_v63 = vld [vmem:[#allocation3 + $0x160] sm:$0xff]  ;;  %v1762_v2 = vld [vmem:[#allocation3 + $0x1f0] sm:$0xff] }
 0x15b   : > { %v497_v52 = vpop.permute.xlu0 %496  ;;  %v1790_v0 = vld [vmem:[#allocation3 + $0x2d0] sm:$0xff]  ;;  %v1819_v22 = vpack.c.bf16 %v1747_v57, %v1744_v63 }
 0x15c   : > { %585 = vst.msk [vmem:[#allocation3 + $0xc0] sm:$0xff] %vm576_vm2, %v497_v52  ;;  %v1841_v1 = vpack.c.bf16 %v1793_v59, %v1790_v0  ;;  %v692_v26 = vpop.permute.xlu1 %691  ;;  %v4095_v59 = vld [vmem:[#allocation2 + $0x120] sm:$0xff] }
 0x15d   : > { %1159 = vrot.lane.b32.xlu0 %v3749_v17, %s3097_s25  ;;  %779 = vst.msk [vmem:[#allocation3 + $0xd8] sm:$0xff] %vm769_vm3, %v692_v26  ;;  %v1756_v26 = vld [vmem:[#allocation3 + $0x1c0] sm:$0xff] }
 0x15e   : > { %2189 = vmatmul.mubr.bf16.gmra.mrb[12].mxu1 %v1841_v1  ;;  %1354 = vrot.lane.b32.xlu1 %v3780_v49, %s3098_s26 }
 0x15f   : > { %v1333_v29 = vpop.permute.xlu0 %1332  ;;  %3010 = vmatprep.mubr.msk.bf16.mxu1 %vm199_vm0, %v1798_v35 }
 0x160   : > { %1420 = vst.msk [vmem:[#allocation3 + $0xc8] sm:$0xff] %vm769_vm3, %v1333_v29  ;;  %v1527_v9 = vpop.permute.xlu1 %1526  ;;  %v1759_v29 = vld [vmem:[#allocation3 + $0x1d8] sm:$0xff] }
 0x161   : > { %516 = vrot.lane.b32.xlu0 %v3674_v8, %s3097_s25  ;;  %1613 = vst.msk [vmem:[#allocation3 + $0xe0] sm:$0xff] %vm962_vm4, %v1527_v9  ;;  %v1720_v8 = vld [vmem:[#allocation3 + $0xa0] sm:$0xff]  ;;  %v1825_v53 = vpack.c.bf16 %v1759_v29, %v1756_v26 }
 0x162   : > { %711 = vrot.lane.b32.xlu1 %v3694_v20, %s3098_s26  ;;  %v1729_v20 = vld [vmem:[#allocation3 + $0xe8] sm:$0xff]  ;;  %v1807_v14 = vpack.c.bf16 %v1723_v6, %v1720_v8 }
 0x163   : > { %v690_v54 = vpop.permute.xlu0 %689  ;;  %v1810_v38 = vpack.c.bf16 %v1729_v20, %v1726_v7 }
 0x164   : > { %778 = vst.msk [vmem:[#allocation3 + $0xc0] sm:$0xff] %vm769_vm3, %v690_v54  ;;  %v885_v47 = vpop.permute.xlu1 %884 }
 0x165   : > { %1352 = vrot.lane.b32.xlu0 %v3782_v36, %s3098_s26  ;;  %972 = vst.msk [vmem:[#allocation3 + $0xd8] sm:$0xff] %vm962_vm4, %v885_v47  ;;  %v1771_v47 = vld [vmem:[#allocation3 + $0x238] sm:$0xff] }
 0x166   : > { %3011 = vmatmul.mubr.msk.bf16.vlgmr.msra.gmra.mrb[16].mxu1 %vm199_vm0, %v1801_v5  ;;  %1546 = vrot.lane.b32.xlu1 %v3804_v62, %s3099_s9 }
 0x167   : > { %v1525_v13 = vpop.permute.xlu0 %1524  ;;  %3014 = vmatprep.mubr.msk.bf16.mxu1 %vm199_vm0, %v1804_v32  ;;  %v1768_v32 = vld [vmem:[#allocation3 + $0x220] sm:$0xff] }
 0x168   : > { %1612 = vst.msk [vmem:[#allocation3 + $0xc8] sm:$0xff] %vm962_vm4, %v1525_v13  ;;  %v1146_v42 = vpop.permute.xlu1 %1145  ;;  %v1831_v6 = vpack.c.bf16 %v1771_v47, %v1768_v32 }
 0x169   : > { %709 = vrot.lane.b32.xlu0 %v3696_v21, %s3098_s26  ;;  %1230 = vst.msk [vmem:[#allocation3 + $0x110] sm:$0xff] %vm576_vm2, %v1146_v42  ;;  %v1728_v21 = vld [vmem:[#allocation3 + $0xe0] sm:$0xff] }
 0x16a   : > { %904 = vrot.lane.b32.xlu1 %v4000_v11, %s3099_s9  ;;  %v1738_v11 = vld [vmem:[#allocation3 + $0x130] sm:$0xff] }
 0x16b   : > { %v883_v37 = vpop.permute.xlu0 %882  ;;  %v1816_v43 = vpack.c.bf16 %v1741_v39, %v1738_v11 }
 0x16c   : > { %971 = vst.msk [vmem:[#allocation3 + $0xc0] sm:$0xff] %vm962_vm4, %v883_v37  ;;  %v503_v19 = vpop.permute.xlu1 %502  ;;  %v1727_v16 = vld [vmem:[#allocation3 + $0xd8] sm:$0xff]  ;;  %v1780_v37 = vld [vmem:[#allocation3 + $0x280] sm:$0xff] }
 0x16d   : > { %1544 = vrot.lane.b32.xlu0 %v3806_v44, %s3099_s9  ;;  %588 = vst.msk [vmem:[#allocation3 + $0x108] sm:$0xff] %vm576_vm2, %v503_v19 }
 0x16e   : > { %3015 = vmatmul.mubr.msk.bf16.gmra.mrb[20].mxu1 %vm199_vm0, %v1807_v14  ;;  %1165 = vrot.lane.b32.xlu1 %v3826_v10, %s3097_s25 }
 0x16f   : > { %v1144_v48 = vpop.permute.xlu0 %1143  ;;  %v1725_v55 = vld [vmem:[#allocation3 + $0xc8] sm:$0xff]  ;;  %3018 = vmatprep.mubr.msk.bf16.mxu1 %vm199_vm0, %v1810_v38  ;;  %v1783_v38 = vld [vmem:[#allocation3 + $0x298] sm:$0xff] }
 0x170   : > { %1229 = vst.msk [vmem:[#allocation3 + $0xf8] sm:$0xff] %vm576_vm2, %v1144_v48  ;;  %v1809_v30 = vpack.c.bf16 %v1728_v21, %v1725_v55  ;;  %v1339_v40 = vpop.permute.xlu1 %1338  ;;  %v1789_v21 = vld [vmem:[#allocation3 + $0x2c8] sm:$0xff]  ;;  %v1837_v55 = vpack.c.bf16 %v1783_v38, %v1780_v37 }
 0x171   : > { %902 = vrot.lane.b32.xlu0 %v4008_v50, %s3099_s9  ;;  %1423 = vst.msk [vmem:[#allocation3 + $0x110] sm:$0xff] %vm769_vm3, %v1339_v40  ;;  %v1274_v48 = vld [vmem:[#allocation2 + $0x138] sm:$0xff] }
 0x172   : > { %2100 = vmatprep.mubr.bf16.mxu0 %v1809_v30  ;;  %522 = vrot.lane.b32.xlu1 %v3726_v61, %s3097_s25  ;;  %v1750_v61 = vld [vmem:[#allocation3 + $0x190] sm:$0xff] }
 0x173   : > { %v501_v34 = vpop.permute.xlu0 %500  ;;  %v1724_v3 = vld [vmem:[#allocation3 + $0xc0] sm:$0xff]  ;;  %v1822_v35 = vpack.c.bf16 %v1753_v58, %v1750_v61 }
 0x174   : > { %587 = vst.msk [vmem:[#allocation3 + $0xf0] sm:$0xff] %vm576_vm2, %v501_v34  ;;  %v1808_v28 = vpack.c.bf16 %v1727_v16, %v1724_v3  ;;  %v696_v50 = vpop.permute.xlu1 %695  ;;  %v1792_v3 = vld [vmem:[#allocation3 + $0x2e0] sm:$0xff] }
 0x175   : > { %1163 = vrot.lane.b32.xlu0 %v3828_v12, %s3097_s25  ;;  %781 = vst.msk [vmem:[#allocation3 + $0x108] sm:$0xff] %vm769_vm3, %v696_v50 }
 0x176   : > { %2101 = vmatmul.mubr.bf16.gmra.mrb[16].mxu0 %v1808_v28  ;;  %3019 = vmatmul.mubr.msk.bf16.gmra.mrb[24].mxu1 %vm199_vm0, %v1813_v33 }
 0x177   : > { %v1337_v46 = vpop.permute.xlu0 %1336  ;;  %3022 = vmatprep.mubr.msk.bf16.mxu1 %vm199_vm0, %v1816_v43  ;;  %1358 = vrot.lane.b32.xlu1 %v4085_v41, %s3098_s26  ;;  %v1795_v43 = vld [vmem:[#allocation3 + $0x2f8] sm:$0xff] }
 0x178   : > { %1422 = vst.msk [vmem:[#allocation3 + $0xf8] sm:$0xff] %vm769_vm3, %v1337_v46  ;;  %v1531_v52 = vpop.permute.xlu1 %1530  ;;  %v1843_v28 = vpack.c.bf16 %v1795_v43, %v1792_v3 }
 0x179   : > { %520 = vrot.lane.b32.xlu0 %v3728_v51, %s3097_s25  ;;  %1615 = vst.msk [vmem:[#allocation3 + $0x110] sm:$0xff] %vm962_vm4, %v1531_v52 }
 0x17b   : > { %v694_v0 = vpop.permute.xlu0 %693  ;;  %715 = vrot.lane.b32.xlu1 %v3747_v45, %s3098_s26  ;;  %v1765_v45 = vld [vmem:[#allocation3 + $0x208] sm:$0xff] }
 0x17c   : > { %780 = vst.msk [vmem:[#allocation3 + $0xf0] sm:$0xff] %vm769_vm3, %v694_v0  ;;  %v889_v1 = vpop.permute.xlu1 %888  ;;  %v1828_v5 = vpack.c.bf16 %v1765_v45, %v1762_v2 }
 0x17d   : > { %1356 = vrot.lane.b32.xlu0 %v4095_v59, %s3098_s26  ;;  %974 = vst.msk [vmem:[#allocation3 + $0x108] sm:$0xff] %vm962_vm4, %v889_v1 }
 0x17e   : > { %3023 = vmatmul.mubr.msk.bf16.gmra.mrb[28].mxu1 %vm199_vm0, %v1819_v22 }
 0x17f   : > { %v1529_v51 = vpop.permute.xlu0 %1528  ;;  %3026 = vmatprep.mubr.msk.bf16.mxu1 %vm199_vm0, %v1822_v35  ;;  %1550 = vrot.lane.b32.xlu1 %v3868_v4, %s3099_s9 }
 0x180   : > { %1614 = vst.msk [vmem:[#allocation3 + $0xf8] sm:$0xff] %vm962_vm4, %v1529_v51  ;;  %v1150_v60 = vpop.permute.xlu1 %1149  ;;  %v1734_v4 = vld [vmem:[#allocation3 + $0x110] sm:$0xff] }
 0x181   : > { %713 = vrot.lane.b32.xlu0 %v3749_v17, %s3098_s26  ;;  %1232 = vst.msk [vmem:[#allocation3 + $0x140] sm:$0xff] %vm576_vm2, %v1150_v60 }
 0x183   : > { %v887_v56 = vpop.permute.xlu0 %886  ;;  %908 = vrot.lane.b32.xlu1 %v3780_v49, %s3099_s9  ;;  %v1774_v49 = vld [vmem:[#allocation3 + $0x250] sm:$0xff] }
 0x184   : > { %973 = vst.msk [vmem:[#allocation3 + $0xf0] sm:$0xff] %vm962_vm4, %v887_v56  ;;  %v507_v9 = vpop.permute.xlu1 %506  ;;  %v1733_v8 = vld [vmem:[#allocation3 + $0x108] sm:$0xff] }
 0x185   : > { %1548 = vrot.lane.b32.xlu0 %v3870_v24, %s3099_s9  ;;  %590 = vst.msk [vmem:[#allocation3 + $0x138] sm:$0xff] %vm576_vm2, %v507_v9  ;;  %v1777_v24 = vld [vmem:[#allocation3 + $0x268] sm:$0xff] }
 0x186   : > { %3027 = vmatmul.mubr.msk.bf16.gmra.mrb[32].mxu1 %vm199_vm0, %v1825_v53  ;;  %v1834_v42 = vpack.c.bf16 %v1777_v24, %v1774_v49 }
 0x187   : > { %v1148_v54 = vpop.permute.xlu0 %1147  ;;  %v1731_v17 = vld [vmem:[#allocation3 + $0xf8] sm:$0xff]  ;;  %3030 = vmatprep.mubr.msk.bf16.mxu1 %vm199_vm0, %v1828_v5  ;;  %1169 = vrot.lane.b32.xlu1 %v3858_v27, %s3097_s25  ;;  %v1275_v27 = vld [vmem:[#allocation2 + $0x140] sm:$0xff] }
 0x188   : > { %1231 = vst.msk [vmem:[#allocation3 + $0x128] sm:$0xff] %vm576_vm2, %v1148_v54  ;;  %v1812_v13 = vpack.c.bf16 %v1734_v4, %v1731_v17  ;;  %v1343_v7 = vpop.permute.xlu1 %1342 }
 0x189   : > { %906 = vrot.lane.b32.xlu0 %v3782_v36, %s3099_s9  ;;  %1425 = vst.msk [vmem:[#allocation3 + $0x140] sm:$0xff] %vm769_vm3, %v1343_v7 }
 0x18a   : > { %2108 = vmatprep.mubr.bf16.mxu0 %v1812_v13 }
 0x18b   : > { %v505_v20 = vpop.permute.xlu0 %504  ;;  %v1730_v14 = vld [vmem:[#allocation3 + $0xf0] sm:$0xff]  ;;  %526 = vrot.lane.b32.xlu1 %v3804_v62, %s3097_s25 }
 0x18c   : > { %589 = vst.msk [vmem:[#allocation3 + $0x120] sm:$0xff] %vm576_vm2, %v505_v20  ;;  %v1811_v15 = vpack.c.bf16 %v1733_v8, %v1730_v14  ;;  %v700_v36 = vpop.permute.xlu1 %699  ;;  %v1786_v62 = vld [vmem:[#allocation3 + $0x2b0] sm:$0xff] }
 0x18d   : > { %1167 = vrot.lane.b32.xlu0 %v3861_v31, %s3097_s25  ;;  %783 = vst.msk [vmem:[#allocation3 + $0x138] sm:$0xff] %vm769_vm3, %v700_v36  ;;  %v1840_v39 = vpack.c.bf16 %v1789_v21, %v1786_v62 }
 0x18e   : > { %2109 = vmatmul.mubr.bf16.gmra.mrb[20].mxu0 %v1811_v15  ;;  %3031 = vmatmul.mubr.msk.bf16.gmra.mrb[36].mxu1 %vm199_vm0, %v1831_v6 }
 0x18f   : > { %v1341_v18 = vpop.permute.xlu0 %1340  ;;  %3034 = vmatprep.mubr.msk.bf16.mxu1 %vm199_vm0, %v1834_v42  ;;  %1362 = vrot.lane.b32.xlu1 %v1275_v27, %s3098_s26 }
 0x190   : > { %1424 = vst.msk [vmem:[#allocation3 + $0x128] sm:$0xff] %vm769_vm3, %v1341_v18  ;;  %v1535_v25 = vpop.permute.xlu1 %1534 }
 0x191   : > { %v2892_v19 = vpop.f32.mrb[0].mxu0  ;;  %524 = vrot.lane.b32.xlu0 %v3806_v44, %s3097_s25  ;;  %1617 = vst.msk [vmem:[#allocation3 + $0x140] sm:$0xff] %vm962_vm4, %v1535_v25  ;;  %v1467_v44 = vld [vmem:[#allocation2 + $0x141] sm:$0xff] }
 0x192   : > { %v2893_v31 = vpop.f32.mrb[1].mxu0 }
 0x193   : > { %v4138_v23 = vadd.f32 %v2893_v31, %v2892_v19  ;;  %v2895_v30 = vpop.f32.mrb[2].mxu0  ;;  %v698_v11 = vpop.permute.xlu0 %697  ;;  %719 = vrot.lane.b32.xlu1 %v3826_v10, %s3098_s26  ;;  %v1466_v10 = vld [vmem:[#allocation2 + $0x139] sm:$0xff] }
 0x194   : > { %782 = vst.msk [vmem:[#allocation3 + $0x120] sm:$0xff] %vm769_vm3, %v698_v11  ;;  %v2896_v16 = vpop.f32.mrb[3].mxu0  ;;  %v893_v40 = vpop.permute.xlu1 %892 }
 0x195   : > { %v4144_v33 = vadd.f32 %v2896_v16, %v2895_v30  ;;  %1360 = vrot.lane.b32.xlu0 %v1274_v48, %s3098_s26  ;;  %976 = vst.msk [vmem:[#allocation3 + $0x138] sm:$0xff] %vm962_vm4, %v893_v40 }
 0x196   : > { %3035 = vmatmul.mubr.msk.bf16.gmra.mrb[40].mxu1 %vm199_vm0, %v1837_v55 }
 0x197   : > { %v1533_v34 = vpop.permute.xlu0 %1532  ;;  %3038 = vmatprep.mubr.msk.bf16.mxu1 %vm199_vm0, %v1840_v39  ;;  %1554 = vrot.lane.b32.xlu1 %v1467_v44, %s3099_s9 }
 0x198   : > { %1616 = vst.msk [vmem:[#allocation3 + $0x128] sm:$0xff] %vm962_vm4, %v1533_v34  ;;  %v1154_v50 = vpop.permute.xlu1 %1153  ;;  %v1740_v63 = vld [vmem:[#allocation3 + $0x140] sm:$0xff] }
 0x199   : > { %717 = vrot.lane.b32.xlu0 %v3828_v12, %s3098_s26  ;;  %1234 = vst.msk [vmem:[#allocation3 + $0x170] sm:$0xff] %vm576_vm2, %v1154_v50 }
 0x19b   : > { %v891_v46 = vpop.permute.xlu0 %890  ;;  %912 = vrot.lane.b32.xlu1 %v4085_v41, %s3099_s9 }
 0x19c   : > { %975 = vst.msk [vmem:[#allocation3 + $0x120] sm:$0xff] %vm962_vm4, %v891_v46  ;;  %v511_v57 = vpop.permute.xlu1 %510  ;;  %v1739_v52 = vld [vmem:[#allocation3 + $0x138] sm:$0xff] }
 0x19d   : > { %1552 = vrot.lane.b32.xlu0 %v1466_v10, %s3099_s9  ;;  %592 = vst.msk [vmem:[#allocation3 + $0x168] sm:$0xff] %vm576_vm2, %v511_v57 }
 0x19e   : > { %3039 = vmatmul.mubr.msk.bf16.gmra.mrb[44].mxu1 %vm199_vm0, %v1843_v28 }
 0x19f   : > { %v1152_v61 = vpop.permute.xlu0 %1151  ;;  %v1737_v58 = vld [vmem:[#allocation3 + $0x128] sm:$0xff] }
 0x1a0   : > { %1233 = vst.msk [vmem:[#allocation3 + $0x158] sm:$0xff] %vm576_vm2, %v1152_v61  ;;  %v1815_v12 = vpack.c.bf16 %v1740_v63, %v1737_v58  ;;  %v1347_v0 = vpop.permute.xlu1 %1346 }
 0x1a1   : > { %v2964_v22 = vpop.f32.mrb[0].mxu1  ;;  %910 = vrot.lane.b32.xlu0 %v4095_v59, %s3099_s9  ;;  %1427 = vst.msk [vmem:[#allocation3 + $0x170] sm:$0xff] %vm769_vm3, %v1347_v0 }
 0x1a2   : > { %2116 = vmatprep.mubr.bf16.mxu0 %v1815_v12  ;;  %v2965_v41 = vpop.f32.mrb[1].mxu1 }
 0x1a3   : > { %v4164_v35 = vadd.f32 %v2965_v41, %v2964_v22  ;;  %v2967_v1 = vpop.f32.mrb[2].mxu1  ;;  %v509_v51 = vpop.permute.xlu0 %508  ;;  %v1736_v26 = vld [vmem:[#allocation3 + $0x120] sm:$0xff] }
 0x1a4   : > { %591 = vst.msk [vmem:[#allocation3 + $0x150] sm:$0xff] %vm576_vm2, %v509_v51  ;;  %v2968_v29 = vpop.f32.mrb[3].mxu1  ;;  %v1814_v2 = vpack.c.bf16 %v1739_v52, %v1736_v26  ;;  %v704_v53 = vpop.permute.xlu1 %703 }
 0x1a5   : > { %v4168_v45 = vadd.f32 %v2968_v29, %v2967_v1  ;;  %785 = vst.msk [vmem:[#allocation3 + $0x168] sm:$0xff] %vm769_vm3, %v704_v53 }
 0x1a6   : > { %2117 = vmatmul.mubr.bf16.gmra.mrb[24].mxu0 %v1814_v2 }
 0x1a7   : > { %v1345_v59 = vpop.permute.xlu0 %1344 }
 0x1a8   : > { %1426 = vst.msk [vmem:[#allocation3 + $0x158] sm:$0xff] %vm769_vm3, %v1345_v59  ;;  %v1539_v60 = vpop.permute.xlu1 %1538 }
 0x1a9   : > { %1619 = vst.msk [vmem:[#allocation3 + $0x170] sm:$0xff] %vm962_vm4, %v1539_v60 }
 0x1ab   : > { %v702_v56 = vpop.permute.xlu0 %701 }
 0x1ac   : > { %784 = vst.msk [vmem:[#allocation3 + $0x150] sm:$0xff] %vm769_vm3, %v702_v56  ;;  %v897_v5 = vpop.permute.xlu1 %896 }
 0x1ad   : > { %978 = vst.msk [vmem:[#allocation3 + $0x168] sm:$0xff] %vm962_vm4, %v897_v5 }
 0x1af   : > { %v1537_v4 = vpop.permute.xlu0 %1536 }
 0x1b0   : > { %1618 = vst.msk [vmem:[#allocation3 + $0x158] sm:$0xff] %vm962_vm4, %v1537_v4  ;;  %v1158_v9 = vpop.permute.xlu1 %1157  ;;  %v1746_v17 = vld [vmem:[#allocation3 + $0x170] sm:$0xff] }
 0x1b1   : > { %1236 = vst.msk [vmem:[#allocation3 + $0x1a0] sm:$0xff] %vm576_vm2, %v1158_v9 }
 0x1b3   : > { %v895_v54 = vpop.permute.xlu0 %894 }
 0x1b4   : > { %977 = vst.msk [vmem:[#allocation3 + $0x150] sm:$0xff] %vm962_vm4, %v895_v54  ;;  %v515_v32 = vpop.permute.xlu1 %514  ;;  %v1745_v24 = vld [vmem:[#allocation3 + $0x168] sm:$0xff] }
 0x1b5   : > { %594 = vst.msk [vmem:[#allocation3 + $0x198] sm:$0xff] %vm576_vm2, %v515_v32 }
 0x1b7   : > { %v1156_v47 = vpop.permute.xlu0 %1155  ;;  %v1743_v13 = vld [vmem:[#allocation3 + $0x158] sm:$0xff] }
 0x1b8   : > { %1235 = vst.msk [vmem:[#allocation3 + $0x188] sm:$0xff] %vm576_vm2, %v1156_v47  ;;  %v1818_v49 = vpack.c.bf16 %v1746_v17, %v1743_v13  ;;  %v1351_v8 = vpop.permute.xlu1 %1350 }
 0x1b9   : > { %1429 = vst.msk [vmem:[#allocation3 + $0x1a0] sm:$0xff] %vm769_vm3, %v1351_v8 }
 0x1ba   : > { %2124 = vmatprep.mubr.bf16.mxu0 %v1818_v49 }
 0x1bb   : > { %v513_v6 = vpop.permute.xlu0 %512  ;;  %v1742_v7 = vld [vmem:[#allocation3 + $0x150] sm:$0xff] }
 0x1bc   : > { %593 = vst.msk [vmem:[#allocation3 + $0x180] sm:$0xff] %vm576_vm2, %v513_v6  ;;  %v1817_v20 = vpack.c.bf16 %v1745_v24, %v1742_v7  ;;  %v708_v14 = vpop.permute.xlu1 %707 }
 0x1bd   : > { %787 = vst.msk [vmem:[#allocation3 + $0x198] sm:$0xff] %vm769_vm3, %v708_v14 }
 0x1be   : > { %2125 = vmatmul.mubr.bf16.gmra.mrb[28].mxu0 %v1817_v20 }
 0x1bf   : > { %v1349_v42 = vpop.permute.xlu0 %1348 }
 0x1c0   : > { %1428 = vst.msk [vmem:[#allocation3 + $0x188] sm:$0xff] %vm769_vm3, %v1349_v42  ;;  %v1543_v36 = vpop.permute.xlu1 %1542 }
 0x1c1   : > { %v2898_v15 = vpop.f32.mrb[4].mxu0  ;;  %1621 = vst.msk [vmem:[#allocation3 + $0x1a0] sm:$0xff] %vm962_vm4, %v1543_v36 }
 0x1c2   : > { %v2899_v27 = vpop.f32.mrb[5].mxu0 }
 0x1c3   : > { %v4184_v18 = vadd.f32 %v2899_v27, %v2898_v15  ;;  %v706_v37 = vpop.permute.xlu0 %705  ;;  %v2901_v38 = vpop.f32.mrb[6].mxu0 }
 0x1c4   : > { %786 = vst.msk [vmem:[#allocation3 + $0x180] sm:$0xff] %vm769_vm3, %v706_v37  ;;  %v2902_v62 = vpop.f32.mrb[7].mxu0  ;;  %v901_v19 = vpop.permute.xlu1 %900 }
 0x1c5   : > { %v4188_v21 = vadd.f32 %v2902_v62, %v2901_v38  ;;  %980 = vst.msk [vmem:[#allocation3 + $0x198] sm:$0xff] %vm962_vm4, %v901_v19 }
 0x1c7   : > { %v1541_v31 = vpop.permute.xlu0 %1540 }
 0x1c8   : > { %1620 = vst.msk [vmem:[#allocation3 + $0x188] sm:$0xff] %vm962_vm4, %v1541_v31  ;;  %v1162_v48 = vpop.permute.xlu1 %1161  ;;  %v1752_v25 = vld [vmem:[#allocation3 + $0x1a0] sm:$0xff] }
 0x1c9   : > { %1238 = vst.msk [vmem:[#allocation3 + $0x1d0] sm:$0xff] %vm576_vm2, %v1162_v48 }
 0x1cb   : > { %v899_v55 = vpop.permute.xlu0 %898 }
 0x1cc   : > { %979 = vst.msk [vmem:[#allocation3 + $0x180] sm:$0xff] %vm962_vm4, %v899_v55  ;;  %v519_v30 = vpop.permute.xlu1 %518  ;;  %v1751_v40 = vld [vmem:[#allocation3 + $0x198] sm:$0xff] }
 0x1cd   : > { %596 = vst.msk [vmem:[#allocation3 + $0x1c8] sm:$0xff] %vm576_vm2, %v519_v30 }
 0x1cf   : > { %v1160_v11 = vpop.permute.xlu0 %1159  ;;  %v1749_v39 = vld [vmem:[#allocation3 + $0x188] sm:$0xff] }
 0x1d0   : > { %1237 = vst.msk [vmem:[#allocation3 + $0x1b8] sm:$0xff] %vm576_vm2, %v1160_v11  ;;  %v1821_v16 = vpack.c.bf16 %v1752_v25, %v1749_v39  ;;  %v1355_v3 = vpop.permute.xlu1 %1354 }
 0x1d1   : > { %v2970_v44 = vpop.f32.mrb[4].mxu1  ;;  %1431 = vst.msk [vmem:[#allocation3 + $0x1d0] sm:$0xff] %vm769_vm3, %v1355_v3 }
 0x1d2   : > { %2132 = vmatprep.mubr.bf16.mxu0 %v1821_v16  ;;  %v2971_v34 = vpop.f32.mrb[5].mxu1 }
 0x1d3   : > { %v4196_v43 = vadd.f32 %v2971_v34, %v2970_v44  ;;  %v2973_v10 = vpop.f32.mrb[6].mxu1  ;;  %v517_v28 = vpop.permute.xlu0 %516  ;;  %v1748_v50 = vld [vmem:[#allocation3 + $0x180] sm:$0xff] }
 0x1d4   : > { %595 = vst.msk [vmem:[#allocation3 + $0x1b0] sm:$0xff] %vm576_vm2, %v517_v28  ;;  %v2974_v46 = vpop.f32.mrb[7].mxu1  ;;  %v1820_v63 = vpack.c.bf16 %v1751_v40, %v1748_v50  ;;  %v712_v61 = vpop.permute.xlu1 %711 }
 0x1d5   : > { %v4200_v57 = vadd.f32 %v2974_v46, %v2973_v10  ;;  %789 = vst.msk [vmem:[#allocation3 + $0x1c8] sm:$0xff] %vm769_vm3, %v712_v61 }
 0x1d6   : > { %2133 = vmatmul.mubr.bf16.gmra.mrb[32].mxu0 %v1820_v63 }
 0x1d7   : > { %v1353_v58 = vpop.permute.xlu0 %1352 }
 0x1d8   : > { %1430 = vst.msk [vmem:[#allocation3 + $0x1b8] sm:$0xff] %vm769_vm3, %v1353_v58  ;;  %v1547_v12 = vpop.permute.xlu1 %1546 }
 0x1d9   : > { %1623 = vst.msk [vmem:[#allocation3 + $0x1d0] sm:$0xff] %vm962_vm4, %v1547_v12 }
 0x1db   : > { %v710_v22 = vpop.permute.xlu0 %709 }
 0x1dc   : > { %788 = vst.msk [vmem:[#allocation3 + $0x1b0] sm:$0xff] %vm769_vm3, %v710_v22  ;;  %v905_v52 = vpop.permute.xlu1 %904 }
 0x1dd   : > { %982 = vst.msk [vmem:[#allocation3 + $0x1c8] sm:$0xff] %vm962_vm4, %v905_v52 }
 0x1df   : > { %v1545_v41 = vpop.permute.xlu0 %1544 }
 0x1e0   : > { %1622 = vst.msk [vmem:[#allocation3 + $0x1b8] sm:$0xff] %vm962_vm4, %v1545_v41  ;;  %v1166_v0 = vpop.permute.xlu1 %1165  ;;  %v1758_v51 = vld [vmem:[#allocation3 + $0x1d0] sm:$0xff] }
 0x1e1   : > { %1240 = vst.msk [vmem:[#allocation3 + $0x200] sm:$0xff] %vm576_vm2, %v1166_v0 }
 0x1e3   : > { %v903_v1 = vpop.permute.xlu0 %902 }
 0x1e4   : > { %981 = vst.msk [vmem:[#allocation3 + $0x1b0] sm:$0xff] %vm962_vm4, %v903_v1  ;;  %v523_v26 = vpop.permute.xlu1 %522  ;;  %v1757_v59 = vld [vmem:[#allocation3 + $0x1c8] sm:$0xff] }
 0x1e5   : > { %598 = vst.msk [vmem:[#allocation3 + $0x1f8] sm:$0xff] %vm576_vm2, %v523_v26 }
 0x1e7   : > { %v1164_v29 = vpop.permute.xlu0 %1163  ;;  %v1755_v2 = vld [vmem:[#allocation3 + $0x1b8] sm:$0xff] }
 0x1e8   : > { %1239 = vst.msk [vmem:[#allocation3 + $0x1e8] sm:$0xff] %vm576_vm2, %v1164_v29  ;;  %v1824_v53 = vpack.c.bf16 %v1758_v51, %v1755_v2 }
 0x1e9   : > { %v1359_v60 = vpop.permute.xlu1 %1358 }
 0x1ea   : > { %2140 = vmatprep.mubr.bf16.mxu0 %v1824_v53  ;;  %1433 = vst.msk [vmem:[#allocation3 + $0x200] sm:$0xff] %vm769_vm3, %v1359_v60 }
 0x1eb   : > { %v521_v56 = vpop.permute.xlu0 %520  ;;  %v1754_v5 = vld [vmem:[#allocation3 + $0x1b0] sm:$0xff] }
 0x1ec   : > { %597 = vst.msk [vmem:[#allocation3 + $0x1e0] sm:$0xff] %vm576_vm2, %v521_v56  ;;  %v1823_v4 = vpack.c.bf16 %v1757_v59, %v1754_v5 }
 0x1ed   : > { %v716_v9 = vpop.permute.xlu1 %715 }
 0x1ee   : > { %2141 = vmatmul.mubr.bf16.gmra.mrb[36].mxu0 %v1823_v4  ;;  %791 = vst.msk [vmem:[#allocation3 + $0x1f8] sm:$0xff] %vm769_vm3, %v716_v9  ;;  %v4248_v9 = vld [vmem:[%s4445_s2] ss:$0 sm:$0xff] }
 0x1ef   : > { %v1357_v54 = vpop.permute.xlu0 %1356 }
 0x1f0   : > { %1432 = vst.msk [vmem:[#allocation3 + $0x1e8] sm:$0xff] %vm769_vm3, %v1357_v54 }
 0x1f1   : > { %v2904_v17 = vpop.f32.mrb[8].mxu0  ;;  %v1551_v47 = vpop.permute.xlu1 %1550 }
 0x1f2   : > { %v2905_v32 = vpop.f32.mrb[9].mxu0  ;;  %1625 = vst.msk [vmem:[#allocation3 + $0x200] sm:$0xff] %vm962_vm4, %v1551_v47 }
 0x1f3   : > { %v4216_v13 = vadd.f32 %v2905_v32, %v2904_v17  ;;  %v714_v49 = vpop.permute.xlu0 %713  ;;  %v2907_v24 = vpop.f32.mrb[10].mxu0  ;;  %v4254_v32 = vld [vmem:[%s4446_s3] ss:$0 sm:$0xff] }
 0x1f4   : > { %790 = vst.msk [vmem:[#allocation3 + $0x1e0] sm:$0xff] %vm769_vm3, %v714_v49  ;;  %v2908_v8 = vpop.f32.mrb[11].mxu0 }
 0x1f5   : > { %v4220_v6 = vadd.f32 %v2908_v8, %v2907_v24  ;;  %v909_v7 = vpop.permute.xlu1 %908 }
 0x1f6   : > { %984 = vst.msk [vmem:[#allocation3 + $0x1f8] sm:$0xff] %vm962_vm4, %v909_v7 }
 0x1f7   : > { %v1549_v20 = vpop.permute.xlu0 %1548 }
 0x1f8   : > { %1624 = vst.msk [vmem:[#allocation3 + $0x1e8] sm:$0xff] %vm962_vm4, %v1549_v20 }
 0x1f9   : > { %v1170_v14 = vpop.permute.xlu1 %1169  ;;  %v1764_v15 = vld [vmem:[#allocation3 + $0x200] sm:$0xff] }
 0x1fa   : > { %1242 = vst.msk [vmem:[#allocation3 + $0x230] sm:$0xff] %vm576_vm2, %v1170_v14 }
 0x1fb   : > { %v907_v42 = vpop.permute.xlu0 %906 }
 0x1fc   : > { %983 = vst.msk [vmem:[#allocation3 + $0x1e0] sm:$0xff] %vm962_vm4, %v907_v42 }
 0x1fd   : > { %v527_v27 = vpop.permute.xlu1 %526  ;;  %v1763_v19 = vld [vmem:[#allocation3 + $0x1f8] sm:$0xff] }
 0x1fe   : > { %600 = vst.msk [vmem:[#allocation3 + $0x228] sm:$0xff] %vm576_vm2, %v527_v27 }
 0x1ff   : > { %v1168_v36 = vpop.permute.xlu0 %1167  ;;  %v1761_v37 = vld [vmem:[#allocation3 + $0x1e8] sm:$0xff] }
 0x200   : > { %1241 = vst.msk [vmem:[#allocation3 + $0x218] sm:$0xff] %vm576_vm2, %v1168_v36  ;;  %v1827_v38 = vpack.c.bf16 %v1764_v15, %v1761_v37 }
 0x201   : > { %v2976_v62 = vpop.f32.mrb[8].mxu1  ;;  %v1363_v48 = vpop.permute.xlu1 %1362 }
 0x202   : > { %2148 = vmatprep.mubr.bf16.mxu0 %v1827_v38  ;;  %v2977_v31 = vpop.f32.mrb[9].mxu1  ;;  %1435 = vst.msk [vmem:[#allocation3 + $0x230] sm:$0xff] %vm769_vm3, %v1363_v48 }
 0x203   : > { %v4228_v55 = vadd.f32 %v2977_v31, %v2976_v62  ;;  %v2979_v25 = vpop.f32.mrb[10].mxu1  ;;  %v525_v30 = vpop.permute.xlu0 %524  ;;  %v1760_v11 = vld [vmem:[#allocation3 + $0x1e0] sm:$0xff] }
 0x204   : > { %599 = vst.msk [vmem:[#allocation3 + $0x210] sm:$0xff] %vm576_vm2, %v525_v30  ;;  %v2980_v39 = vpop.f32.mrb[11].mxu1  ;;  %v1826_v16 = vpack.c.bf16 %v1763_v19, %v1760_v11 }
 0x205   : > { %v4232_v44 = vadd.f32 %v2980_v39, %v2979_v25  ;;  %v720_v40 = vpop.permute.xlu1 %719 }
 0x206   : > { %2149 = vmatmul.mubr.bf16.gmra.mrb[40].mxu0 %v1826_v16  ;;  %793 = vst.msk [vmem:[#allocation3 + $0x228] sm:$0xff] %vm769_vm3, %v720_v40 }
 0x207   : > { %v1361_v34 = vpop.permute.xlu0 %1360 }
 0x208   : > { %1434 = vst.msk [vmem:[#allocation3 + $0x218] sm:$0xff] %vm769_vm3, %v1361_v34 }
 0x209   : > { %v1555_v3 = vpop.permute.xlu1 %1554 }
 0x20a   : > { %1627 = vst.msk [vmem:[#allocation3 + $0x230] sm:$0xff] %vm962_vm4, %v1555_v3 }
 0x20b   : > { %v718_v10 = vpop.permute.xlu0 %717 }
 0x20c   : > { %792 = vst.msk [vmem:[#allocation3 + $0x210] sm:$0xff] %vm769_vm3, %v718_v10 }
 0x20d   : > { %v913_v28 = vpop.permute.xlu1 %912 }
 0x20e   : > { %986 = vst.msk [vmem:[#allocation3 + $0x228] sm:$0xff] %vm962_vm4, %v913_v28 }
 0x20f   : > { %v1553_v50 = vpop.permute.xlu0 %1552 }
 0x210   : > { %1626 = vst.msk [vmem:[#allocation3 + $0x218] sm:$0xff] %vm962_vm4, %v1553_v50 }
 0x211   : > { %v1770_v63 = vld [vmem:[#allocation3 + $0x230] sm:$0xff] }
 0x213   : > { %v911_v46 = vpop.permute.xlu0 %910 }
 0x214   : > { %985 = vst.msk [vmem:[#allocation3 + $0x210] sm:$0xff] %vm962_vm4, %v911_v46 }
 0x215   : > { %v1769_v12 = vld [vmem:[#allocation3 + $0x228] sm:$0xff] }
 0x217   : > { %v1767_v61 = vld [vmem:[#allocation3 + $0x218] sm:$0xff] }
 0x218   : > { %v1830_v58 = vpack.c.bf16 %v1770_v63, %v1767_v61 }
 0x21a   : > { %2156 = vmatprep.mubr.bf16.mxu0 %v1830_v58 }
 0x21b   : > { %v1766_v22 = vld [vmem:[#allocation3 + $0x210] sm:$0xff] }
 0x21c   : > { %v1829_v52 = vpack.c.bf16 %v1769_v12, %v1766_v22 }
 0x21e   : > { %2157 = vmatmul.mubr.bf16.gmra.mrb[44].mxu0 %v1829_v52 }
 0x221   : > { %v2910_v41 = vpop.f32.mrb[12].mxu0 }
 0x222   : > { %v2911_v0 = vpop.f32.mrb[13].mxu0 }
 0x223   : > { %v2912_v1 = vadd.f32 %v2911_v0, %v2910_v41  ;;  %v2913_v51 = vpop.f32.mrb[14].mxu0 }
 0x224   : > { %v2914_v26 = vpop.f32.mrb[15].mxu0 }
 0x225   : > { %v2915_v29 = vadd.f32 %v2914_v26, %v2913_v51 }
 0x231   : > { %v2982_v2 = vpop.f32.mrb[12].mxu1 }
 0x232   : > { %v2983_v53 = vpop.f32.mrb[13].mxu1 }
 0x233   : > { %v4241_v59 = vadd.f32 %v2983_v53, %v2982_v2  ;;  %v2985_v60 = vpop.f32.mrb[14].mxu1 }
 0x234   : > { %v2986_v56 = vpop.f32.mrb[15].mxu1 }
 0x235   : > { %v4243_v5 = vadd.f32 %v2986_v56, %v2985_v60 }
 0x239   : > { %v3012_v4 = vpop.f32.mrb[16].mxu1 }
 0x23a   : > { %v2240_v54 = vadd.f32 %v3012_v4, %v4184_v18  ;;  %v2231_v17 = vpop.f32.mrb[17].mxu1 }
 0x23b   : > { %v2232_v47 = vadd.f32 %v4138_v23, %v2231_v17  ;;  %v3013_v49 = vpop.f32.mrb[18].mxu1 }
 0x23c   : > { %v2367_v24 = vmul.f32 %v4248_v9, %v2240_v54  ;;  %v2243_v8 = vadd.f32 %v3013_v49, %v4188_v21  ;;  %v2234_v7 = vpop.f32.mrb[19].mxu1 }
 0x23d   : > { %v2365_v20 = vmul.f32 %v4248_v9, %v2232_v47  ;;  %v2235_v14 = vadd.f32 %v4144_v33, %v2234_v7 }
 0x23e   : > { %v2406_v18 = vadd.f32 %v4254_v32, %v2367_v24  ;;  %v2368_v42 = vmul.f32 %v4248_v9, %v2243_v8 }
 0x23f   : > { %v2404_v15 = vadd.f32 %v4254_v32, %v2365_v20  ;;  %v2366_v27 = vmul.f32 %v4248_v9, %v2235_v14 }
 0x240   : > { %v2438_v36 = vmax.f32 %v2406_v18, 0.0  ;;  %v2407_v23 = vadd.f32 %v4254_v32, %v2368_v42 }
 0x241   : > { %v2436_v33 = vmax.f32 %v2404_v15, 0.0  ;;  %v2405_v21 = vadd.f32 %v4254_v32, %v2366_v27  ;;  %v3016_v37 = vpop.f32.mrb[20].mxu1 }
 0x242   : > { %v2767_v38 = vpack.c.bf16 %v2438_v36, %v2438_v36  ;;  %v2439_v62 = vmax.f32 %v2407_v23, 0.0  ;;  %v2256_v19 = vadd.f32 %v3016_v37, %v2912_v1  ;;  %v2247_v31 = vpop.f32.mrb[21].mxu1 }
 0x243   : > { %v2765_v48 = vpack.c.bf16 %v2436_v33, %v2436_v33  ;;  %v2437_v25 = vmax.f32 %v2405_v21, 0.0  ;;  %v2248_v30 = vadd.f32 %v4216_v13, %v2247_v31  ;;  %v3017_v11 = vpop.f32.mrb[22].mxu1 }
 0x244   : > { %2599 = vst.msk [vmem:[%s4271_s20 + $0x8] sm:$0xf] %vm2596_vm5, %v2767_v38  ;;  %v2768_v39 = vpack.c.bf16 %v2439_v62, %v2439_v62  ;;  %v2371_v16 = vmul.f32 %v4248_v9, %v2256_v19  ;;  %v2259_v40 = vadd.f32 %v3017_v11, %v2915_v29  ;;  %v2250_v34 = vpop.f32.mrb[23].mxu1 }
 0x245   : > { %2597 = vst.msk [vmem:[%s4271_s20] sm:$0xf] %vm2596_vm5, %v2765_v48  ;;  %v2766_v3 = vpack.c.bf16 %v2437_v25, %v2437_v25  ;;  %v2369_v10 = vmul.f32 %v4248_v9, %v2248_v30  ;;  %v2251_v28 = vadd.f32 %v4220_v6, %v2250_v34 }
 0x246   : > { %2600 = vst.msk [vmem:[%s4271_s20 + $0xc] sm:$0xf] %vm2596_vm5, %v2768_v39  ;;  %v2410_v50 = vadd.f32 %v4254_v32, %v2371_v16  ;;  %v2372_v13 = vmul.f32 %v4248_v9, %v2259_v40 }
 0x247   : > { %2598 = vst.msk [vmem:[%s4271_s20 + $0x4] sm:$0xf] %vm2596_vm5, %v2766_v3  ;;  %v2408_v46 = vadd.f32 %v4254_v32, %v2369_v10  ;;  %v2370_v63 = vmul.f32 %v4248_v9, %v2251_v28 }
 0x248   : > { %v2442_v61 = vmax.f32 %v2410_v50, 0.0  ;;  %v2411_v58 = vadd.f32 %v4254_v32, %v2372_v13 }
 0x249   : > { %v2440_v12 = vmax.f32 %v2408_v46, 0.0  ;;  %v2409_v22 = vadd.f32 %v4254_v32, %v2370_v63  ;;  %v2916_v6 = vpop.f32.mrb[16].mxu0  ;;  %v3020_v52 = vpop.f32.mrb[24].mxu1 }
 0x24a   : > { %v2771_v41 = vpack.c.bf16 %v2442_v61, %v2442_v61  ;;  %v2443_v0 = vmax.f32 %v2411_v58, 0.0  ;;  %v2917_v1 = vpop.f32.mrb[17].mxu0  ;;  %v2263_v51 = vpop.f32.mrb[25].mxu1 }
 0x24b   : > { %v2769_v26 = vpack.c.bf16 %v2440_v12, %v2440_v12  ;;  %v2441_v29 = vmax.f32 %v2409_v22, 0.0  ;;  %v2918_v2 = vadd.f32 %v2917_v1, %v2916_v6  ;;  %v2919_v53 = vpop.f32.mrb[18].mxu0  ;;  %v3021_v60 = vpop.f32.mrb[26].mxu1 }
 0x24c   : > { %2603 = vst.msk [vmem:[%s4271_s20 + $0x18] sm:$0xf] %vm2596_vm5, %v2771_v41  ;;  %v2772_v56 = vpack.c.bf16 %v2443_v0, %v2443_v0  ;;  %v2920_v4 = vpop.f32.mrb[19].mxu0  ;;  %v2266_v54 = vpop.f32.mrb[27].mxu1 }
 0x24d   : > { %2601 = vst.msk [vmem:[%s4271_s20 + $0x10] sm:$0xf] %vm2596_vm5, %v2769_v26  ;;  %v2770_v17 = vpack.c.bf16 %v2441_v29, %v2441_v29  ;;  %v2921_v47 = vadd.f32 %v2920_v4, %v2919_v53  ;;  %v2264_v49 = vadd.f32 %v2918_v2, %v2263_v51 }
 0x24e   : > { %2604 = vst.msk [vmem:[%s4271_s20 + $0x1c] sm:$0xf] %vm2596_vm5, %v2772_v56 }
 0x24f   : > { %2602 = vst.msk [vmem:[%s4271_s20 + $0x14] sm:$0xf] %vm2596_vm5, %v2770_v17  ;;  %v2373_v24 = vmul.f32 %v4248_v9, %v2264_v49  ;;  %v2267_v8 = vadd.f32 %v2921_v47, %v2266_v54 }
 0x251   : > { %v2412_v7 = vadd.f32 %v4254_v32, %v2373_v24  ;;  %v2374_v20 = vmul.f32 %v4248_v9, %v2267_v8  ;;  %v4303_v14 = vpop.f32.mrb[28].mxu1 }
 0x252   : > { %v4305_v18 = vpop.f32.mrb[29].mxu1 }
 0x253   : > { %v2444_v42 = vmax.f32 %v2412_v7, 0.0  ;;  %v2413_v15 = vadd.f32 %v4254_v32, %v2374_v20  ;;  %v4308_v27 = vpop.f32.mrb[30].mxu1 }
 0x254   : > { %v4310_v36 = vpop.f32.mrb[31].mxu1 }
 0x255   : > { %v2773_v23 = vpack.c.bf16 %v2444_v42, %v2444_v42  ;;  %v2445_v33 = vmax.f32 %v2413_v15, 0.0 }
 0x257   : > { %2605 = vst.msk [vmem:[%s4271_s20 + $0x20] sm:$0xf] %vm2596_vm5, %v2773_v23  ;;  %v2774_v21 = vpack.c.bf16 %v2445_v33, %v2445_v33 }
 0x259   : > { %2606 = vst.msk [vmem:[%s4271_s20 + $0x24] sm:$0xf] %vm2596_vm5, %v2774_v21  ;;  %v4316_v37 = vpop.f32.mrb[32].mxu1 }
 0x25a   : > { %v4318_v38 = vpop.f32.mrb[33].mxu1 }
 0x25b   : > { %v4320_v62 = vpop.f32.mrb[34].mxu1 }
 0x25c   : > { %v4322_v19 = vpop.f32.mrb[35].mxu1 }
 0x261   : > { %v2922_v31 = vpop.f32.mrb[20].mxu0  ;;  %v4324_v48 = vpop.f32.mrb[36].mxu1 }
 0x262   : > { %v2923_v25 = vpop.f32.mrb[21].mxu0  ;;  %v4326_v30 = vpop.f32.mrb[37].mxu1 }
 0x263   : > { %v2924_v11 = vadd.f32 %v2923_v25, %v2922_v31  ;;  %v2925_v39 = vpop.f32.mrb[22].mxu0  ;;  %v4328_v16 = vpop.f32.mrb[38].mxu1 }
 0x264   : > { %v2926_v40 = vpop.f32.mrb[23].mxu0  ;;  %v4330_v34 = vpop.f32.mrb[39].mxu1 }
 0x265   : > { %v2272_v3 = vadd.f32 %v3020_v52, %v2924_v11  ;;  %v2927_v10 = vadd.f32 %v2926_v40, %v2925_v39 }
 0x267   : > { %v2375_v28 = vmul.f32 %v4248_v9, %v2272_v3  ;;  %v2275_v50 = vadd.f32 %v3021_v60, %v2927_v10 }
 0x269   : > { %v2414_v13 = vadd.f32 %v4254_v32, %v2375_v28  ;;  %v2376_v46 = vmul.f32 %v4248_v9, %v2275_v50  ;;  %v3036_v63 = vpop.f32.mrb[40].mxu1 }
 0x26a   : > { %v2336_v61 = vadd.f32 %v3036_v63, %v4196_v43  ;;  %v2327_v58 = vpop.f32.mrb[41].mxu1 }
 0x26b   : > { %v2446_v12 = vmax.f32 %v2414_v13, 0.0  ;;  %v2415_v22 = vadd.f32 %v4254_v32, %v2376_v46  ;;  %v2328_v6 = vadd.f32 %v4164_v35, %v2327_v58  ;;  %v3037_v41 = vpop.f32.mrb[42].mxu1 }
 0x26c   : > { %v2391_v52 = vmul.f32 %v4248_v9, %v2336_v61  ;;  %v2339_v0 = vadd.f32 %v3037_v41, %v4200_v57  ;;  %v2330_v1 = vpop.f32.mrb[43].mxu1 }
 0x26d   : > { %v2775_v51 = vpack.c.bf16 %v2446_v12, %v2446_v12  ;;  %v2447_v26 = vmax.f32 %v2415_v22, 0.0  ;;  %v2389_v29 = vmul.f32 %v4248_v9, %v2328_v6  ;;  %v2331_v2 = vadd.f32 %v4168_v45, %v2330_v1 }
 0x26e   : > { %v2430_v43 = vadd.f32 %v4254_v32, %v2391_v52  ;;  %v2392_v53 = vmul.f32 %v4248_v9, %v2339_v0 }
 0x26f   : > { %2607 = vst.msk [vmem:[%s4271_s20 + $0x28] sm:$0xf] %vm2596_vm5, %v2775_v51  ;;  %v2776_v35 = vpack.c.bf16 %v2447_v26, %v2447_v26  ;;  %v2428_v60 = vadd.f32 %v4254_v32, %v2389_v29  ;;  %v2390_v56 = vmul.f32 %v4248_v9, %v2331_v2 }
 0x270   : > { %v2462_v57 = vmax.f32 %v2430_v43, 0.0  ;;  %v2431_v4 = vadd.f32 %v4254_v32, %v2392_v53 }
 0x271   : > { %2608 = vst.msk [vmem:[%s4271_s20 + $0x2c] sm:$0xf] %vm2596_vm5, %v2776_v35  ;;  %v2460_v54 = vmax.f32 %v2428_v60, 0.0  ;;  %v2429_v45 = vadd.f32 %v4254_v32, %v2390_v56  ;;  %v3040_v17 = vpop.f32.mrb[44].mxu1 }
 0x272   : > { %v2791_v47 = vpack.c.bf16 %v2462_v57, %v2462_v57  ;;  %v2463_v49 = vmax.f32 %v2431_v4, 0.0  ;;  %v2352_v24 = vadd.f32 %v3040_v17, %v4241_v59  ;;  %v2343_v8 = vpop.f32.mrb[45].mxu1 }
 0x273   : > { %v2789_v7 = vpack.c.bf16 %v2460_v54, %v2460_v54  ;;  %v2461_v20 = vmax.f32 %v2429_v45, 0.0  ;;  %v2344_v42 = vadd.f32 %v4228_v55, %v2343_v8  ;;  %v3041_v15 = vpop.f32.mrb[46].mxu1 }
 0x274   : > { %2623 = vst.msk [vmem:[%s4271_s20 + $0x68] sm:$0xf] %vm2596_vm5, %v2791_v47  ;;  %v2792_v23 = vpack.c.bf16 %v2463_v49, %v2463_v49  ;;  %v2395_v33 = vmul.f32 %v4248_v9, %v2352_v24  ;;  %v2355_v21 = vadd.f32 %v3041_v15, %v4243_v5  ;;  %v2346_v31 = vpop.f32.mrb[47].mxu1 }
 0x275   : > { %2621 = vst.msk [vmem:[%s4271_s20 + $0x60] sm:$0xf] %vm2596_vm5, %v2789_v7  ;;  %v2790_v25 = vpack.c.bf16 %v2461_v20, %v2461_v20  ;;  %v2393_v59 = vmul.f32 %v4248_v9, %v2344_v42  ;;  %v2347_v11 = vadd.f32 %v4232_v44, %v2346_v31 }
 0x276   : > { %2624 = vst.msk [vmem:[%s4271_s20 + $0x6c] sm:$0xf] %vm2596_vm5, %v2792_v23  ;;  %v2434_v55 = vadd.f32 %v4254_v32, %v2395_v33  ;;  %v2396_v39 = vmul.f32 %v4248_v9, %v2355_v21 }
 0x277   : > { %2622 = vst.msk [vmem:[%s4271_s20 + $0x64] sm:$0xf] %vm2596_vm5, %v2790_v25  ;;  %v2432_v40 = vadd.f32 %v4254_v32, %v2393_v59  ;;  %v2394_v5 = vmul.f32 %v4248_v9, %v2347_v11 }
 0x278   : > { %v2466_v3 = vmax.f32 %v2434_v55, 0.0  ;;  %v2435_v10 = vadd.f32 %v4254_v32, %v2396_v39 }
 0x279   : > { %v2464_v28 = vmax.f32 %v2432_v40, 0.0  ;;  %v2433_v44 = vadd.f32 %v4254_v32, %v2394_v5  ;;  %v2928_v50 = vpop.f32.mrb[24].mxu0 }
 0x27a   : > { %v2795_v13 = vpack.c.bf16 %v2466_v3, %v2466_v3  ;;  %v2467_v46 = vmax.f32 %v2435_v10, 0.0  ;;  %v2929_v63 = vpop.f32.mrb[25].mxu0 }
 0x27b   : > { %v2793_v61 = vpack.c.bf16 %v2464_v28, %v2464_v28  ;;  %v2465_v58 = vmax.f32 %v2433_v44, 0.0  ;;  %v2930_v12 = vadd.f32 %v2929_v63, %v2928_v50  ;;  %v2931_v22 = vpop.f32.mrb[26].mxu0 }
 0x27c   : > { %2627 = vst.msk [vmem:[%s4271_s20 + $0x78] sm:$0xf] %vm2596_vm5, %v2795_v13  ;;  %v2796_v6 = vpack.c.bf16 %v2467_v46, %v2467_v46  ;;  %v2932_v41 = vpop.f32.mrb[27].mxu0 }
 0x27d   : > { %2625 = vst.msk [vmem:[%s4271_s20 + $0x70] sm:$0xf] %vm2596_vm5, %v2793_v61  ;;  %v2794_v52 = vpack.c.bf16 %v2465_v58, %v2465_v58  ;;  %v2280_v0 = vadd.f32 %v2930_v12, %v4305_v18  ;;  %v2933_v1 = vadd.f32 %v2932_v41, %v2931_v22 }
 0x27e   : > { %2628 = vst.msk [vmem:[%s4271_s20 + $0x7c] sm:$0xf] %vm2596_vm5, %v2796_v6 }
 0x27f   : > { %2626 = vst.msk [vmem:[%s4271_s20 + $0x74] sm:$0xf] %vm2596_vm5, %v2794_v52  ;;  %v2377_v51 = vmul.f32 %v4248_v9, %v2280_v0  ;;  %v2283_v26 = vadd.f32 %v2933_v1, %v4310_v36 }
 0x281   : > { %v2416_v29 = vadd.f32 %v4254_v32, %v2377_v51  ;;  %v2378_v2 = vmul.f32 %v4248_v9, %v2283_v26 }
 0x283   : > { %v2448_v43 = vmax.f32 %v2416_v29, 0.0  ;;  %v2417_v53 = vadd.f32 %v4254_v32, %v2378_v2 }
 0x285   : > { %v2777_v35 = vpack.c.bf16 %v2448_v43, %v2448_v43  ;;  %v2449_v60 = vmax.f32 %v2417_v53, 0.0 }
 0x287   : > { %2609 = vst.msk [vmem:[%s4271_s20 + $0x30] sm:$0xf] %vm2596_vm5, %v2777_v35  ;;  %v2778_v18 = vpack.c.bf16 %v2449_v60, %v2449_v60 }
 0x289   : > { %2610 = vst.msk [vmem:[%s4271_s20 + $0x34] sm:$0xf] %vm2596_vm5, %v2778_v18 }
 0x291   : > { %v2934_v56 = vpop.f32.mrb[28].mxu0 }
 0x292   : > { %v2935_v57 = vpop.f32.mrb[29].mxu0 }
 0x293   : > { %v2936_v4 = vadd.f32 %v2935_v57, %v2934_v56  ;;  %v2937_v36 = vpop.f32.mrb[30].mxu0 }
 0x294   : > { %v2938_v54 = vpop.f32.mrb[31].mxu0 }
 0x295   : > { %v2288_v45 = vadd.f32 %v4303_v14, %v2936_v4  ;;  %v2939_v17 = vadd.f32 %v2938_v54, %v2937_v36 }
 0x297   : > { %v2379_v47 = vmul.f32 %v4248_v9, %v2288_v45  ;;  %v2291_v49 = vadd.f32 %v4308_v27, %v2939_v17 }
 0x299   : > { %v2418_v24 = vadd.f32 %v4254_v32, %v2379_v47  ;;  %v2380_v8 = vmul.f32 %v4248_v9, %v2291_v49 }
 0x29b   : > { %v2450_v7 = vmax.f32 %v2418_v24, 0.0  ;;  %v2419_v20 = vadd.f32 %v4254_v32, %v2380_v8 }
 0x29d   : > { %v2779_v42 = vpack.c.bf16 %v2450_v7, %v2450_v7  ;;  %v2451_v15 = vmax.f32 %v2419_v20, 0.0 }
 0x29f   : > { %2611 = vst.msk [vmem:[%s4271_s20 + $0x38] sm:$0xf] %vm2596_vm5, %v2779_v42  ;;  %v2780_v23 = vpack.c.bf16 %v2451_v15, %v2451_v15 }
 0x2a1   : > { %2612 = vst.msk [vmem:[%s4271_s20 + $0x3c] sm:$0xf] %vm2596_vm5, %v2780_v23 }
 0x2a9   : > { %v2940_v14 = vpop.f32.mrb[32].mxu0 }
 0x2aa   : > { %v2941_v33 = vpop.f32.mrb[33].mxu0 }
 0x2ab   : > { %v2942_v21 = vadd.f32 %v2941_v33, %v2940_v14  ;;  %v2943_v27 = vpop.f32.mrb[34].mxu0 }
 0x2ac   : > { %v2944_v31 = vpop.f32.mrb[35].mxu0 }
 0x2ad   : > { %v2296_v25 = vadd.f32 %v2942_v21, %v4318_v38  ;;  %v2945_v59 = vadd.f32 %v2944_v31, %v2943_v27 }
 0x2af   : > { %v2381_v11 = vmul.f32 %v4248_v9, %v2296_v25  ;;  %v2299_v55 = vadd.f32 %v2945_v59, %v4322_v19 }
 0x2b1   : > { %v2420_v39 = vadd.f32 %v4254_v32, %v2381_v11  ;;  %v2382_v40 = vmul.f32 %v4248_v9, %v2299_v55 }
 0x2b3   : > { %v2452_v5 = vmax.f32 %v2420_v39, 0.0  ;;  %v2421_v3 = vadd.f32 %v4254_v32, %v2382_v40 }
 0x2b5   : > { %v2781_v10 = vpack.c.bf16 %v2452_v5, %v2452_v5  ;;  %v2453_v28 = vmax.f32 %v2421_v3, 0.0 }
 0x2b7   : > { %2613 = vst.msk [vmem:[%s4271_s20 + $0x40] sm:$0xf] %vm2596_vm5, %v2781_v10  ;;  %v2782_v44 = vpack.c.bf16 %v2453_v28, %v2453_v28 }
 0x2b9   : > { %2614 = vst.msk [vmem:[%s4271_s20 + $0x44] sm:$0xf] %vm2596_vm5, %v2782_v44 }
 0x2c1   : > { %v2946_v38 = vpop.f32.mrb[36].mxu0 }
 0x2c2   : > { %v2947_v50 = vpop.f32.mrb[37].mxu0 }
 0x2c3   : > { %v2948_v13 = vadd.f32 %v2947_v50, %v2946_v38  ;;  %v2949_v19 = vpop.f32.mrb[38].mxu0 }
 0x2c4   : > { %v2950_v46 = vpop.f32.mrb[39].mxu0 }
 0x2c5   : > { %v2304_v63 = vadd.f32 %v4316_v37, %v2948_v13  ;;  %v2951_v61 = vadd.f32 %v2950_v46, %v2949_v19 }
 0x2c7   : > { %v2383_v58 = vmul.f32 %v4248_v9, %v2304_v63  ;;  %v2307_v12 = vadd.f32 %v4320_v62, %v2951_v61 }
 0x2c9   : > { %v2422_v22 = vadd.f32 %v4254_v32, %v2383_v58  ;;  %v2384_v6 = vmul.f32 %v4248_v9, %v2307_v12 }
 0x2cb   : > { %v2454_v41 = vmax.f32 %v2422_v22, 0.0  ;;  %v2423_v52 = vadd.f32 %v4254_v32, %v2384_v6 }
 0x2cd   : > { %v2783_v0 = vpack.c.bf16 %v2454_v41, %v2454_v41  ;;  %v2455_v1 = vmax.f32 %v2423_v52, 0.0 }
 0x2cf   : > { %2615 = vst.msk [vmem:[%s4271_s20 + $0x48] sm:$0xf] %vm2596_vm5, %v2783_v0  ;;  %v2784_v51 = vpack.c.bf16 %v2455_v1, %v2455_v1 }
 0x2d1   : > { %2616 = vst.msk [vmem:[%s4271_s20 + $0x4c] sm:$0xf] %vm2596_vm5, %v2784_v51 }
 0x2d9   : > { %v2952_v37 = vpop.f32.mrb[40].mxu0 }
 0x2da   : > { %v2953_v26 = vpop.f32.mrb[41].mxu0 }
 0x2db   : > { %v2954_v29 = vadd.f32 %v2953_v26, %v2952_v37  ;;  %v2955_v62 = vpop.f32.mrb[42].mxu0 }
 0x2dc   : > { %v2956_v2 = vpop.f32.mrb[43].mxu0 }
 0x2dd   : > { %v2312_v43 = vadd.f32 %v2954_v29, %v4326_v30  ;;  %v2957_v53 = vadd.f32 %v2956_v2, %v2955_v62 }
 0x2df   : > { %v2385_v35 = vmul.f32 %v4248_v9, %v2312_v43  ;;  %v2315_v60 = vadd.f32 %v2957_v53, %v4330_v34 }
 0x2e1   : > { %v2424_v18 = vadd.f32 %v4254_v32, %v2385_v35  ;;  %v2386_v56 = vmul.f32 %v4248_v9, %v2315_v60 }
 0x2e3   : > { %v2456_v57 = vmax.f32 %v2424_v18, 0.0  ;;  %v2425_v4 = vadd.f32 %v4254_v32, %v2386_v56 }
 0x2e5   : > { %v2785_v36 = vpack.c.bf16 %v2456_v57, %v2456_v57  ;;  %v2457_v54 = vmax.f32 %v2425_v4, 0.0 }
 0x2e7   : > { %2617 = vst.msk [vmem:[%s4271_s20 + $0x50] sm:$0xf] %vm2596_vm5, %v2785_v36  ;;  %v2786_v45 = vpack.c.bf16 %v2457_v54, %v2457_v54 }
 0x2e9   : > { %2618 = vst.msk [vmem:[%s4271_s20 + $0x54] sm:$0xf] %vm2596_vm5, %v2786_v45 }
 0x2f1   : > { %v2958_v30 = vpop.f32.mrb[44].mxu0 }
 0x2f2   : > { %v2959_v17 = vpop.f32.mrb[45].mxu0 }
 0x2f3   : > { %v2960_v47 = vadd.f32 %v2959_v17, %v2958_v30  ;;  %v2961_v34 = vpop.f32.mrb[46].mxu0 }
 0x2f4   : > { %v2962_v49 = vpop.f32.mrb[47].mxu0 }
 0x2f5   : > { %v2320_v24 = vadd.f32 %v4324_v48, %v2960_v47  ;;  %v2963_v8 = vadd.f32 %v2962_v49, %v2961_v34 }
 0x2f7   : > { %v2387_v7 = vmul.f32 %v4248_v9, %v2320_v24  ;;  %v2323_v20 = vadd.f32 %v4328_v16, %v2963_v8 }
 0x2f9   : > { %v2426_v42 = vadd.f32 %v4254_v32, %v2387_v7  ;;  %v2388_v15 = vmul.f32 %v4248_v9, %v2323_v20 }
 0x2fb   : > { %v2458_v23 = vmax.f32 %v2426_v42, 0.0  ;;  %v2427_v14 = vadd.f32 %v4254_v32, %v2388_v15 }
 0x2fd   : > { %v2787_v33 = vpack.c.bf16 %v2458_v23, %v2458_v23  ;;  %v2459_v21 = vmax.f32 %v2427_v14, 0.0 }
 0x2ff   : > { %2619 = vst.msk [vmem:[%s4271_s20 + $0x58] sm:$0xf] %vm2596_vm5, %v2787_v33  ;;  %v2788_v27 = vpack.c.bf16 %v2459_v21, %v2459_v21 }
 0x301   : > { %2620 = vst.msk [vmem:[%s4271_s20 + $0x5c] sm:$0xf] %vm2596_vm5, %v2788_v27 }
 0x302 PF: > { %s14_s15 = sadd.s32 1, %s3094_s15  }
 0x303   : > { %p11_p4 = scmp.ge.s32.totalorder %s14_s15, 4  }
 0x305   :  { %13 = sbr.rel (!%p11_p4) target bundleno = 1 (0x1), region = 68 }

</bundles_post_ra>
